<compile_context>
chip_gen: v7x
topology: tpu7x:2x2x1
jax: 0.10.0
libtpu: 0.0.40
codegen_flags: <defaults>
</compile_context>

<pallas_src>
import functools

import jax
import jax.numpy as jnp
from jax.experimental import pallas as pl
from jax.experimental.pallas import tpu as pltpu


# ---------------------------------------------------------------------------
# Kernel 1: one-off prep (Chebyshev supports, per-node biases, attention context)
# ---------------------------------------------------------------------------

def _make_prep_kernel(num_layers, cheb_k, input_window):
    def kernel(*refs):
        (nv1_ref, nv2_ref, emb_ref, state_ref, enc_ref,
         was_ref, wae_ref, ba_ref, v_ref) = refs[:9]
        gbp_refs = refs[9:9 + num_layers]
        ubp_refs = refs[9 + num_layers:9 + 2 * num_layers]
        o = 9 + 2 * num_layers
        sup_ref = refs[o]                              # (K, N, N)
        w_ref = refs[o + 1]                            # (L, M, H)
        gb_refs = refs[o + 2:o + 2 + num_layers]       # (N, 2H) each
        ub_refs = refs[o + 2 + num_layers:o + 2 + 2 * num_layers]   # (N, H) each

        n = sup_ref.shape[1]
        m = state_ref.shape[1]

        # supports = softmax(relu(nodevec1 @ nodevec2), dim=1); Chebyshev stack [I, S, ...].
        prod = jnp.dot(nv1_ref[...], nv2_ref[...], preferred_element_type=jnp.float32)
        prod = jnp.maximum(prod, 0.0)
        prod = prod - jnp.max(prod, axis=1, keepdims=True)
        ex = jnp.exp(prod)
        s = ex / jnp.sum(ex, axis=1, keepdims=True)
        row = jax.lax.broadcasted_iota(jnp.int32, (n, n), 0)
        col = jax.lax.broadcasted_iota(jnp.int32, (n, n), 1)
        eye = jnp.where(row == col, 1.0, 0.0).astype(jnp.float32)
        sup_ref[0] = eye
        sup_ref[1] = s
        prev2, prev1 = eye, s
        for k in range(2, cheb_k):
            cur = 2.0 * jnp.dot(s, prev1, preferred_element_type=jnp.float32) - prev2
            sup_ref[k] = cur
            prev2, prev1 = prev1, cur

        # per-node AGCN biases: node_embeddings @ bias_pool.
        emb = emb_ref[...]
        for l in range(num_layers):
            gb_refs[l][...] = jnp.dot(emb, gbp_refs[l][...], preferred_element_type=jnp.float32)
            ub_refs[l][...] = jnp.dot(emb, ubp_refs[l][...], preferred_element_type=jnp.float32)

        # Attention context per layer.  Loop-invariant: the reference re-appends the OLD
        # state every step, so decoder_hidden never advances -> compute once here.
        enc = enc_ref[...]                                          # (T_in*M, H)
        enc_proj = jnp.dot(enc, wae_ref[...], preferred_element_type=jnp.float32)
        ba = ba_ref[...]                                            # (1, H)
        v = v_ref[...]                                              # (1, H)
        h_dim = enc.shape[1]
        for l in range(num_layers):
            s_proj = jnp.dot(state_ref[l], was_ref[...],
                             preferred_element_type=jnp.float32) + ba        # (M, H)
            cols = []
            for t in range(input_window):
                e_t = jnp.tanh(s_proj + enc_proj[t * m:(t + 1) * m, :])
                cols.append(jnp.sum(e_t * v, axis=-1, keepdims=True))        # (M, 1)
            scores = jnp.concatenate(cols, axis=-1)                          # (M, T_in)
            scores = scores - jnp.max(scores, axis=-1, keepdims=True)
            es = jnp.exp(scores)
            attn = es / jnp.sum(es, axis=-1, keepdims=True)
            acc = jnp.zeros((m, h_dim), jnp.float32)
            for t in range(input_window):
                acc = acc + attn[:, t:t + 1] * enc[t * m:(t + 1) * m, :]
            w_ref[l] = acc
    return kernel


# ---------------------------------------------------------------------------
# Kernel 2: fused per-timestep decoder (grid over output_window, carry in VMEM)
# ---------------------------------------------------------------------------

def _make_decoder_kernel(num_layers, batch, num_nodes, hidden_dim, embed_dim, cheb_k):
    B, N, H, E, K = batch, num_nodes, hidden_dim, embed_dim, cheb_k

    def kernel(*refs):
        y_prev_ref = refs[0]          # (M, out_dim + 3)
        y_lab_ref = refs[1]           # (1, M, 3) == y_labels[:, t, :, 1:4] (b-major rows)
        sup_ref = refs[2]             # (K*N, N) stacked Chebyshev supports
        emb_ref = refs[3]             # (M, E) node embeddings tiled per batch
        pos = 4
        layers = []
        for _ in range(num_layers):
            layers.append(refs[pos:pos + 6])   # weighted, state, gpool, gbias, upool, ubias
            pos += 6
        proj_w_ref = refs[pos]        # (3H, out_dim)
        proj_b_ref = refs[pos + 1]    # (1, out_dim)
        out_ref = refs[pos + 2]       # (1, M, out_dim)
        carry_ref = refs[pos + 3]     # VMEM scratch (M, out_dim + 3), persists across t

        @pl.when(pl.program_id(0) == 0)
        def _init():
            carry_ref[...] = y_prev_ref[...]

        sup = sup_ref[...]
        emb_rows = emb_ref[...]

        def agcn(x_all, pool_ref, bias_ref, co):
            """AGCN with the hypernetwork fold.  x_all: (B*N, Ci), rows b-major."""
            xg_parts = []
            for b in range(B):
                x_b = x_all[b * N:(b + 1) * N, :]                               # (N, Ci)
                mix_b = jnp.dot(sup, x_b, preferred_element_type=jnp.float32)   # (K*N, Ci)
                xg_parts.append(jnp.concatenate(
                    [mix_b[k * N:(k + 1) * N, :] for k in range(K)], axis=-1))  # (N, K*Ci)
            xg = jnp.concatenate(xg_parts, axis=0)                              # (B*N, K*Ci)
            z = jnp.dot(xg, pool_ref[...], preferred_element_type=jnp.float32)  # (B*N, E*co)
            acc = bias_ref[...]                                                 # (B*N, co)
            for e in range(E):   # contract the embedding dim on the VPU (no per-node weights)
                acc = acc + emb_rows[:, e:e + 1] * z[:, e * co:(e + 1) * co]
            return acc

        d_in = carry_ref[...]
        x_l = None
        h = None
        for l in range(num_layers):
            w_ref_l, s_ref_l, gpool_ref, gbias_ref, upool_ref, ubias_ref = layers[l]
            s_l = s_ref_l[...]                                            # (M, H)
            x_l = jnp.concatenate([d_in, w_ref_l[...]], axis=-1)          # (M, dim_in_l)
            xs = jnp.concatenate([x_l, s_l], axis=-1)                     # (M, Ci_l)
            zr = jax.nn.sigmoid(agcn(xs, gpool_ref, gbias_ref, 2 * H))    # (M, 2H)
            z_g = zr[:, :H]
            r_g = zr[:, H:]
            cand = jnp.concatenate([x_l, z_g * s_l], axis=-1)             # (M, Ci_l)
            hc = jnp.tanh(agcn(cand, upool_ref, ubias_ref, H))            # (M, H)
            h = r_g * s_l + (1.0 - r_g) * hc
            d_in = h

        proj_in = jnp.concatenate([h, x_l], axis=-1)                      # (M, 3H)
        dec_out = jnp.dot(proj_in, proj_w_ref[...],
                          preferred_element_type=jnp.float32) + proj_b_ref[...]
        out_ref[0] = dec_out
        # autoregressive input for the next step: [decoder_output, y_labels[:, t, :, 1:4]]
        carry_ref[...] = jnp.concatenate([dec_out, y_lab_ref[0]], axis=-1)
    return kernel


# ---------------------------------------------------------------------------
# Module-level forward
# ---------------------------------------------------------------------------

def atgru_decoder_forward(params, y_prev, y_labels, decoder_hidden, encoder_output,
                          node_embeddings, nodevec1, nodevec2, *,
                          hidden_dim, cheb_k, output_window, num_layers):
    assert cheb_k >= 2
    H = hidden_dim
    B, N, d0 = y_prev.shape
    E = node_embeddings.shape[1]
    T_in = encoder_output.shape[1]
    M = B * N
    out_dim = params['projection_w'].shape[1]
    K = cheb_k

    # ---- layout glue (plain XLA; transposes / flattening / tiling only) ----
    state_m = decoder_hidden.reshape(num_layers, M, H)
    enc_m = jnp.transpose(encoder_output, (1, 0, 2, 3)).reshape(T_in * M, H)
    y_prev_m = y_prev.reshape(M, d0)
    y_lab_m = jnp.transpose(y_labels[..., 1:4], (1, 0, 2, 3)).reshape(output_window, M, 3)
    emb_rows = jnp.tile(node_embeddings, (B, 1))                          # (M, E)

    wa = params['attention_linear_w']                                     # (2H, H)
    wa_s, wa_e = wa[:H], wa[H:]
    ba = params['attention_linear_b'].reshape(1, H)
    v_row = params['attn_v_w'].reshape(1, H)

    gbp = [params['cells'][l]['gate_bias_pool'] for l in range(num_layers)]
    ubp = [params['cells'][l]['update_bias_pool'] for l in range(num_layers)]

    # ---- kernel 1: supports + per-node biases + loop-invariant attention ----
    prep_out_shape = ((jax.ShapeDtypeStruct((K, N, N), jnp.float32),
                       jax.ShapeDtypeStruct((num_layers, M, H), jnp.float32))
                      + tuple(jax.ShapeDtypeStruct((N, 2 * H), jnp.float32)
                              for _ in range(num_layers))
                      + tuple(jax.ShapeDtypeStruct((N, H), jnp.float32)
                              for _ in range(num_layers)))
    prep_res = pl.pallas_call(
        _make_prep_kernel(num_layers, K, T_in),
        out_shape=prep_out_shape,
    )(nodevec1, nodevec2, node_embeddings, state_m, enc_m,
      wa_s, wa_e, ba, v_row, *gbp, *ubp)
    supports = prep_res[0]
    weighted_all = prep_res[1]
    gate_bias = prep_res[2:2 + num_layers]
    update_bias = prep_res[2 + num_layers:2 + 2 * num_layers]

    sup_flat = supports.reshape(K * N, N)

    # ---- per-layer VMEM-resident constants for the fused decoder kernel ----
    layer_args = []
    for l in range(num_layers):
        wp = params['cells'][l]['gate_weights_pool']      # (E, K, Ci, 2H)
        up = params['cells'][l]['update_weights_pool']    # (E, K, Ci, H)
        ci = wp.shape[2]
        gpool = jnp.transpose(wp, (1, 2, 0, 3)).reshape(K * ci, E * 2 * H)
        upool = jnp.transpose(up, (1, 2, 0, 3)).reshape(K * ci, E * H)
        layer_args += [weighted_all[l], state_m[l], gpool,
                       jnp.tile(gate_bias[l], (B, 1)), upool,
                       jnp.tile(update_bias[l], (B, 1))]

    proj_w = params['projection_w']
    proj_b = params['projection_b'].reshape(1, out_dim)

    def _full_spec(arr):
        zeros = (0,) * arr.ndim
        return pl.BlockSpec(arr.shape, lambda t, _z=zeros: _z)

    in_specs = [_full_spec(y_prev_m),
                pl.BlockSpec((1, M, 3), lambda t: (t, 0, 0)),
                _full_spec(sup_flat), _full_spec(emb_rows)]
    in_specs += [_full_spec(a) for a in layer_args]
    in_specs += [_full_spec(proj_w), _full_spec(proj_b)]

    # ---- kernel 2: fused per-timestep decoder, sequential grid over t ----
    out_m = pl.pallas_call(
        _make_decoder_kernel(num_layers, B, N, H, E, K),
        grid=(output_window,),
        in_specs=in_specs,
        out_specs=pl.BlockSpec((1, M, out_dim), lambda t: (t, 0, 0)),
        out_shape=jax.ShapeDtypeStruct((output_window, M, out_dim), jnp.float32),
        scratch_shapes=[pltpu.VMEM((M, d0), jnp.float32)],
        compiler_params=pltpu.CompilerParams(dimension_semantics=("arbitrary",)),
    )(y_prev_m, y_lab_m, sup_flat, emb_rows, *layer_args, proj_w, proj_b)

    return out_m.reshape(output_window, B, N, out_dim).transpose(1, 0, 2, 3)


# ---------------------------------------------------------------------------
# Pure-JAX reference (mirrors the PyTorch module, eval path) for validation
# ---------------------------------------------------------------------------

def forward_reference(params, y_prev, y_labels, decoder_hidden, encoder_output,
                      node_embeddings, nodevec1, nodevec2, *,
                      hidden_dim, cheb_k, output_window, num_layers):
    n = node_embeddings.shape[0]
    t_in = encoder_output.shape[1]
    s = jax.nn.softmax(jax.nn.relu(nodevec1 @ nodevec2), axis=1)
    support_set = [jnp.eye(n, dtype=jnp.float32), s]
    for k in range(2, cheb_k):
        support_set.append(2.0 * s @ support_set[-1] - support_set[-2])
    supports = jnp.stack(support_set, axis=0)

    def agcn(x, wp, bp):
        weights = jnp.einsum('nd,dkio->nkio', node_embeddings, wp)
        bias = node_embeddings @ bp
        x_g = jnp.einsum('knm,bmc->bknc', supports, x)
        x_g = jnp.transpose(x_g, (0, 2, 1, 3))
        return jnp.einsum('bnki,nkio->bno', x_g, weights) + bias

    def cell(cp, x, state):
        xs = jnp.concatenate([x, state], axis=-1)
        z_r = jax.nn.sigmoid(agcn(xs, cp['gate_weights_pool'], cp['gate_bias_pool']))
        z, r = z_r[..., :hidden_dim], z_r[..., hidden_dim:]
        cand = jnp.concatenate([x, z * state], axis=-1)
        hc = jnp.tanh(agcn(cand, cp['update_weights_pool'], cp['update_bias_pool']))
        return r * state + (1.0 - r) * hc

    wa = params['attention_linear_w']
    ba = params['attention_linear_b']
    v = params['attn_v_w']
    dec_hidden = [decoder_hidden[l] for l in range(num_layers)]
    decoder_input = y_prev
    outputs = []
    for t in range(output_window):
        hidden_states = []
        decoder_input_f = None
        for l in range(num_layers):
            state = dec_hidden[l]
            hidden = jnp.broadcast_to(state[:, None], (state.shape[0], t_in) + state.shape[1:])
            energy = jnp.tanh(jnp.concatenate([hidden, encoder_output], axis=-1) @ wa + ba)
            scores = jnp.squeeze(energy @ v, -1)
            attn = jax.nn.softmax(scores, axis=1)
            weighted = jnp.einsum('btn,btnh->bnh', attn, encoder_output)
            decoder_input_f = jnp.concatenate([decoder_input, weighted], axis=-1)
            decoder_input = cell(params['cells'][l], decoder_input_f, state)
            hidden_states.append(state)     # faithful: reference re-appends the OLD state
        dec_hidden = hidden_states
        decoder_output = (jnp.concatenate([decoder_input, decoder_input_f], axis=-1)
                          @ params['projection_w'] + params['projection_b'])
        decoder_input = jnp.concatenate([decoder_output, y_labels[:, t, :, 1:4]], axis=-1)
        outputs.append(decoder_output)
    return jnp.stack(outputs, axis=1)


# ---------------------------------------------------------------------------
# Deterministic parameter initialization (synthetic; shapes per module __init__)
# ---------------------------------------------------------------------------

def init_params(key, hidden_dim, embed_dim, cheb_k, out_dim, num_layers):
    keys = iter(jax.random.split(key, 64))

    def nrm(shape, scale=0.1):
        return (scale * jax.random.normal(next(keys), shape)).astype(jnp.float32)

    cells = []
    for l in range(num_layers):
        dim_in = (out_dim + 3 + hidden_dim) if l == 0 else (hidden_dim + hidden_dim)
        ci = dim_in + hidden_dim
        cells.append({
            'gate_weights_pool': nrm((embed_dim, cheb_k, ci, 2 * hidden_dim)),
            'gate_bias_pool': nrm((embed_dim, 2 * hidden_dim)),
            'update_weights_pool': nrm((embed_dim, cheb_k, ci, hidden_dim)),
            'update_bias_pool': nrm((embed_dim, hidden_dim)),
        })
    return {
        'cells': cells,
        'attention_linear_w': nrm((2 * hidden_dim, hidden_dim)),
        'attention_linear_b': nrm((hidden_dim,)),
        'attn_v_w': nrm((hidden_dim, 1)),
        'projection_w': nrm((3 * hidden_dim, out_dim)),
        'projection_b': nrm((out_dim,)),
    }


# ---------------------------------------------------------------------------
# Demo
# ---------------------------------------------------------------------------

if __name__ == "__main__":
    key = jax.random.PRNGKey(0)
    (k_params, k_yprev, k_ylab, k_hidden,
     k_enc, k_emb, k_nv1, k_nv2) = jax.random.split(key, 8)

    B, N, H, E, K, L = 2, 8, 32, 10, 2, 2        # batch, nodes, rnn_units, embed_dim, cheb_order, num_layers
    T_IN, T_OUT, OUT_DIM = 4, 2, 1               # input_window, output_window, end_dim - start_dim

    params = init_params(k_params, H, E, K, OUT_DIM, L)

    y_prev = jax.random.normal(k_yprev, (B, N, OUT_DIM + 3), jnp.float32)
    y_labels = jax.random.normal(k_ylab, (B, T_OUT, N, 4), jnp.float32)
    decoder_hidden = jax.random.normal(k_hidden, (L, B, N, H), jnp.float32)
    encoder_output = jax.random.normal(k_enc, (B, T_IN, N, H), jnp.float32)
    node_embeddings = 0.5 * jax.random.normal(k_emb, (N, E), jnp.float32)
    nodevec1 = jax.random.normal(k_nv1, (N, E), jnp.float32)
    nodevec2 = jax.random.normal(k_nv2, (E, N), jnp.float32)

    fwd = jax.jit(functools.partial(
        atgru_decoder_forward,
        hidden_dim=H, cheb_k=K, output_window=T_OUT, num_layers=L))

    out = jax.block_until_ready(fwd(params, y_prev, y_labels, decoder_hidden, encoder_output,
                                    node_embeddings, nodevec1, nodevec2))
    assert out.shape == (B, T_OUT, N, OUT_DIM), out.shape
    assert bool(jnp.all(jnp.isfinite(out)))

    ref = forward_reference(params, y_prev, y_labels, decoder_hidden, encoder_output,
                            node_embeddings, nodevec1, nodevec2,
                            hidden_dim=H, cheb_k=K, output_window=T_OUT, num_layers=L)
    err = float(jnp.max(jnp.abs(out - ref)))
    assert err < 1e-1, f"kernel/reference mismatch: max abs err {err}"

    print("KERNEL_OK")
</pallas_src>

<mosaic_0001>
module attributes {stable_mosaic.version = 11 : i64} {
  func.func @kernel(%arg0: memref<8x10xf32, #tpu.memory_space<vmem>>, %arg1: memref<10x8xf32, #tpu.memory_space<vmem>>, %arg2: memref<8x10xf32, #tpu.memory_space<vmem>>, %arg3: memref<2x16x32xf32, #tpu.memory_space<vmem>>, %arg4: memref<64x32xf32, #tpu.memory_space<vmem>>, %arg5: memref<32x32xf32, #tpu.memory_space<vmem>>, %arg6: memref<32x32xf32, #tpu.memory_space<vmem>>, %arg7: memref<1x32xf32, #tpu.memory_space<vmem>>, %arg8: memref<1x32xf32, #tpu.memory_space<vmem>>, %arg9: memref<10x64xf32, #tpu.memory_space<vmem>>, %arg10: memref<10x64xf32, #tpu.memory_space<vmem>>, %arg11: memref<10x32xf32, #tpu.memory_space<vmem>>, %arg12: memref<10x32xf32, #tpu.memory_space<vmem>>, %arg13: memref<2x8x8xf32, #tpu.memory_space<vmem>>, %arg14: memref<2x16x32xf32, #tpu.memory_space<vmem>>, %arg15: memref<8x64xf32, #tpu.memory_space<vmem>>, %arg16: memref<8x64xf32, #tpu.memory_space<vmem>>, %arg17: memref<8x32xf32, #tpu.memory_space<vmem>>, %arg18: memref<8x32xf32, #tpu.memory_space<vmem>>) attributes {dimension_semantics = [], scalar_prefetch = 0 : i64, scratch_operands = 0 : i64, tpu.core_type = #tpu.core_type<tc>} {
    %c0 = arith.constant 0 : index
    %c0_0 = arith.constant 0 : index
    %0 = vector.load %arg0[%c0, %c0_0] : memref<8x10xf32, #tpu.memory_space<vmem>>, vector<8x10xf32>
    %c0_1 = arith.constant 0 : index
    %c0_2 = arith.constant 0 : index
    %1 = vector.load %arg1[%c0_1, %c0_2] : memref<10x8xf32, #tpu.memory_space<vmem>>, vector<10x8xf32>
    %cst = arith.constant dense<0.000000e+00> : vector<8x8xf32>
    %2 = tpu.matmul %0, %1, %cst {dimension_numbers = #tpu.dot_dimension_numbers<[1], [0], [0], [1], [0, 0, 1, 1], [], []>} : vector<8x10xf32>, vector<10x8xf32>, vector<8x8xf32> -> vector<8x8xf32>
    %cst_3 = arith.constant 0.000000e+00 : f32
    %3 = vector.broadcast %cst_3 : f32 to vector<8x8xf32>
    %4 = arith.maximumf %2, %3 : vector<8x8xf32>
    %cst_4 = arith.constant dense<0xFF800000> : vector<8xf32>
    %5 = vector.multi_reduction <maximumf>, %4, %cst_4 [1] : vector<8x8xf32> to vector<8xf32>
    %6 = vector.shape_cast %5 : vector<8xf32> to vector<8x1xf32>
    %7 = vector.broadcast %6 : vector<8x1xf32> to vector<8x8xf32>
    %8 = arith.subf %4, %7 : vector<8x8xf32>
    %9 = math.exp %8 : vector<8x8xf32>
    %cst_5 = arith.constant dense<0.000000e+00> : vector<8xf32>
    %10 = vector.multi_reduction <add>, %9, %cst_5 [1] : vector<8x8xf32> to vector<8xf32>
    %11 = vector.shape_cast %10 : vector<8xf32> to vector<8x1xf32>
    %12 = vector.broadcast %11 : vector<8x1xf32> to vector<8x8xf32>
    %13 = arith.divf %9, %12 : vector<8x8xf32>
    %14 = tpu.iota {dimensions = array<i32: 0>} : vector<8x8xi32>
    %15 = tpu.iota {dimensions = array<i32: 1>} : vector<8x8xi32>
    %16 = arith.cmpi eq, %14, %15 : vector<8x8xi32>
    %cst_6 = arith.constant 1.000000e+00 : f32
    %cst_7 = arith.constant 0.000000e+00 : f32
    %17 = vector.broadcast %cst_6 : f32 to vector<8x8xf32>
    %18 = vector.broadcast %cst_7 : f32 to vector<8x8xf32>
    %19 = arith.select %16, %17, %18 : vector<8x8xi1>, vector<8x8xf32>
    %c0_8 = arith.constant 0 : index
    %c0_9 = arith.constant 0 : index
    %c0_10 = arith.constant 0 : index
    %20 = vector.load %arg13[%c0_8, %c0_9, %c0_10] : memref<2x8x8xf32, #tpu.memory_space<vmem>>, vector<1x8x8xf32>
    %21 = vector.shape_cast %20 : vector<1x8x8xf32> to vector<8x8xf32>
    %22 = vector.shape_cast %19 : vector<8x8xf32> to vector<1x8x8xf32>
    tpu.vector_store %arg13[%c0_8, %c0_9, %c0_10], %22 {strides = array<i32>} : memref<2x8x8xf32, #tpu.memory_space<vmem>>, vector<1x8x8xf32>,
    %c1 = arith.constant 1 : index
    %c0_11 = arith.constant 0 : index
    %c0_12 = arith.constant 0 : index
    %23 = vector.load %arg13[%c1, %c0_11, %c0_12] : memref<2x8x8xf32, #tpu.memory_space<vmem>>, vector<1x8x8xf32>
    %24 = vector.shape_cast %23 : vector<1x8x8xf32> to vector<8x8xf32>
    %25 = vector.shape_cast %13 : vector<8x8xf32> to vector<1x8x8xf32>
    tpu.vector_store %arg13[%c1, %c0_11, %c0_12], %25 {strides = array<i32>} : memref<2x8x8xf32, #tpu.memory_space<vmem>>, vector<1x8x8xf32>,
    %c0_13 = arith.constant 0 : index
    %c0_14 = arith.constant 0 : index
    %26 = vector.load %arg2[%c0_13, %c0_14] : memref<8x10xf32, #tpu.memory_space<vmem>>, vector<8x10xf32>
    %c0_15 = arith.constant 0 : index
    %c0_16 = arith.constant 0 : index
    %27 = vector.load %arg9[%c0_15, %c0_16] : memref<10x64xf32, #tpu.memory_space<vmem>>, vector<10x64xf32>
    %cst_17 = arith.constant dense<0.000000e+00> : vector<8x64xf32>
    %28 = tpu.matmul %26, %27, %cst_17 {dimension_numbers = #tpu.dot_dimension_numbers<[1], [0], [0], [1], [0, 0, 1, 1], [], []>} : vector<8x10xf32>, vector<10x64xf32>, vector<8x64xf32> -> vector<8x64xf32>
    %c0_18 = arith.constant 0 : index
    %c0_19 = arith.constant 0 : index
    %29 = vector.load %arg15[%c0_18, %c0_19] : memref<8x64xf32, #tpu.memory_space<vmem>>, vector<8x64xf32>
    tpu.vector_store %arg15[%c0_18, %c0_19], %28 {strides = array<i32>} : memref<8x64xf32, #tpu.memory_space<vmem>>, vector<8x64xf32>,
    %c0_20 = arith.constant 0 : index
    %c0_21 = arith.constant 0 : index
    %30 = vector.load %arg11[%c0_20, %c0_21] : memref<10x32xf32, #tpu.memory_space<vmem>>, vector<10x32xf32>
    %cst_22 = arith.constant dense<0.000000e+00> : vector<8x32xf32>
    %31 = tpu.matmul %26, %30, %cst_22 {dimension_numbers = #tpu.dot_dimension_numbers<[1], [0], [0], [1], [0, 0, 1, 1], [], []>} : vector<8x10xf32>, vector<10x32xf32>, vector<8x32xf32> -> vector<8x32xf32>
    %c0_23 = arith.constant 0 : index
    %c0_24 = arith.constant 0 : index
    %32 = vector.load %arg17[%c0_23, %c0_24] : memref<8x32xf32, #tpu.memory_space<vmem>>, vector<8x32xf32>
    tpu.vector_store %arg17[%c0_23, %c0_24], %31 {strides = array<i32>} : memref<8x32xf32, #tpu.memory_space<vmem>>, vector<8x32xf32>,
    %c0_25 = arith.constant 0 : index
    %c0_26 = arith.constant 0 : index
    %33 = vector.load %arg10[%c0_25, %c0_26] : memref<10x64xf32, #tpu.memory_space<vmem>>, vector<10x64xf32>
    %cst_27 = arith.constant dense<0.000000e+00> : vector<8x64xf32>
    %34 = tpu.matmul %26, %33, %cst_27 {dimension_numbers = #tpu.dot_dimension_numbers<[1], [0], [0], [1], [0, 0, 1, 1], [], []>} : vector<8x10xf32>, vector<10x64xf32>, vector<8x64xf32> -> vector<8x64xf32>
    %c0_28 = arith.constant 0 : index
    %c0_29 = arith.constant 0 : index
    %35 = vector.load %arg16[%c0_28, %c0_29] : memref<8x64xf32, #tpu.memory_space<vmem>>, vector<8x64xf32>
    tpu.vector_store %arg16[%c0_28, %c0_29], %34 {strides = array<i32>} : memref<8x64xf32, #tpu.memory_space<vmem>>, vector<8x64xf32>,
    %c0_30 = arith.constant 0 : index
    %c0_31 = arith.constant 0 : index
    %36 = vector.load %arg12[%c0_30, %c0_31] : memref<10x32xf32, #tpu.memory_space<vmem>>, vector<10x32xf32>
    %cst_32 = arith.constant dense<0.000000e+00> : vector<8x32xf32>
    %37 = tpu.matmul %26, %36, %cst_32 {dimension_numbers = #tpu.dot_dimension_numbers<[1], [0], [0], [1], [0, 0, 1, 1], [], []>} : vector<8x10xf32>, vector<10x32xf32>, vector<8x32xf32> -> vector<8x32xf32>
    %c0_33 = arith.constant 0 : index
    %c0_34 = arith.constant 0 : index
    %38 = vector.load %arg18[%c0_33, %c0_34] : memref<8x32xf32, #tpu.memory_space<vmem>>, vector<8x32xf32>
    tpu.vector_store %arg18[%c0_33, %c0_34], %37 {strides = array<i32>} : memref<8x32xf32, #tpu.memory_space<vmem>>, vector<8x32xf32>,
    %c0_35 = arith.constant 0 : index
    %c0_36 = arith.constant 0 : index
    %39 = vector.load %arg4[%c0_35, %c0_36] : memref<64x32xf32, #tpu.memory_space<vmem>>, vector<64x32xf32>
    %c0_37 = arith.constant 0 : index
    %c0_38 = arith.constant 0 : index
    %40 = vector.load %arg6[%c0_37, %c0_38] : memref<32x32xf32, #tpu.memory_space<vmem>>, vector<32x32xf32>
    %cst_39 = arith.constant dense<0.000000e+00> : vector<64x32xf32>
    %41 = tpu.matmul %39, %40, %cst_39 {dimension_numbers = #tpu.dot_dimension_numbers<[1], [0], [0], [1], [0, 0, 1, 1], [], []>} : vector<64x32xf32>, vector<32x32xf32>, vector<64x32xf32> -> vector<64x32xf32>
    %c0_40 = arith.constant 0 : index
    %c0_41 = arith.constant 0 : index
    %42 = vector.load %arg7[%c0_40, %c0_41] : memref<1x32xf32, #tpu.memory_space<vmem>>, vector<1x32xf32>
    %c0_42 = arith.constant 0 : index
    %c0_43 = arith.constant 0 : index
    %43 = vector.load %arg8[%c0_42, %c0_43] : memref<1x32xf32, #tpu.memory_space<vmem>>, vector<1x32xf32>
    %c0_44 = arith.constant 0 : index
    %c0_45 = arith.constant 0 : index
    %c0_46 = arith.constant 0 : index
    %44 = vector.load %arg3[%c0_44, %c0_45, %c0_46] : memref<2x16x32xf32, #tpu.memory_space<vmem>>, vector<1x16x32xf32>
    %45 = vector.shape_cast %44 : vector<1x16x32xf32> to vector<16x32xf32>
    %c0_47 = arith.constant 0 : index
    %c0_48 = arith.constant 0 : index
    %46 = vector.load %arg5[%c0_47, %c0_48] : memref<32x32xf32, #tpu.memory_space<vmem>>, vector<32x32xf32>
    %cst_49 = arith.constant dense<0.000000e+00> : vector<16x32xf32>
    %47 = tpu.matmul %45, %46, %cst_49 {dimension_numbers = #tpu.dot_dimension_numbers<[1], [0], [0], [1], [0, 0, 1, 1], [], []>} : vector<16x32xf32>, vector<32x32xf32>, vector<16x32xf32> -> vector<16x32xf32>
    %48 = vector.broadcast %42 : vector<1x32xf32> to vector<16x32xf32>
    %49 = arith.addf %47, %48 : vector<16x32xf32>
    %50 = vector.extract_strided_slice %41 {offsets = [0, 0], sizes = [16, 32], strides = [1, 1]} : vector<64x32xf32> to vector<16x32xf32>
    %51 = arith.addf %49, %50 : vector<16x32xf32>
    %52 = math.tanh %51 : vector<16x32xf32>
    %53 = vector.broadcast %43 : vector<1x32xf32> to vector<16x32xf32>
    %54 = arith.mulf %52, %53 : vector<16x32xf32>
    %cst_50 = arith.constant dense<0.000000e+00> : vector<16xf32>
    %55 = vector.multi_reduction <add>, %54, %cst_50 [1] : vector<16x32xf32> to vector<16xf32>
    %56 = vector.shape_cast %55 : vector<16xf32> to vector<16x1xf32>
    %57 = vector.extract_strided_slice %41 {offsets = [16, 0], sizes = [16, 32], strides = [1, 1]} : vector<64x32xf32> to vector<16x32xf32>
    %58 = arith.addf %49, %57 : vector<16x32xf32>
    %59 = math.tanh %58 : vector<16x32xf32>
    %60 = vector.broadcast %43 : vector<1x32xf32> to vector<16x32xf32>
    %61 = arith.mulf %59, %60 : vector<16x32xf32>
    %cst_51 = arith.constant dense<0.000000e+00> : vector<16xf32>
    %62 = vector.multi_reduction <add>, %61, %cst_51 [1] : vector<16x32xf32> to vector<16xf32>
    %63 = vector.shape_cast %62 : vector<16xf32> to vector<16x1xf32>
    %64 = vector.extract_strided_slice %41 {offsets = [32, 0], sizes = [16, 32], strides = [1, 1]} : vector<64x32xf32> to vector<16x32xf32>
    %65 = arith.addf %49, %64 : vector<16x32xf32>
    %66 = math.tanh %65 : vector<16x32xf32>
    %67 = vector.broadcast %43 : vector<1x32xf32> to vector<16x32xf32>
    %68 = arith.mulf %66, %67 : vector<16x32xf32>
    %cst_52 = arith.constant dense<0.000000e+00> : vector<16xf32>
    %69 = vector.multi_reduction <add>, %68, %cst_52 [1] : vector<16x32xf32> to vector<16xf32>
    %70 = vector.shape_cast %69 : vector<16xf32> to vector<16x1xf32>
    %71 = vector.extract_strided_slice %41 {offsets = [48, 0], sizes = [16, 32], strides = [1, 1]} : vector<64x32xf32> to vector<16x32xf32>
    %72 = arith.addf %49, %71 : vector<16x32xf32>
    %73 = math.tanh %72 : vector<16x32xf32>
    %74 = vector.broadcast %43 : vector<1x32xf32> to vector<16x32xf32>
    %75 = arith.mulf %73, %74 : vector<16x32xf32>
    %cst_53 = arith.constant dense<0.000000e+00> : vector<16xf32>
    %76 = vector.multi_reduction <add>, %75, %cst_53 [1] : vector<16x32xf32> to vector<16xf32>
    %77 = vector.shape_cast %76 : vector<16xf32> to vector<16x1xf32>
    %78 = tpu.concatenate %56, %63, %70, %77 in 1 : vector<16x1xf32>, vector<16x1xf32>, vector<16x1xf32>, vector<16x1xf32> -> vector<16x4xf32>
    %cst_54 = arith.constant dense<0xFF800000> : vector<16xf32>
    %79 = vector.multi_reduction <maximumf>, %78, %cst_54 [1] : vector<16x4xf32> to vector<16xf32>
    %80 = vector.shape_cast %79 : vector<16xf32> to vector<16x1xf32>
    %81 = vector.broadcast %80 : vector<16x1xf32> to vector<16x4xf32>
    %82 = arith.subf %78, %81 : vector<16x4xf32>
    %83 = math.exp %82 : vector<16x4xf32>
    %cst_55 = arith.constant dense<0.000000e+00> : vector<16xf32>
    %84 = vector.multi_reduction <add>, %83, %cst_55 [1] : vector<16x4xf32> to vector<16xf32>
    %85 = vector.shape_cast %84 : vector<16xf32> to vector<16x1xf32>
    %86 = vector.broadcast %85 : vector<16x1xf32> to vector<16x4xf32>
    %87 = arith.divf %83, %86 : vector<16x4xf32>
    %cst_56 = arith.constant 0.000000e+00 : f32
    %88 = vector.broadcast %cst_56 : f32 to vector<16x32xf32>
    %89 = vector.extract_strided_slice %87 {offsets = [0, 0], sizes = [16, 1], strides = [1, 1]} : vector<16x4xf32> to vector<16x1xf32>
    %90 = vector.extract_strided_slice %39 {offsets = [0, 0], sizes = [16, 32], strides = [1, 1]} : vector<64x32xf32> to vector<16x32xf32>
    %91 = vector.broadcast %89 : vector<16x1xf32> to vector<16x32xf32>
    %92 = arith.mulf %91, %90 : vector<16x32xf32>
    %93 = arith.addf %88, %92 : vector<16x32xf32>
    %94 = vector.extract_strided_slice %87 {offsets = [0, 1], sizes = [16, 1], strides = [1, 1]} : vector<16x4xf32> to vector<16x1xf32>
    %95 = vector.extract_strided_slice %39 {offsets = [16, 0], sizes = [16, 32], strides = [1, 1]} : vector<64x32xf32> to vector<16x32xf32>
    %96 = vector.broadcast %94 : vector<16x1xf32> to vector<16x32xf32>
    %97 = arith.mulf %96, %95 : vector<16x32xf32>
    %98 = arith.addf %93, %97 : vector<16x32xf32>
    %99 = vector.extract_strided_slice %87 {offsets = [0, 2], sizes = [16, 1], strides = [1, 1]} : vector<16x4xf32> to vector<16x1xf32>
    %100 = vector.extract_strided_slice %39 {offsets = [32, 0], sizes = [16, 32], strides = [1, 1]} : vector<64x32xf32> to vector<16x32xf32>
    %101 = vector.broadcast %99 : vector<16x1xf32> to vector<16x32xf32>
    %102 = arith.mulf %101, %100 : vector<16x32xf32>
    %103 = arith.addf %98, %102 : vector<16x32xf32>
    %104 = vector.extract_strided_slice %87 {offsets = [0, 3], sizes = [16, 1], strides = [1, 1]} : vector<16x4xf32> to vector<16x1xf32>
    %105 = vector.extract_strided_slice %39 {offsets = [48, 0], sizes = [16, 32], strides = [1, 1]} : vector<64x32xf32> to vector<16x32xf32>
    %106 = vector.broadcast %104 : vector<16x1xf32> to vector<16x32xf32>
    %107 = arith.mulf %106, %105 : vector<16x32xf32>
    %108 = arith.addf %103, %107 : vector<16x32xf32>
    %c0_57 = arith.constant 0 : index
    %c0_58 = arith.constant 0 : index
    %c0_59 = arith.constant 0 : index
    %109 = vector.load %arg14[%c0_57, %c0_58, %c0_59] : memref<2x16x32xf32, #tpu.memory_space<vmem>>, vector<1x16x32xf32>
    %110 = vector.shape_cast %109 : vector<1x16x32xf32> to vector<16x32xf32>
    %111 = vector.shape_cast %108 : vector<16x32xf32> to vector<1x16x32xf32>
    tpu.vector_store %arg14[%c0_57, %c0_58, %c0_59], %111 {strides = array<i32>} : memref<2x16x32xf32, #tpu.memory_space<vmem>>, vector<1x16x32xf32>,
    %c1_60 = arith.constant 1 : index
    %c0_61 = arith.constant 0 : index
    %c0_62 = arith.constant 0 : index
    %112 = vector.load %arg3[%c1_60, %c0_61, %c0_62] : memref<2x16x32xf32, #tpu.memory_space<vmem>>, vector<1x16x32xf32>
    %113 = vector.shape_cast %112 : vector<1x16x32xf32> to vector<16x32xf32>
    %c0_63 = arith.constant 0 : index
    %c0_64 = arith.constant 0 : index
    %114 = vector.load %arg5[%c0_63, %c0_64] : memref<32x32xf32, #tpu.memory_space<vmem>>, vector<32x32xf32>
    %cst_65 = arith.constant dense<0.000000e+00> : vector<16x32xf32>
    %115 = tpu.matmul %113, %114, %cst_65 {dimension_numbers = #tpu.dot_dimension_numbers<[1], [0], [0], [1], [0, 0, 1, 1], [], []>} : vector<16x32xf32>, vector<32x32xf32>, vector<16x32xf32> -> vector<16x32xf32>
    %116 = vector.broadcast %42 : vector<1x32xf32> to vector<16x32xf32>
    %117 = arith.addf %115, %116 : vector<16x32xf32>
    %118 = vector.extract_strided_slice %41 {offsets = [0, 0], sizes = [16, 32], strides = [1, 1]} : vector<64x32xf32> to vector<16x32xf32>
    %119 = arith.addf %117, %118 : vector<16x32xf32>
    %120 = math.tanh %119 : vector<16x32xf32>
    %121 = vector.broadcast %43 : vector<1x32xf32> to vector<16x32xf32>
    %122 = arith.mulf %120, %121 : vector<16x32xf32>
    %cst_66 = arith.constant dense<0.000000e+00> : vector<16xf32>
    %123 = vector.multi_reduction <add>, %122, %cst_66 [1] : vector<16x32xf32> to vector<16xf32>
    %124 = vector.shape_cast %123 : vector<16xf32> to vector<16x1xf32>
    %125 = vector.extract_strided_slice %41 {offsets = [16, 0], sizes = [16, 32], strides = [1, 1]} : vector<64x32xf32> to vector<16x32xf32>
    %126 = arith.addf %117, %125 : vector<16x32xf32>
    %127 = math.tanh %126 : vector<16x32xf32>
    %128 = vector.broadcast %43 : vector<1x32xf32> to vector<16x32xf32>
    %129 = arith.mulf %127, %128 : vector<16x32xf32>
    %cst_67 = arith.constant dense<0.000000e+00> : vector<16xf32>
    %130 = vector.multi_reduction <add>, %129, %cst_67 [1] : vector<16x32xf32> to vector<16xf32>
    %131 = vector.shape_cast %130 : vector<16xf32> to vector<16x1xf32>
    %132 = vector.extract_strided_slice %41 {offsets = [32, 0], sizes = [16, 32], strides = [1, 1]} : vector<64x32xf32> to vector<16x32xf32>
    %133 = arith.addf %117, %132 : vector<16x32xf32>
    %134 = math.tanh %133 : vector<16x32xf32>
    %135 = vector.broadcast %43 : vector<1x32xf32> to vector<16x32xf32>
    %136 = arith.mulf %134, %135 : vector<16x32xf32>
    %cst_68 = arith.constant dense<0.000000e+00> : vector<16xf32>
    %137 = vector.multi_reduction <add>, %136, %cst_68 [1] : vector<16x32xf32> to vector<16xf32>
    %138 = vector.shape_cast %137 : vector<16xf32> to vector<16x1xf32>
    %139 = vector.extract_strided_slice %41 {offsets = [48, 0], sizes = [16, 32], strides = [1, 1]} : vector<64x32xf32> to vector<16x32xf32>
    %140 = arith.addf %117, %139 : vector<16x32xf32>
    %141 = math.tanh %140 : vector<16x32xf32>
    %142 = vector.broadcast %43 : vector<1x32xf32> to vector<16x32xf32>
    %143 = arith.mulf %141, %142 : vector<16x32xf32>
    %cst_69 = arith.constant dense<0.000000e+00> : vector<16xf32>
    %144 = vector.multi_reduction <add>, %143, %cst_69 [1] : vector<16x32xf32> to vector<16xf32>
    %145 = vector.shape_cast %144 : vector<16xf32> to vector<16x1xf32>
    %146 = tpu.concatenate %124, %131, %138, %145 in 1 : vector<16x1xf32>, vector<16x1xf32>, vector<16x1xf32>, vector<16x1xf32> -> vector<16x4xf32>
    %cst_70 = arith.constant dense<0xFF800000> : vector<16xf32>
    %147 = vector.multi_reduction <maximumf>, %146, %cst_70 [1] : vector<16x4xf32> to vector<16xf32>
    %148 = vector.shape_cast %147 : vector<16xf32> to vector<16x1xf32>
    %149 = vector.broadcast %148 : vector<16x1xf32> to vector<16x4xf32>
    %150 = arith.subf %146, %149 : vector<16x4xf32>
    %151 = math.exp %150 : vector<16x4xf32>
    %cst_71 = arith.constant dense<0.000000e+00> : vector<16xf32>
    %152 = vector.multi_reduction <add>, %151, %cst_71 [1] : vector<16x4xf32> to vector<16xf32>
    %153 = vector.shape_cast %152 : vector<16xf32> to vector<16x1xf32>
    %154 = vector.broadcast %153 : vector<16x1xf32> to vector<16x4xf32>
    %155 = arith.divf %151, %154 : vector<16x4xf32>
    %cst_72 = arith.constant 0.000000e+00 : f32
    %156 = vector.broadcast %cst_72 : f32 to vector<16x32xf32>
    %157 = vector.extract_strided_slice %155 {offsets = [0, 0], sizes = [16, 1], strides = [1, 1]} : vector<16x4xf32> to vector<16x1xf32>
    %158 = vector.extract_strided_slice %39 {offsets = [0, 0], sizes = [16, 32], strides = [1, 1]} : vector<64x32xf32> to vector<16x32xf32>
    %159 = vector.broadcast %157 : vector<16x1xf32> to vector<16x32xf32>
    %160 = arith.mulf %159, %158 : vector<16x32xf32>
    %161 = arith.addf %156, %160 : vector<16x32xf32>
    %162 = vector.extract_strided_slice %155 {offsets = [0, 1], sizes = [16, 1], strides = [1, 1]} : vector<16x4xf32> to vector<16x1xf32>
    %163 = vector.extract_strided_slice %39 {offsets = [16, 0], sizes = [16, 32], strides = [1, 1]} : vector<64x32xf32> to vector<16x32xf32>
    %164 = vector.broadcast %162 : vector<16x1xf32> to vector<16x32xf32>
    %165 = arith.mulf %164, %163 : vector<16x32xf32>
    %166 = arith.addf %161, %165 : vector<16x32xf32>
    %167 = vector.extract_strided_slice %155 {offsets = [0, 2], sizes = [16, 1], strides = [1, 1]} : vector<16x4xf32> to vector<16x1xf32>
    %168 = vector.extract_strided_slice %39 {offsets = [32, 0], sizes = [16, 32], strides = [1, 1]} : vector<64x32xf32> to vector<16x32xf32>
    %169 = vector.broadcast %167 : vector<16x1xf32> to vector<16x32xf32>
    %170 = arith.mulf %169, %168 : vector<16x32xf32>
    %171 = arith.addf %166, %170 : vector<16x32xf32>
    %172 = vector.extract_strided_slice %155 {offsets = [0, 3], sizes = [16, 1], strides = [1, 1]} : vector<16x4xf32> to vector<16x1xf32>
    %173 = vector.extract_strided_slice %39 {offsets = [48, 0], sizes = [16, 32], strides = [1, 1]} : vector<64x32xf32> to vector<16x32xf32>
    %174 = vector.broadcast %172 : vector<16x1xf32> to vector<16x32xf32>
    %175 = arith.mulf %174, %173 : vector<16x32xf32>
    %176 = arith.addf %171, %175 : vector<16x32xf32>
    %c1_73 = arith.constant 1 : index
    %c0_74 = arith.constant 0 : index
    %c0_75 = arith.constant 0 : index
    %177 = vector.load %arg14[%c1_73, %c0_74, %c0_75] : memref<2x16x32xf32, #tpu.memory_space<vmem>>, vector<1x16x32xf32>
    %178 = vector.shape_cast %177 : vector<1x16x32xf32> to vector<16x32xf32>
    %179 = vector.shape_cast %176 : vector<16x32xf32> to vector<1x16x32xf32>
    tpu.vector_store %arg14[%c1_73, %c0_74, %c0_75], %179 {strides = array<i32>} : memref<2x16x32xf32, #tpu.memory_space<vmem>>, vector<1x16x32xf32>,
    return
  }
}

module attributes {stable_mosaic.version = 11 : i64} {
  func.func @kernel(%arg0: i32, %arg1: memref<16x4xf32, #tpu.memory_space<vmem>>, %arg2: memref<1x16x3xf32, #tpu.memory_space<vmem>>, %arg3: memref<16x8xf32, #tpu.memory_space<vmem>>, %arg4: memref<16x10xf32, #tpu.memory_space<vmem>>, %arg5: memref<16x32xf32, #tpu.memory_space<vmem>>, %arg6: memref<16x32xf32, #tpu.memory_space<vmem>>, %arg7: memref<136x640xf32, #tpu.memory_space<vmem>>, %arg8: memref<16x64xf32, #tpu.memory_space<vmem>>, %arg9: memref<136x320xf32, #tpu.memory_space<vmem>>, %arg10: memref<16x32xf32, #tpu.memory_space<vmem>>, %arg11: memref<16x32xf32, #tpu.memory_space<vmem>>, %arg12: memref<16x32xf32, #tpu.memory_space<vmem>>, %arg13: memref<192x640xf32, #tpu.memory_space<vmem>>, %arg14: memref<16x64xf32, #tpu.memory_space<vmem>>, %arg15: memref<192x320xf32, #tpu.memory_space<vmem>>, %arg16: memref<16x32xf32, #tpu.memory_space<vmem>>, %arg17: memref<96x1xf32, #tpu.memory_space<vmem>>, %arg18: memref<1x1xf32, #tpu.memory_space<vmem>>, %arg19: memref<1x16x1xf32, #tpu.memory_space<vmem>>, %arg20: memref<16x4xf32, #tpu.memory_space<vmem>>) attributes {dimension_semantics = [#tpu.dimension_semantics<arbitrary>], iteration_bounds = array<i64: 2>, scalar_prefetch = 0 : i64, scratch_operands = 1 : i64, tpu.core_type = #tpu.core_type<tc>, window_params = [{pipeline_mode = #tpu.pipeline_mode<synchronous>, transform_indices = @transform_0, window_bounds = array<i64: 16, 4>}, {transform_indices = @transform_1, window_bounds = array<i64: 1, 16, 3>}, {pipeline_mode = #tpu.pipeline_mode<synchronous>, transform_indices = @transform_2, window_bounds = array<i64: 16, 8>}, {pipeline_mode = #tpu.pipeline_mode<synchronous>, transform_indices = @transform_3, window_bounds = array<i64: 16, 10>}, {pipeline_mode = #tpu.pipeline_mode<synchronous>, transform_indices = @transform_4, window_bounds = array<i64: 16, 32>}, {pipeline_mode = #tpu.pipeline_mode<synchronous>, transform_indices = @transform_5, window_bounds = array<i64: 16, 32>}, {pipeline_mode = #tpu.pipeline_mode<synchronous>, transform_indices = @transform_6, window_bounds = array<i64: 136, 640>}, {pipeline_mode = #tpu.pipeline_mode<synchronous>, transform_indices = @transform_7, window_bounds = array<i64: 16, 64>}, {pipeline_mode = #tpu.pipeline_mode<synchronous>, transform_indices = @transform_8, window_bounds = array<i64: 136, 320>}, {pipeline_mode = #tpu.pipeline_mode<synchronous>, transform_indices = @transform_9, window_bounds = array<i64: 16, 32>}, {pipeline_mode = #tpu.pipeline_mode<synchronous>, transform_indices = @transform_10, window_bounds = array<i64: 16, 32>}, {pipeline_mode = #tpu.pipeline_mode<synchronous>, transform_indices = @transform_11, window_bounds = array<i64: 16, 32>}, {pipeline_mode = #tpu.pipeline_mode<synchronous>, transform_indices = @transform_12, window_bounds = array<i64: 192, 640>}, {pipeline_mode = #tpu.pipeline_mode<synchronous>, transform_indices = @transform_13, window_bounds = array<i64: 16, 64>}, {pipeline_mode = #tpu.pipeline_mode<synchronous>, transform_indices = @transform_14, window_bounds = array<i64: 192, 320>}, {pipeline_mode = #tpu.pipeline_mode<synchronous>, transform_indices = @transform_15, window_bounds = array<i64: 16, 32>}, {pipeline_mode = #tpu.pipeline_mode<synchronous>, transform_indices = @transform_16, window_bounds = array<i64: 96, 1>}, {pipeline_mode = #tpu.pipeline_mode<synchronous>, transform_indices = @transform_17, window_bounds = array<i64: 1, 1>}, {transform_indices = @transform_18, window_bounds = array<i64: 1, 16, 1>}]} {
    %c0_i32 = arith.constant 0 : i32
    %0 = arith.cmpi eq, %arg0, %c0_i32 : i32
    %1 = arith.extui %0 : i1 to i32
    %c0_i32_0 = arith.constant 0 : i32
    %2 = arith.cmpi ne, %1, %c0_i32_0 : i32
    scf.if %2 {
      %c0_58 = arith.constant 0 : index
      %c0_59 = arith.constant 0 : index
      %313 = vector.load %arg1[%c0_58, %c0_59] : memref<16x4xf32, #tpu.memory_space<vmem>>, vector<16x4xf32>
      %c0_60 = arith.constant 0 : index
      %c0_61 = arith.constant 0 : index
      %314 = vector.load %arg20[%c0_60, %c0_61] : memref<16x4xf32, #tpu.memory_space<vmem>>, vector<16x4xf32>
      tpu.vector_store %arg20[%c0_60, %c0_61], %313 {strides = array<i32>} : memref<16x4xf32, #tpu.memory_space<vmem>>, vector<16x4xf32>,
    } else {
    }
    %c0 = arith.constant 0 : index
    %c0_1 = arith.constant 0 : index
    %3 = vector.load %arg3[%c0, %c0_1] : memref<16x8xf32, #tpu.memory_space<vmem>>, vector<16x8xf32>
    %c0_2 = arith.constant 0 : index
    %c0_3 = arith.constant 0 : index
    %4 = vector.load %arg4[%c0_2, %c0_3] : memref<16x10xf32, #tpu.memory_space<vmem>>, vector<16x10xf32>
    %c0_4 = arith.constant 0 : index
    %c0_5 = arith.constant 0 : index
    %5 = vector.load %arg20[%c0_4, %c0_5] : memref<16x4xf32, #tpu.memory_space<vmem>>, vector<16x4xf32>
    %c0_6 = arith.constant 0 : index
    %c0_7 = arith.constant 0 : index
    %6 = vector.load %arg6[%c0_6, %c0_7] : memref<16x32xf32, #tpu.memory_space<vmem>>, vector<16x32xf32>
    %c0_8 = arith.constant 0 : index
    %c0_9 = arith.constant 0 : index
    %7 = vector.load %arg5[%c0_8, %c0_9] : memref<16x32xf32, #tpu.memory_space<vmem>>, vector<16x32xf32>
    %8 = tpu.concatenate %5, %7 in 1 : vector<16x4xf32>, vector<16x32xf32> -> vector<16x36xf32>
    %9 = tpu.concatenate %8, %6 in 1 : vector<16x36xf32>, vector<16x32xf32> -> vector<16x68xf32>
    %10 = vector.extract_strided_slice %9 {offsets = [0, 0], sizes = [8, 68], strides = [1, 1]} : vector<16x68xf32> to vector<8x68xf32>
    %cst = arith.constant dense<0.000000e+00> : vector<16x68xf32>
    %11 = tpu.matmul %3, %10, %cst {dimension_numbers = #tpu.dot_dimension_numbers<[1], [0], [0], [1], [0, 0, 1, 1], [], []>} : vector<16x8xf32>, vector<8x68xf32>, vector<16x68xf32> -> vector<16x68xf32>
    %12 = vector.extract_strided_slice %11 {offsets = [0, 0], sizes = [8, 68], strides = [1, 1]} : vector<16x68xf32> to vector<8x68xf32>
    %13 = vector.extract_strided_slice %11 {offsets = [8, 0], sizes = [8, 68], strides = [1, 1]} : vector<16x68xf32> to vector<8x68xf32>
    %14 = tpu.concatenate %12, %13 in 1 : vector<8x68xf32>, vector<8x68xf32> -> vector<8x136xf32>
    %15 = vector.extract_strided_slice %9 {offsets = [8, 0], sizes = [8, 68], strides = [1, 1]} : vector<16x68xf32> to vector<8x68xf32>
    %cst_10 = arith.constant dense<0.000000e+00> : vector<16x68xf32>
    %16 = tpu.matmul %3, %15, %cst_10 {dimension_numbers = #tpu.dot_dimension_numbers<[1], [0], [0], [1], [0, 0, 1, 1], [], []>} : vector<16x8xf32>, vector<8x68xf32>, vector<16x68xf32> -> vector<16x68xf32>
    %17 = vector.extract_strided_slice %16 {offsets = [0, 0], sizes = [8, 68], strides = [1, 1]} : vector<16x68xf32> to vector<8x68xf32>
    %18 = vector.extract_strided_slice %16 {offsets = [8, 0], sizes = [8, 68], strides = [1, 1]} : vector<16x68xf32> to vector<8x68xf32>
    %19 = tpu.concatenate %17, %18 in 1 : vector<8x68xf32>, vector<8x68xf32> -> vector<8x136xf32>
    %20 = tpu.concatenate %14, %19 in 0 : vector<8x136xf32>, vector<8x136xf32> -> vector<16x136xf32>
    %c0_11 = arith.constant 0 : index
    %c0_12 = arith.constant 0 : index
    %21 = vector.load %arg7[%c0_11, %c0_12] : memref<136x640xf32, #tpu.memory_space<vmem>>, vector<136x640xf32>
    %cst_13 = arith.constant dense<0.000000e+00> : vector<16x640xf32>
    %22 = tpu.matmul %20, %21, %cst_13 {dimension_numbers = #tpu.dot_dimension_numbers<[1], [0], [0], [1], [0, 0, 1, 1], [], []>} : vector<16x136xf32>, vector<136x640xf32>, vector<16x640xf32> -> vector<16x640xf32>
    %c0_14 = arith.constant 0 : index
    %c0_15 = arith.constant 0 : index
    %23 = vector.load %arg8[%c0_14, %c0_15] : memref<16x64xf32, #tpu.memory_space<vmem>>, vector<16x64xf32>
    %24 = vector.extract_strided_slice %4 {offsets = [0, 0], sizes = [16, 1], strides = [1, 1]} : vector<16x10xf32> to vector<16x1xf32>
    %25 = vector.extract_strided_slice %22 {offsets = [0, 0], sizes = [16, 64], strides = [1, 1]} : vector<16x640xf32> to vector<16x64xf32>
    %26 = vector.broadcast %24 : vector<16x1xf32> to vector<16x64xf32>
    %27 = arith.mulf %26, %25 : vector<16x64xf32>
    %28 = arith.addf %23, %27 : vector<16x64xf32>
    %29 = vector.extract_strided_slice %4 {offsets = [0, 1], sizes = [16, 1], strides = [1, 1]} : vector<16x10xf32> to vector<16x1xf32>
    %30 = vector.extract_strided_slice %22 {offsets = [0, 64], sizes = [16, 64], strides = [1, 1]} : vector<16x640xf32> to vector<16x64xf32>
    %31 = vector.broadcast %29 : vector<16x1xf32> to vector<16x64xf32>
    %32 = arith.mulf %31, %30 : vector<16x64xf32>
    %33 = arith.addf %28, %32 : vector<16x64xf32>
    %34 = vector.extract_strided_slice %4 {offsets = [0, 2], sizes = [16, 1], strides = [1, 1]} : vector<16x10xf32> to vector<16x1xf32>
    %35 = vector.extract_strided_slice %22 {offsets = [0, 128], sizes = [16, 64], strides = [1, 1]} : vector<16x640xf32> to vector<16x64xf32>
    %36 = vector.broadcast %34 : vector<16x1xf32> to vector<16x64xf32>
    %37 = arith.mulf %36, %35 : vector<16x64xf32>
    %38 = arith.addf %33, %37 : vector<16x64xf32>
    %39 = vector.extract_strided_slice %4 {offsets = [0, 3], sizes = [16, 1], strides = [1, 1]} : vector<16x10xf32> to vector<16x1xf32>
    %40 = vector.extract_strided_slice %22 {offsets = [0, 192], sizes = [16, 64], strides = [1, 1]} : vector<16x640xf32> to vector<16x64xf32>
    %41 = vector.broadcast %39 : vector<16x1xf32> to vector<16x64xf32>
    %42 = arith.mulf %41, %40 : vector<16x64xf32>
    %43 = arith.addf %38, %42 : vector<16x64xf32>
    %44 = vector.extract_strided_slice %4 {offsets = [0, 4], sizes = [16, 1], strides = [1, 1]} : vector<16x10xf32> to vector<16x1xf32>
    %45 = vector.extract_strided_slice %22 {offsets = [0, 256], sizes = [16, 64], strides = [1, 1]} : vector<16x640xf32> to vector<16x64xf32>
    %46 = vector.broadcast %44 : vector<16x1xf32> to vector<16x64xf32>
    %47 = arith.mulf %46, %45 : vector<16x64xf32>
    %48 = arith.addf %43, %47 : vector<16x64xf32>
    %49 = vector.extract_strided_slice %4 {offsets = [0, 5], sizes = [16, 1], strides = [1, 1]} : vector<16x10xf32> to vector<16x1xf32>
    %50 = vector.extract_strided_slice %22 {offsets = [0, 320], sizes = [16, 64], strides = [1, 1]} : vector<16x640xf32> to vector<16x64xf32>
    %51 = vector.broadcast %49 : vector<16x1xf32> to vector<16x64xf32>
    %52 = arith.mulf %51, %50 : vector<16x64xf32>
    %53 = arith.addf %48, %52 : vector<16x64xf32>
    %54 = vector.extract_strided_slice %4 {offsets = [0, 6], sizes = [16, 1], strides = [1, 1]} : vector<16x10xf32> to vector<16x1xf32>
    %55 = vector.extract_strided_slice %22 {offsets = [0, 384], sizes = [16, 64], strides = [1, 1]} : vector<16x640xf32> to vector<16x64xf32>
    %56 = vector.broadcast %54 : vector<16x1xf32> to vector<16x64xf32>
    %57 = arith.mulf %56, %55 : vector<16x64xf32>
    %58 = arith.addf %53, %57 : vector<16x64xf32>
    %59 = vector.extract_strided_slice %4 {offsets = [0, 7], sizes = [16, 1], strides = [1, 1]} : vector<16x10xf32> to vector<16x1xf32>
    %60 = vector.extract_strided_slice %22 {offsets = [0, 448], sizes = [16, 64], strides = [1, 1]} : vector<16x640xf32> to vector<16x64xf32>
    %61 = vector.broadcast %59 : vector<16x1xf32> to vector<16x64xf32>
    %62 = arith.mulf %61, %60 : vector<16x64xf32>
    %63 = arith.addf %58, %62 : vector<16x64xf32>
    %64 = vector.extract_strided_slice %4 {offsets = [0, 8], sizes = [16, 1], strides = [1, 1]} : vector<16x10xf32> to vector<16x1xf32>
    %65 = vector.extract_strided_slice %22 {offsets = [0, 512], sizes = [16, 64], strides = [1, 1]} : vector<16x640xf32> to vector<16x64xf32>
    %66 = vector.broadcast %64 : vector<16x1xf32> to vector<16x64xf32>
    %67 = arith.mulf %66, %65 : vector<16x64xf32>
    %68 = arith.addf %63, %67 : vector<16x64xf32>
    %69 = vector.extract_strided_slice %4 {offsets = [0, 9], sizes = [16, 1], strides = [1, 1]} : vector<16x10xf32> to vector<16x1xf32>
    %70 = vector.extract_strided_slice %22 {offsets = [0, 576], sizes = [16, 64], strides = [1, 1]} : vector<16x640xf32> to vector<16x64xf32>
    %71 = vector.broadcast %69 : vector<16x1xf32> to vector<16x64xf32>
    %72 = arith.mulf %71, %70 : vector<16x64xf32>
    %73 = arith.addf %68, %72 : vector<16x64xf32>
    %74 = arith.negf %73 : vector<16x64xf32>
    %75 = math.exp %74 : vector<16x64xf32>
    %cst_16 = arith.constant 1.000000e+00 : f32
    %76 = vector.broadcast %cst_16 : f32 to vector<16x64xf32>
    %77 = arith.addf %76, %75 : vector<16x64xf32>
    %78 = arith.divf %76, %77 : vector<16x64xf32>
    %79 = vector.extract_strided_slice %78 {offsets = [0, 0], sizes = [16, 32], strides = [1, 1]} : vector<16x64xf32> to vector<16x32xf32>
    %80 = vector.extract_strided_slice %78 {offsets = [0, 32], sizes = [16, 32], strides = [1, 1]} : vector<16x64xf32> to vector<16x32xf32>
    %81 = arith.mulf %79, %6 : vector<16x32xf32>
    %82 = tpu.concatenate %8, %81 in 1 : vector<16x36xf32>, vector<16x32xf32> -> vector<16x68xf32>
    %83 = vector.extract_strided_slice %82 {offsets = [0, 0], sizes = [8, 68], strides = [1, 1]} : vector<16x68xf32> to vector<8x68xf32>
    %cst_17 = arith.constant dense<0.000000e+00> : vector<16x68xf32>
    %84 = tpu.matmul %3, %83, %cst_17 {dimension_numbers = #tpu.dot_dimension_numbers<[1], [0], [0], [1], [0, 0, 1, 1], [], []>} : vector<16x8xf32>, vector<8x68xf32>, vector<16x68xf32> -> vector<16x68xf32>
    %85 = vector.extract_strided_slice %84 {offsets = [0, 0], sizes = [8, 68], strides = [1, 1]} : vector<16x68xf32> to vector<8x68xf32>
    %86 = vector.extract_strided_slice %84 {offsets = [8, 0], sizes = [8, 68], strides = [1, 1]} : vector<16x68xf32> to vector<8x68xf32>
    %87 = tpu.concatenate %85, %86 in 1 : vector<8x68xf32>, vector<8x68xf32> -> vector<8x136xf32>
    %88 = vector.extract_strided_slice %82 {offsets = [8, 0], sizes = [8, 68], strides = [1, 1]} : vector<16x68xf32> to vector<8x68xf32>
    %cst_18 = arith.constant dense<0.000000e+00> : vector<16x68xf32>
    %89 = tpu.matmul %3, %88, %cst_18 {dimension_numbers = #tpu.dot_dimension_numbers<[1], [0], [0], [1], [0, 0, 1, 1], [], []>} : vector<16x8xf32>, vector<8x68xf32>, vector<16x68xf32> -> vector<16x68xf32>
    %90 = vector.extract_strided_slice %89 {offsets = [0, 0], sizes = [8, 68], strides = [1, 1]} : vector<16x68xf32> to vector<8x68xf32>
    %91 = vector.extract_strided_slice %89 {offsets = [8, 0], sizes = [8, 68], strides = [1, 1]} : vector<16x68xf32> to vector<8x68xf32>
    %92 = tpu.concatenate %90, %91 in 1 : vector<8x68xf32>, vector<8x68xf32> -> vector<8x136xf32>
    %93 = tpu.concatenate %87, %92 in 0 : vector<8x136xf32>, vector<8x136xf32> -> vector<16x136xf32>
    %c0_19 = arith.constant 0 : index
    %c0_20 = arith.constant 0 : index
    %94 = vector.load %arg9[%c0_19, %c0_20] : memref<136x320xf32, #tpu.memory_space<vmem>>, vector<136x320xf32>
    %cst_21 = arith.constant dense<0.000000e+00> : vector<16x320xf32>
    %95 = tpu.matmul %93, %94, %cst_21 {dimension_numbers = #tpu.dot_dimension_numbers<[1], [0], [0], [1], [0, 0, 1, 1], [], []>} : vector<16x136xf32>, vector<136x320xf32>, vector<16x320xf32> -> vector<16x320xf32>
    %c0_22 = arith.constant 0 : index
    %c0_23 = arith.constant 0 : index
    %96 = vector.load %arg10[%c0_22, %c0_23] : memref<16x32xf32, #tpu.memory_space<vmem>>, vector<16x32xf32>
    %97 = vector.extract_strided_slice %4 {offsets = [0, 0], sizes = [16, 1], strides = [1, 1]} : vector<16x10xf32> to vector<16x1xf32>
    %98 = vector.extract_strided_slice %95 {offsets = [0, 0], sizes = [16, 32], strides = [1, 1]} : vector<16x320xf32> to vector<16x32xf32>
    %99 = vector.broadcast %97 : vector<16x1xf32> to vector<16x32xf32>
    %100 = arith.mulf %99, %98 : vector<16x32xf32>
    %101 = arith.addf %96, %100 : vector<16x32xf32>
    %102 = vector.extract_strided_slice %4 {offsets = [0, 1], sizes = [16, 1], strides = [1, 1]} : vector<16x10xf32> to vector<16x1xf32>
    %103 = vector.extract_strided_slice %95 {offsets = [0, 32], sizes = [16, 32], strides = [1, 1]} : vector<16x320xf32> to vector<16x32xf32>
    %104 = vector.broadcast %102 : vector<16x1xf32> to vector<16x32xf32>
    %105 = arith.mulf %104, %103 : vector<16x32xf32>
    %106 = arith.addf %101, %105 : vector<16x32xf32>
    %107 = vector.extract_strided_slice %4 {offsets = [0, 2], sizes = [16, 1], strides = [1, 1]} : vector<16x10xf32> to vector<16x1xf32>
    %108 = vector.extract_strided_slice %95 {offsets = [0, 64], sizes = [16, 32], strides = [1, 1]} : vector<16x320xf32> to vector<16x32xf32>
    %109 = vector.broadcast %107 : vector<16x1xf32> to vector<16x32xf32>
    %110 = arith.mulf %109, %108 : vector<16x32xf32>
    %111 = arith.addf %106, %110 : vector<16x32xf32>
    %112 = vector.extract_strided_slice %4 {offsets = [0, 3], sizes = [16, 1], strides = [1, 1]} : vector<16x10xf32> to vector<16x1xf32>
    %113 = vector.extract_strided_slice %95 {offsets = [0, 96], sizes = [16, 32], strides = [1, 1]} : vector<16x320xf32> to vector<16x32xf32>
    %114 = vector.broadcast %112 : vector<16x1xf32> to vector<16x32xf32>
    %115 = arith.mulf %114, %113 : vector<16x32xf32>
    %116 = arith.addf %111, %115 : vector<16x32xf32>
    %117 = vector.extract_strided_slice %4 {offsets = [0, 4], sizes = [16, 1], strides = [1, 1]} : vector<16x10xf32> to vector<16x1xf32>
    %118 = vector.extract_strided_slice %95 {offsets = [0, 128], sizes = [16, 32], strides = [1, 1]} : vector<16x320xf32> to vector<16x32xf32>
    %119 = vector.broadcast %117 : vector<16x1xf32> to vector<16x32xf32>
    %120 = arith.mulf %119, %118 : vector<16x32xf32>
    %121 = arith.addf %116, %120 : vector<16x32xf32>
    %122 = vector.extract_strided_slice %4 {offsets = [0, 5], sizes = [16, 1], strides = [1, 1]} : vector<16x10xf32> to vector<16x1xf32>
    %123 = vector.extract_strided_slice %95 {offsets = [0, 160], sizes = [16, 32], strides = [1, 1]} : vector<16x320xf32> to vector<16x32xf32>
    %124 = vector.broadcast %122 : vector<16x1xf32> to vector<16x32xf32>
    %125 = arith.mulf %124, %123 : vector<16x32xf32>
    %126 = arith.addf %121, %125 : vector<16x32xf32>
    %127 = vector.extract_strided_slice %4 {offsets = [0, 6], sizes = [16, 1], strides = [1, 1]} : vector<16x10xf32> to vector<16x1xf32>
    %128 = vector.extract_strided_slice %95 {offsets = [0, 192], sizes = [16, 32], strides = [1, 1]} : vector<16x320xf32> to vector<16x32xf32>
    %129 = vector.broadcast %127 : vector<16x1xf32> to vector<16x32xf32>
    %130 = arith.mulf %129, %128 : vector<16x32xf32>
    %131 = arith.addf %126, %130 : vector<16x32xf32>
    %132 = vector.extract_strided_slice %4 {offsets = [0, 7], sizes = [16, 1], strides = [1, 1]} : vector<16x10xf32> to vector<16x1xf32>
    %133 = vector.extract_strided_slice %95 {offsets = [0, 224], sizes = [16, 32], strides = [1, 1]} : vector<16x320xf32> to vector<16x32xf32>
    %134 = vector.broadcast %132 : vector<16x1xf32> to vector<16x32xf32>
    %135 = arith.mulf %134, %133 : vector<16x32xf32>
    %136 = arith.addf %131, %135 : vector<16x32xf32>
    %137 = vector.extract_strided_slice %4 {offsets = [0, 8], sizes = [16, 1], strides = [1, 1]} : vector<16x10xf32> to vector<16x1xf32>
    %138 = vector.extract_strided_slice %95 {offsets = [0, 256], sizes = [16, 32], strides = [1, 1]} : vector<16x320xf32> to vector<16x32xf32>
    %139 = vector.broadcast %137 : vector<16x1xf32> to vector<16x32xf32>
    %140 = arith.mulf %139, %138 : vector<16x32xf32>
    %141 = arith.addf %136, %140 : vector<16x32xf32>
    %142 = vector.extract_strided_slice %4 {offsets = [0, 9], sizes = [16, 1], strides = [1, 1]} : vector<16x10xf32> to vector<16x1xf32>
    %143 = vector.extract_strided_slice %95 {offsets = [0, 288], sizes = [16, 32], strides = [1, 1]} : vector<16x320xf32> to vector<16x32xf32>
    %144 = vector.broadcast %142 : vector<16x1xf32> to vector<16x32xf32>
    %145 = arith.mulf %144, %143 : vector<16x32xf32>
    %146 = arith.addf %141, %145 : vector<16x32xf32>
    %147 = math.tanh %146 : vector<16x32xf32>
    %148 = arith.mulf %80, %6 : vector<16x32xf32>
    %cst_24 = arith.constant 1.000000e+00 : f32
    %149 = vector.broadcast %cst_24 : f32 to vector<16x32xf32>
    %150 = arith.subf %149, %80 : vector<16x32xf32>
    %151 = arith.mulf %150, %147 : vector<16x32xf32>
    %152 = arith.addf %148, %151 : vector<16x32xf32>
    %c0_25 = arith.constant 0 : index
    %c0_26 = arith.constant 0 : index
    %153 = vector.load %arg12[%c0_25, %c0_26] : memref<16x32xf32, #tpu.memory_space<vmem>>, vector<16x32xf32>
    %c0_27 = arith.constant 0 : index
    %c0_28 = arith.constant 0 : index
    %154 = vector.load %arg11[%c0_27, %c0_28] : memref<16x32xf32, #tpu.memory_space<vmem>>, vector<16x32xf32>
    %155 = tpu.concatenate %152, %154 in 1 : vector<16x32xf32>, vector<16x32xf32> -> vector<16x64xf32>
    %156 = tpu.concatenate %155, %153 in 1 : vector<16x64xf32>, vector<16x32xf32> -> vector<16x96xf32>
    %157 = vector.extract_strided_slice %156 {offsets = [0, 0], sizes = [8, 96], strides = [1, 1]} : vector<16x96xf32> to vector<8x96xf32>
    %cst_29 = arith.constant dense<0.000000e+00> : vector<16x96xf32>
    %158 = tpu.matmul %3, %157, %cst_29 {dimension_numbers = #tpu.dot_dimension_numbers<[1], [0], [0], [1], [0, 0, 1, 1], [], []>} : vector<16x8xf32>, vector<8x96xf32>, vector<16x96xf32> -> vector<16x96xf32>
    %159 = vector.extract_strided_slice %158 {offsets = [0, 0], sizes = [8, 96], strides = [1, 1]} : vector<16x96xf32> to vector<8x96xf32>
    %160 = vector.extract_strided_slice %158 {offsets = [8, 0], sizes = [8, 96], strides = [1, 1]} : vector<16x96xf32> to vector<8x96xf32>
    %161 = tpu.concatenate %159, %160 in 1 : vector<8x96xf32>, vector<8x96xf32> -> vector<8x192xf32>
    %162 = vector.extract_strided_slice %156 {offsets = [8, 0], sizes = [8, 96], strides = [1, 1]} : vector<16x96xf32> to vector<8x96xf32>
    %cst_30 = arith.constant dense<0.000000e+00> : vector<16x96xf32>
    %163 = tpu.matmul %3, %162, %cst_30 {dimension_numbers = #tpu.dot_dimension_numbers<[1], [0], [0], [1], [0, 0, 1, 1], [], []>} : vector<16x8xf32>, vector<8x96xf32>, vector<16x96xf32> -> vector<16x96xf32>
    %164 = vector.extract_strided_slice %163 {offsets = [0, 0], sizes = [8, 96], strides = [1, 1]} : vector<16x96xf32> to vector<8x96xf32>
    %165 = vector.extract_strided_slice %163 {offsets = [8, 0], sizes = [8, 96], strides = [1, 1]} : vector<16x96xf32> to vector<8x96xf32>
    %166 = tpu.concatenate %164, %165 in 1 : vector<8x96xf32>, vector<8x96xf32> -> vector<8x192xf32>
    %167 = tpu.concatenate %161, %166 in 0 : vector<8x192xf32>, vector<8x192xf32> -> vector<16x192xf32>
    %c0_31 = arith.constant 0 : index
    %c0_32 = arith.constant 0 : index
    %168 = vector.load %arg13[%c0_31, %c0_32] : memref<192x640xf32, #tpu.memory_space<vmem>>, vector<192x640xf32>
    %cst_33 = arith.constant dense<0.000000e+00> : vector<16x640xf32>
    %169 = tpu.matmul %167, %168, %cst_33 {dimension_numbers = #tpu.dot_dimension_numbers<[1], [0], [0], [1], [0, 0, 1, 1], [], []>} : vector<16x192xf32>, vector<192x640xf32>, vector<16x640xf32> -> vector<16x640xf32>
    %c0_34 = arith.constant 0 : index
    %c0_35 = arith.constant 0 : index
    %170 = vector.load %arg14[%c0_34, %c0_35] : memref<16x64xf32, #tpu.memory_space<vmem>>, vector<16x64xf32>
    %171 = vector.extract_strided_slice %4 {offsets = [0, 0], sizes = [16, 1], strides = [1, 1]} : vector<16x10xf32> to vector<16x1xf32>
    %172 = vector.extract_strided_slice %169 {offsets = [0, 0], sizes = [16, 64], strides = [1, 1]} : vector<16x640xf32> to vector<16x64xf32>
    %173 = vector.broadcast %171 : vector<16x1xf32> to vector<16x64xf32>
    %174 = arith.mulf %173, %172 : vector<16x64xf32>
    %175 = arith.addf %170, %174 : vector<16x64xf32>
    %176 = vector.extract_strided_slice %4 {offsets = [0, 1], sizes = [16, 1], strides = [1, 1]} : vector<16x10xf32> to vector<16x1xf32>
    %177 = vector.extract_strided_slice %169 {offsets = [0, 64], sizes = [16, 64], strides = [1, 1]} : vector<16x640xf32> to vector<16x64xf32>
    %178 = vector.broadcast %176 : vector<16x1xf32> to vector<16x64xf32>
    %179 = arith.mulf %178, %177 : vector<16x64xf32>
    %180 = arith.addf %175, %179 : vector<16x64xf32>
    %181 = vector.extract_strided_slice %4 {offsets = [0, 2], sizes = [16, 1], strides = [1, 1]} : vector<16x10xf32> to vector<16x1xf32>
    %182 = vector.extract_strided_slice %169 {offsets = [0, 128], sizes = [16, 64], strides = [1, 1]} : vector<16x640xf32> to vector<16x64xf32>
    %183 = vector.broadcast %181 : vector<16x1xf32> to vector<16x64xf32>
    %184 = arith.mulf %183, %182 : vector<16x64xf32>
    %185 = arith.addf %180, %184 : vector<16x64xf32>
    %186 = vector.extract_strided_slice %4 {offsets = [0, 3], sizes = [16, 1], strides = [1, 1]} : vector<16x10xf32> to vector<16x1xf32>
    %187 = vector.extract_strided_slice %169 {offsets = [0, 192], sizes = [16, 64], strides = [1, 1]} : vector<16x640xf32> to vector<16x64xf32>
    %188 = vector.broadcast %186 : vector<16x1xf32> to vector<16x64xf32>
    %189 = arith.mulf %188, %187 : vector<16x64xf32>
    %190 = arith.addf %185, %189 : vector<16x64xf32>
    %191 = vector.extract_strided_slice %4 {offsets = [0, 4], sizes = [16, 1], strides = [1, 1]} : vector<16x10xf32> to vector<16x1xf32>
    %192 = vector.extract_strided_slice %169 {offsets = [0, 256], sizes = [16, 64], strides = [1, 1]} : vector<16x640xf32> to vector<16x64xf32>
    %193 = vector.broadcast %191 : vector<16x1xf32> to vector<16x64xf32>
    %194 = arith.mulf %193, %192 : vector<16x64xf32>
    %195 = arith.addf %190, %194 : vector<16x64xf32>
    %196 = vector.extract_strided_slice %4 {offsets = [0, 5], sizes = [16, 1], strides = [1, 1]} : vector<16x10xf32> to vector<16x1xf32>
    %197 = vector.extract_strided_slice %169 {offsets = [0, 320], sizes = [16, 64], strides = [1, 1]} : vector<16x640xf32> to vector<16x64xf32>
    %198 = vector.broadcast %196 : vector<16x1xf32> to vector<16x64xf32>
    %199 = arith.mulf %198, %197 : vector<16x64xf32>
    %200 = arith.addf %195, %199 : vector<16x64xf32>
    %201 = vector.extract_strided_slice %4 {offsets = [0, 6], sizes = [16, 1], strides = [1, 1]} : vector<16x10xf32> to vector<16x1xf32>
    %202 = vector.extract_strided_slice %169 {offsets = [0, 384], sizes = [16, 64], strides = [1, 1]} : vector<16x640xf32> to vector<16x64xf32>
    %203 = vector.broadcast %201 : vector<16x1xf32> to vector<16x64xf32>
    %204 = arith.mulf %203, %202 : vector<16x64xf32>
    %205 = arith.addf %200, %204 : vector<16x64xf32>
    %206 = vector.extract_strided_slice %4 {offsets = [0, 7], sizes = [16, 1], strides = [1, 1]} : vector<16x10xf32> to vector<16x1xf32>
    %207 = vector.extract_strided_slice %169 {offsets = [0, 448], sizes = [16, 64], strides = [1, 1]} : vector<16x640xf32> to vector<16x64xf32>
    %208 = vector.broadcast %206 : vector<16x1xf32> to vector<16x64xf32>
    %209 = arith.mulf %208, %207 : vector<16x64xf32>
    %210 = arith.addf %205, %209 : vector<16x64xf32>
    %211 = vector.extract_strided_slice %4 {offsets = [0, 8], sizes = [16, 1], strides = [1, 1]} : vector<16x10xf32> to vector<16x1xf32>
    %212 = vector.extract_strided_slice %169 {offsets = [0, 512], sizes = [16, 64], strides = [1, 1]} : vector<16x640xf32> to vector<16x64xf32>
    %213 = vector.broadcast %211 : vector<16x1xf32> to vector<16x64xf32>
    %214 = arith.mulf %213, %212 : vector<16x64xf32>
    %215 = arith.addf %210, %214 : vector<16x64xf32>
    %216 = vector.extract_strided_slice %4 {offsets = [0, 9], sizes = [16, 1], strides = [1, 1]} : vector<16x10xf32> to vector<16x1xf32>
    %217 = vector.extract_strided_slice %169 {offsets = [0, 576], sizes = [16, 64], strides = [1, 1]} : vector<16x640xf32> to vector<16x64xf32>
    %218 = vector.broadcast %216 : vector<16x1xf32> to vector<16x64xf32>
    %219 = arith.mulf %218, %217 : vector<16x64xf32>
    %220 = arith.addf %215, %219 : vector<16x64xf32>
    %221 = arith.negf %220 : vector<16x64xf32>
    %222 = math.exp %221 : vector<16x64xf32>
    %cst_36 = arith.constant 1.000000e+00 : f32
    %223 = vector.broadcast %cst_36 : f32 to vector<16x64xf32>
    %224 = arith.addf %223, %222 : vector<16x64xf32>
    %225 = arith.divf %223, %224 : vector<16x64xf32>
    %226 = vector.extract_strided_slice %225 {offsets = [0, 0], sizes = [16, 32], strides = [1, 1]} : vector<16x64xf32> to vector<16x32xf32>
    %227 = vector.extract_strided_slice %225 {offsets = [0, 32], sizes = [16, 32], strides = [1, 1]} : vector<16x64xf32> to vector<16x32xf32>
    %228 = arith.mulf %226, %153 : vector<16x32xf32>
    %229 = tpu.concatenate %155, %228 in 1 : vector<16x64xf32>, vector<16x32xf32> -> vector<16x96xf32>
    %230 = vector.extract_strided_slice %229 {offsets = [0, 0], sizes = [8, 96], strides = [1, 1]} : vector<16x96xf32> to vector<8x96xf32>
    %cst_37 = arith.constant dense<0.000000e+00> : vector<16x96xf32>
    %231 = tpu.matmul %3, %230, %cst_37 {dimension_numbers = #tpu.dot_dimension_numbers<[1], [0], [0], [1], [0, 0, 1, 1], [], []>} : vector<16x8xf32>, vector<8x96xf32>, vector<16x96xf32> -> vector<16x96xf32>
    %232 = vector.extract_strided_slice %231 {offsets = [0, 0], sizes = [8, 96], strides = [1, 1]} : vector<16x96xf32> to vector<8x96xf32>
    %233 = vector.extract_strided_slice %231 {offsets = [8, 0], sizes = [8, 96], strides = [1, 1]} : vector<16x96xf32> to vector<8x96xf32>
    %234 = tpu.concatenate %232, %233 in 1 : vector<8x96xf32>, vector<8x96xf32> -> vector<8x192xf32>
    %235 = vector.extract_strided_slice %229 {offsets = [8, 0], sizes = [8, 96], strides = [1, 1]} : vector<16x96xf32> to vector<8x96xf32>
    %cst_38 = arith.constant dense<0.000000e+00> : vector<16x96xf32>
    %236 = tpu.matmul %3, %235, %cst_38 {dimension_numbers = #tpu.dot_dimension_numbers<[1], [0], [0], [1], [0, 0, 1, 1], [], []>} : vector<16x8xf32>, vector<8x96xf32>, vector<16x96xf32> -> vector<16x96xf32>
    %237 = vector.extract_strided_slice %236 {offsets = [0, 0], sizes = [8, 96], strides = [1, 1]} : vector<16x96xf32> to vector<8x96xf32>
    %238 = vector.extract_strided_slice %236 {offsets = [8, 0], sizes = [8, 96], strides = [1, 1]} : vector<16x96xf32> to vector<8x96xf32>
    %239 = tpu.concatenate %237, %238 in 1 : vector<8x96xf32>, vector<8x96xf32> -> vector<8x192xf32>
    %240 = tpu.concatenate %234, %239 in 0 : vector<8x192xf32>, vector<8x192xf32> -> vector<16x192xf32>
    %c0_39 = arith.constant 0 : index
    %c0_40 = arith.constant 0 : index
    %241 = vector.load %arg15[%c0_39, %c0_40] : memref<192x320xf32, #tpu.memory_space<vmem>>, vector<192x320xf32>
    %cst_41 = arith.constant dense<0.000000e+00> : vector<16x320xf32>
    %242 = tpu.matmul %240, %241, %cst_41 {dimension_numbers = #tpu.dot_dimension_numbers<[1], [0], [0], [1], [0, 0, 1, 1], [], []>} : vector<16x192xf32>, vector<192x320xf32>, vector<16x320xf32> -> vector<16x320xf32>
    %c0_42 = arith.constant 0 : index
    %c0_43 = arith.constant 0 : index
    %243 = vector.load %arg16[%c0_42, %c0_43] : memref<16x32xf32, #tpu.memory_space<vmem>>, vector<16x32xf32>
    %244 = vector.extract_strided_slice %4 {offsets = [0, 0], sizes = [16, 1], strides = [1, 1]} : vector<16x10xf32> to vector<16x1xf32>
    %245 = vector.extract_strided_slice %242 {offsets = [0, 0], sizes = [16, 32], strides = [1, 1]} : vector<16x320xf32> to vector<16x32xf32>
    %246 = vector.broadcast %244 : vector<16x1xf32> to vector<16x32xf32>
    %247 = arith.mulf %246, %245 : vector<16x32xf32>
    %248 = arith.addf %243, %247 : vector<16x32xf32>
    %249 = vector.extract_strided_slice %4 {offsets = [0, 1], sizes = [16, 1], strides = [1, 1]} : vector<16x10xf32> to vector<16x1xf32>
    %250 = vector.extract_strided_slice %242 {offsets = [0, 32], sizes = [16, 32], strides = [1, 1]} : vector<16x320xf32> to vector<16x32xf32>
    %251 = vector.broadcast %249 : vector<16x1xf32> to vector<16x32xf32>
    %252 = arith.mulf %251, %250 : vector<16x32xf32>
    %253 = arith.addf %248, %252 : vector<16x32xf32>
    %254 = vector.extract_strided_slice %4 {offsets = [0, 2], sizes = [16, 1], strides = [1, 1]} : vector<16x10xf32> to vector<16x1xf32>
    %255 = vector.extract_strided_slice %242 {offsets = [0, 64], sizes = [16, 32], strides = [1, 1]} : vector<16x320xf32> to vector<16x32xf32>
    %256 = vector.broadcast %254 : vector<16x1xf32> to vector<16x32xf32>
    %257 = arith.mulf %256, %255 : vector<16x32xf32>
    %258 = arith.addf %253, %257 : vector<16x32xf32>
    %259 = vector.extract_strided_slice %4 {offsets = [0, 3], sizes = [16, 1], strides = [1, 1]} : vector<16x10xf32> to vector<16x1xf32>
    %260 = vector.extract_strided_slice %242 {offsets = [0, 96], sizes = [16, 32], strides = [1, 1]} : vector<16x320xf32> to vector<16x32xf32>
    %261 = vector.broadcast %259 : vector<16x1xf32> to vector<16x32xf32>
    %262 = arith.mulf %261, %260 : vector<16x32xf32>
    %263 = arith.addf %258, %262 : vector<16x32xf32>
    %264 = vector.extract_strided_slice %4 {offsets = [0, 4], sizes = [16, 1], strides = [1, 1]} : vector<16x10xf32> to vector<16x1xf32>
    %265 = vector.extract_strided_slice %242 {offsets = [0, 128], sizes = [16, 32], strides = [1, 1]} : vector<16x320xf32> to vector<16x32xf32>
    %266 = vector.broadcast %264 : vector<16x1xf32> to vector<16x32xf32>
    %267 = arith.mulf %266, %265 : vector<16x32xf32>
    %268 = arith.addf %263, %267 : vector<16x32xf32>
    %269 = vector.extract_strided_slice %4 {offsets = [0, 5], sizes = [16, 1], strides = [1, 1]} : vector<16x10xf32> to vector<16x1xf32>
    %270 = vector.extract_strided_slice %242 {offsets = [0, 160], sizes = [16, 32], strides = [1, 1]} : vector<16x320xf32> to vector<16x32xf32>
    %271 = vector.broadcast %269 : vector<16x1xf32> to vector<16x32xf32>
    %272 = arith.mulf %271, %270 : vector<16x32xf32>
    %273 = arith.addf %268, %272 : vector<16x32xf32>
    %274 = vector.extract_strided_slice %4 {offsets = [0, 6], sizes = [16, 1], strides = [1, 1]} : vector<16x10xf32> to vector<16x1xf32>
    %275 = vector.extract_strided_slice %242 {offsets = [0, 192], sizes = [16, 32], strides = [1, 1]} : vector<16x320xf32> to vector<16x32xf32>
    %276 = vector.broadcast %274 : vector<16x1xf32> to vector<16x32xf32>
    %277 = arith.mulf %276, %275 : vector<16x32xf32>
    %278 = arith.addf %273, %277 : vector<16x32xf32>
    %279 = vector.extract_strided_slice %4 {offsets = [0, 7], sizes = [16, 1], strides = [1, 1]} : vector<16x10xf32> to vector<16x1xf32>
    %280 = vector.extract_strided_slice %242 {offsets = [0, 224], sizes = [16, 32], strides = [1, 1]} : vector<16x320xf32> to vector<16x32xf32>
    %281 = vector.broadcast %279 : vector<16x1xf32> to vector<16x32xf32>
    %282 = arith.mulf %281, %280 : vector<16x32xf32>
    %283 = arith.addf %278, %282 : vector<16x32xf32>
    %284 = vector.extract_strided_slice %4 {offsets = [0, 8], sizes = [16, 1], strides = [1, 1]} : vector<16x10xf32> to vector<16x1xf32>
    %285 = vector.extract_strided_slice %242 {offsets = [0, 256], sizes = [16, 32], strides = [1, 1]} : vector<16x320xf32> to vector<16x32xf32>
    %286 = vector.broadcast %284 : vector<16x1xf32> to vector<16x32xf32>
    %287 = arith.mulf %286, %285 : vector<16x32xf32>
    %288 = arith.addf %283, %287 : vector<16x32xf32>
    %289 = vector.extract_strided_slice %4 {offsets = [0, 9], sizes = [16, 1], strides = [1, 1]} : vector<16x10xf32> to vector<16x1xf32>
    %290 = vector.extract_strided_slice %242 {offsets = [0, 288], sizes = [16, 32], strides = [1, 1]} : vector<16x320xf32> to vector<16x32xf32>
    %291 = vector.broadcast %289 : vector<16x1xf32> to vector<16x32xf32>
    %292 = arith.mulf %291, %290 : vector<16x32xf32>
    %293 = arith.addf %288, %292 : vector<16x32xf32>
    %294 = math.tanh %293 : vector<16x32xf32>
    %295 = arith.mulf %227, %153 : vector<16x32xf32>
    %cst_44 = arith.constant 1.000000e+00 : f32
    %296 = vector.broadcast %cst_44 : f32 to vector<16x32xf32>
    %297 = arith.subf %296, %227 : vector<16x32xf32>
    %298 = arith.mulf %297, %294 : vector<16x32xf32>
    %299 = arith.addf %295, %298 : vector<16x32xf32>
    %300 = tpu.concatenate %299, %155 in 1 : vector<16x32xf32>, vector<16x64xf32> -> vector<16x96xf32>
    %c0_45 = arith.constant 0 : index
    %c0_46 = arith.constant 0 : index
    %301 = vector.load %arg17[%c0_45, %c0_46] : memref<96x1xf32, #tpu.memory_space<vmem>>, vector<96x1xf32>
    %cst_47 = arith.constant dense<0.000000e+00> : vector<16x1xf32>
    %302 = tpu.matmul %300, %301, %cst_47 {dimension_numbers = #tpu.dot_dimension_numbers<[1], [0], [0], [1], [0, 0, 1, 1], [], []>} : vector<16x96xf32>, vector<96x1xf32>, vector<16x1xf32> -> vector<16x1xf32>
    %c0_48 = arith.constant 0 : index
    %c0_49 = arith.constant 0 : index
    %303 = vector.load %arg18[%c0_48, %c0_49] : memref<1x1xf32, #tpu.memory_space<vmem>>, vector<1x1xf32>
    %304 = vector.broadcast %303 : vector<1x1xf32> to vector<16x1xf32>
    %305 = arith.addf %302, %304 : vector<16x1xf32>
    %c0_50 = arith.constant 0 : index
    %c0_51 = arith.constant 0 : index
    %c0_52 = arith.constant 0 : index
    %306 = vector.load %arg19[%c0_50, %c0_51, %c0_52] : memref<1x16x1xf32, #tpu.memory_space<vmem>>, vector<1x16x1xf32>
    %307 = vector.shape_cast %306 : vector<1x16x1xf32> to vector<16x1xf32>
    %308 = vector.shape_cast %305 : vector<16x1xf32> to vector<1x16x1xf32>
    tpu.vector_store %arg19[%c0_50, %c0_51, %c0_52], %308 {strides = array<i32>} : memref<1x16x1xf32, #tpu.memory_space<vmem>>, vector<1x16x1xf32>,
    %c0_53 = arith.constant 0 : index
    %c0_54 = arith.constant 0 : index
    %c0_55 = arith.constant 0 : index
    %309 = vector.load %arg2[%c0_53, %c0_54, %c0_55] : memref<1x16x3xf32, #tpu.memory_space<vmem>>, vector<1x16x3xf32>
    %310 = vector.shape_cast %309 : vector<1x16x3xf32> to vector<16x3xf32>
    %311 = tpu.concatenate %305, %310 in 1 : vector<16x1xf32>, vector<16x3xf32> -> vector<16x4xf32>
    %c0_56 = arith.constant 0 : index
    %c0_57 = arith.constant 0 : index
    %312 = vector.load %arg20[%c0_56, %c0_57] : memref<16x4xf32, #tpu.memory_space<vmem>>, vector<16x4xf32>
    tpu.vector_store %arg20[%c0_56, %c0_57], %311 {strides = array<i32>} : memref<16x4xf32, #tpu.memory_space<vmem>>, vector<16x4xf32>,
    return
  }
  func.func @transform_0(%arg0: i32) -> (i32, i32) {
    %c0_i32 = arith.constant 0 : i32
    %c0_i32_0 = arith.constant 0 : i32
    %c0_i32_1 = arith.constant 0 : i32
    return %c0_i32, %c0_i32_0 : i32, i32
  }
  func.func @transform_1(%arg0: i32) -> (i32, i32, i32) {
    %c0_i32 = arith.constant 0 : i32
    %c0_i32_0 = arith.constant 0 : i32
    %c0_i32_1 = arith.constant 0 : i32
    return %arg0, %c0_i32, %c0_i32_0 : i32, i32, i32
  }
  func.func @transform_2(%arg0: i32) -> (i32, i32) {
    %c0_i32 = arith.constant 0 : i32
    %c0_i32_0 = arith.constant 0 : i32
    %c0_i32_1 = arith.constant 0 : i32
    return %c0_i32, %c0_i32_0 : i32, i32
  }
  func.func @transform_3(%arg0: i32) -> (i32, i32) {
    %c0_i32 = arith.constant 0 : i32
    %c0_i32_0 = arith.constant 0 : i32
    %c0_i32_1 = arith.constant 0 : i32
    return %c0_i32, %c0_i32_0 : i32, i32
  }
  func.func @transform_4(%arg0: i32) -> (i32, i32) {
    %c0_i32 = arith.constant 0 : i32
    %c0_i32_0 = arith.constant 0 : i32
    %c0_i32_1 = arith.constant 0 : i32
    return %c0_i32, %c0_i32_0 : i32, i32
  }
  func.func @transform_5(%arg0: i32) -> (i32, i32) {
    %c0_i32 = arith.constant 0 : i32
    %c0_i32_0 = arith.constant 0 : i32
    %c0_i32_1 = arith.constant 0 : i32
    return %c0_i32, %c0_i32_0 : i32, i32
  }
  func.func @transform_6(%arg0: i32) -> (i32, i32) {
    %c0_i32 = arith.constant 0 : i32
    %c0_i32_0 = arith.constant 0 : i32
    %c0_i32_1 = arith.constant 0 : i32
    return %c0_i32, %c0_i32_0 : i32, i32
  }
  func.func @transform_7(%arg0: i32) -> (i32, i32) {
    %c0_i32 = arith.constant 0 : i32
    %c0_i32_0 = arith.constant 0 : i32
    %c0_i32_1 = arith.constant 0 : i32
    return %c0_i32, %c0_i32_0 : i32, i32
  }
  func.func @transform_8(%arg0: i32) -> (i32, i32) {
    %c0_i32 = arith.constant 0 : i32
    %c0_i32_0 = arith.constant 0 : i32
    %c0_i32_1 = arith.constant 0 : i32
    return %c0_i32, %c0_i32_0 : i32, i32
  }
  func.func @transform_9(%arg0: i32) -> (i32, i32) {
    %c0_i32 = arith.constant 0 : i32
    %c0_i32_0 = arith.constant 0 : i32
    %c0_i32_1 = arith.constant 0 : i32
    return %c0_i32, %c0_i32_0 : i32, i32
  }
  func.func @transform_10(%arg0: i32) -> (i32, i32) {
    %c0_i32 = arith.constant 0 : i32
    %c0_i32_0 = arith.constant 0 : i32
    %c0_i32_1 = arith.constant 0 : i32
    return %c0_i32, %c0_i32_0 : i32, i32
  }
  func.func @transform_11(%arg0: i32) -> (i32, i32) {
    %c0_i32 = arith.constant 0 : i32
    %c0_i32_0 = arith.constant 0 : i32
    %c0_i32_1 = arith.constant 0 : i32
    return %c0_i32, %c0_i32_0 : i32, i32
  }
  func.func @transform_12(%arg0: i32) -> (i32, i32) {
    %c0_i32 = arith.constant 0 : i32
    %c0_i32_0 = arith.constant 0 : i32
    %c0_i32_1 = arith.constant 0 : i32
    return %c0_i32, %c0_i32_0 : i32, i32
  }
  func.func @transform_13(%arg0: i32) -> (i32, i32) {
    %c0_i32 = arith.constant 0 : i32
    %c0_i32_0 = arith.constant 0 : i32
    %c0_i32_1 = arith.constant 0 : i32
    return %c0_i32, %c0_i32_0 : i32, i32
  }
  func.func @transform_14(%arg0: i32) -> (i32, i32) {
    %c0_i32 = arith.constant 0 : i32
    %c0_i32_0 = arith.constant 0 : i32
    %c0_i32_1 = arith.constant 0 : i32
    return %c0_i32, %c0_i32_0 : i32, i32
  }
  func.func @transform_15(%arg0: i32) -> (i32, i32) {
    %c0_i32 = arith.constant 0 : i32
    %c0_i32_0 = arith.constant 0 : i32
    %c0_i32_1 = arith.constant 0 : i32
    return %c0_i32, %c0_i32_0 : i32, i32
  }
  func.func @transform_16(%arg0: i32) -> (i32, i32) {
    %c0_i32 = arith.constant 0 : i32
    %c0_i32_0 = arith.constant 0 : i32
    %c0_i32_1 = arith.constant 0 : i32
    return %c0_i32, %c0_i32_0 : i32, i32
  }
  func.func @transform_17(%arg0: i32) -> (i32, i32) {
    %c0_i32 = arith.constant 0 : i32
    %c0_i32_0 = arith.constant 0 : i32
    %c0_i32_1 = arith.constant 0 : i32
    return %c0_i32, %c0_i32_0 : i32, i32
  }
  func.func @transform_18(%arg0: i32) -> (i32, i32, i32) {
    %c0_i32 = arith.constant 0 : i32
    %c0_i32_0 = arith.constant 0 : i32
    %c0_i32_1 = arith.constant 0 : i32
    return %arg0, %c0_i32, %c0_i32_0 : i32, i32, i32
  }
}

</mosaic_0001>

<bundles_post_ra>
// kernel: atgru_decoder_forward.2
= control target key start
LH: loop header
LB: loop body
LE: loop exit
PB: predicated region body
PF: predicated region fallthrough
CT: control target
= control target key end

     0   :  { %s2170_s0 = inlined_call_operand.hbm [shape: f32[8,10], index: 0, kind: input, shape index: {}]   ;;  %s2171_s1 = inlined_call_operand.vmem [shape: f32[10,8], index: 1, kind: input, shape index: {}]   ;;  %s2172_s2 = inlined_call_operand.hbm [shape: f32[8,10], index: 2, kind: input, shape index: {}]   ;;  %s2173_s3 = inlined_call_operand.hbm [shape: f32[2,16,32], index: 3, kind: input, shape index: {}]   ;;  %s2174_s4 = inlined_call_operand.vmem [shape: f32[64,32], index: 4, kind: input, shape index: {}]   ;;  %s2175_s5 = inlined_call_operand.vmem [shape: f32[32,32], index: 5, kind: input, shape index: {}]   ;;  %s2176_s6 = inlined_call_operand.vmem [shape: f32[32,32], index: 6, kind: input, shape index: {}]   ;;  %s2177_s7 = inlined_call_operand.hbm [shape: f32[1,32], index: 7, kind: input, shape index: {}]   ;;  %s2178_s8 = inlined_call_operand.hbm [shape: f32[1,32], index: 8, kind: input, shape index: {}]   ;;  %s2179_s9 = inlined_call_operand.hbm [shape: f32[10,64], index: 9, kind: input, shape index: {}]   ;;  %s2180_s10 = inlined_call_operand.hbm [shape: f32[10,64], index: 10, kind: input, shape index: {}]   ;;  %s2181_s11 = inlined_call_operand.hbm [shape: f32[10,32], index: 11, kind: input, shape index: {}]   ;;  %s2182_s12 = inlined_call_operand.hbm [shape: f32[10,32], index: 12, kind: input, shape index: {}]   ;;  %s2183_s13 = inlined_call_operand.vmem [shape: f32[2,8,8], index: 13, kind: output, shape index: {0}]   ;;  %s2184_s14 = inlined_call_operand.vmem [shape: f32[2,16,32], index: 14, kind: output, shape index: {1}]   ;;  %s2185_s15 = inlined_call_operand.vmem [shape: f32[8,64], index: 15, kind: output, shape index: {2}]   ;;  %s2186_s16 = inlined_call_operand.vmem [shape: f32[8,64], index: 16, kind: output, shape index: {3}]   ;;  %s2187_s17 = inlined_call_operand.vmem [shape: f32[8,32], index: 17, kind: output, shape index: {4}]   ;;  %s2188_s18 = inlined_call_operand.vmem [shape: f32[8,32], index: 18, kind: output, shape index: {5}]  }
   0x1   :  { %2192 = sst [smem:[#allocation21_spill]] %s2170_s0 }
   0x2   :  { %2193 = sst [smem:[#allocation22_spill]] %s2171_s1 }
   0x3   :  { %2194 = sst [smem:[#allocation23_spill]] %s2172_s2 }
   0x4   :  { %24 = vsyncpa [#allocation3], 0 }
   0x5   :  { %25 = vsyncpa [#allocation5], 0 }
   0x6   :  { %26 = vsyncpa [#allocation8], 0 }
   0x7   :  { %27 = vsyncpa [#allocation11], 0 }
   0x8   :  { %28 = vsyncpa [#allocation14], 0  ;;  %s1679_s27 = smov [#allocation4]   ;;  %s1680_s29 = smov [#allocation7]  }
   0x9   :  { %s47_s28 = sshll.u32 %s1679_s27, 4  ;;  %s75_s30 = sshll.u32 %s1680_s29, 4  ;;  %s48_s28 = int_to_ptr.vmem [resolvable:$true] %s47_s28  ;;  %s76_s30 = int_to_ptr.vmem [resolvable:$true] %s75_s30 }
   0xa   :  { %s2195_s1 = sld [smem:[#allocation23_spill]] }
  0x10   :  { %s1471_s20 = scalar_lea.hbm %s2195_s1, 128 }
  0x11   :  { %p1472_p0 = scmp.ne.s32.totalorder %s2195_s1, %s1471_s20  ;;  %p1475_p1 = scmp.lt.u32.totalorder %s1471_s20, %s2195_s1 }
  0x13   :  { %p1477_p2 = pnand %p1475_p1, %p1472_p0 }
  0x15   :  { %1480 = shalt.err (!%p1477_p2)
}
  0x16   :  { %s1481_s24 = scalar_lea.vmem %s48_s28, 128  ;;  %p1486_p4 = scmp.lt.s32.totalorder %s48_s28, %s48_s28 }
  0x17   :  { %p1482_p3 = scmp.ne.s32.totalorder %s48_s28, %s1481_s24  ;;  %p1487_p5 = scmp.lt.s32.totalorder %s1481_s24, %s1481_s24 }
  0x19   :  { %p1488_p6 = por %p1487_p5, %p1486_p4 }
  0x1b   :  { %p1489_p7 = pnand %p1488_p6, %p1482_p3 }
  0x1d   :  { %1492 = shalt.err (!%p1489_p7)
}
  0x1e   :  { %50 = dma.hbm_to_vmem [thread:$0]  %s2195_s1, 128, %s48_s28, [#allocation5]  }
  0x1f   :  { %s1493_s0 = scalar_lea.hbm %s2177_s7, 16 }
  0x20   :  { %p1494_p8 = scmp.ne.s32.totalorder %s2177_s7, %s1493_s0  ;;  %p1497_p9 = scmp.lt.u32.totalorder %s1493_s0, %s2177_s7 }
  0x22   :  { %p1499_p10 = pnand %p1497_p9, %p1494_p8 }
  0x24   :  { %1502 = shalt.err (!%p1499_p10)
}
  0x25   :  { %s1503_s2 = scalar_lea.vmem %s76_s30, 16  ;;  %s1507_s23 = scalar_lea.vmem %s76_s30, 32 }
  0x26   :  { %p1504_p11 = scmp.ne.s32.totalorder %s76_s30, %s1503_s2  ;;  %p1508_p12 = scmp.lt.s32.totalorder %s76_s30, %s76_s30 }
  0x27   :  { %p1509_p13 = scmp.lt.s32.totalorder %s1507_s23, %s1503_s2 }
  0x29   :  { %p1510_p0 = por %p1509_p13, %p1508_p12 }
  0x2b   :  { %p1511_p1 = pnand %p1510_p0, %p1504_p11 }
  0x2d   :  { %1514 = shalt.err (!%p1511_p1)
}
  0x2e   :  { %78 = dma.hbm_to_vmem [thread:$0]  %s2177_s7, 16, %s76_s30, [#allocation8]  }
  0x2f   :  { %s1681_s24 = smov [#allocation10]   ;;  %s1682_s26 = smov [#allocation13]  }
  0x30   :  { %s94_s25 = sshll.u32 %s1681_s24, 4  ;;  %s118_s27 = sshll.u32 %s1682_s26, 4  ;;  %s95_s25 = int_to_ptr.vmem [resolvable:$true] %s94_s25  ;;  %s1817_s27 = int_to_ptr.vmem [resolvable:$true] %s118_s27 }
  0x31   :  { %s1515_s19 = scalar_lea.hbm %s2179_s9, 256 }
  0x32   :  { %p1516_p2 = scmp.ne.s32.totalorder %s2179_s9, %s1515_s19  ;;  %p1519_p3 = scmp.lt.u32.totalorder %s1515_s19, %s2179_s9 }
  0x34   :  { %p1521_p4 = pnand %p1519_p3, %p1516_p2 }
  0x36   :  { %1524 = shalt.err (!%p1521_p4)
}
  0x37   :  { %s1525_s7 = scalar_lea.vmem %s95_s25, 256  ;;  %p1530_p6 = scmp.lt.s32.totalorder %s95_s25, %s95_s25 }
  0x38   :  { %p1526_p5 = scmp.ne.s32.totalorder %s95_s25, %s1525_s7  ;;  %p1531_p7 = scmp.lt.s32.totalorder %s1525_s7, %s1525_s7 }
  0x3a   :  { %p1532_p8 = por %p1531_p7, %p1530_p6 }
  0x3c   :  { %p1533_p9 = pnand %p1532_p8, %p1526_p5 }
  0x3e   :  { %1536 = shalt.err (!%p1533_p9)
}
  0x3f   :  { %s1683_s30 = smov 128   ;;  %s1684_s23 = smov 8  }
  0x40   :  { %100 = dma.hbm_to_vmem [thread:$0]  %s2179_s9, 256, %s95_s25, [#allocation11], %s1683_s30, %s1683_s30, %s1684_s23  }
  0x41   :  { %s1537_s29 = scalar_lea.hbm %s2181_s11, 256 }
  0x42   :  { %p1538_p10 = scmp.ne.s32.totalorder %s2181_s11, %s1537_s29  ;;  %p1541_p11 = scmp.lt.u32.totalorder %s1537_s29, %s2181_s11 }
  0x44   :  { %p1543_p12 = pnand %p1541_p11, %p1538_p10 }
  0x46   :  { %1546 = shalt.err (!%p1543_p12)
}
  0x47   :  { %s1547_s22 = scalar_lea.vmem %s1817_s27, 256  ;;  %p1552_p0 = scmp.lt.s32.totalorder %s1817_s27, %s1817_s27 }
  0x48   :  { %p1548_p13 = scmp.ne.s32.totalorder %s1817_s27, %s1547_s22  ;;  %p1553_p1 = scmp.lt.s32.totalorder %s1547_s22, %s1547_s22 }
  0x4a   :  { %p1554_p2 = por %p1553_p1, %p1552_p0 }
  0x4c   :  { %p1555_p3 = pnand %p1554_p2, %p1548_p13 }
  0x4e   :  { %1558 = shalt.err (!%p1555_p3)
}
  0x4f   :  { %124 = dma.hbm_to_vmem [thread:$0]  %s2181_s11, 256, %s1817_s27, [#allocation14], %s1683_s30, %s1683_s30, %s1684_s23  }
  0x50   :  { %s1685_s2 = smov [#allocation2]   ;;  %s1686_s28 = smov [#allocation6]  }
  0x51   :  { %s35_s7 = sshll.u32 %s1685_s2, 4  ;;  %s56_s1 = sshll.u32 %s1686_s28, 4  ;;  %s36_s7 = int_to_ptr.vmem [resolvable:$true] %s35_s7  ;;  %s1854_s1 = int_to_ptr.vmem [resolvable:$true] %s56_s1 }
  0x52   :  { %s2196_s29 = sld [smem:[#allocation21_spill]] }
  0x58   :  { %s1559_s0 = scalar_lea.hbm %s2196_s29, 128 }
  0x59   :  { %p1560_p4 = scmp.ne.s32.totalorder %s2196_s29, %s1559_s0  ;;  %p1563_p5 = scmp.lt.u32.totalorder %s1559_s0, %s2196_s29 }
  0x5b   :  { %p1565_p6 = pnand %p1563_p5, %p1560_p4 }
  0x5d   :  { %1568 = shalt.err (!%p1565_p6)
}
  0x5e   :  { %s1569_s11 = scalar_lea.vmem %s36_s7, 128  ;;  %p1574_p8 = scmp.lt.s32.totalorder %s36_s7, %s36_s7 }
  0x5f   :  { %p1570_p7 = scmp.ne.s32.totalorder %s36_s7, %s1569_s11  ;;  %p1575_p9 = scmp.lt.s32.totalorder %s1569_s11, %s1569_s11 }
  0x61   :  { %p1576_p10 = por %p1575_p9, %p1574_p8 }
  0x63   :  { %p1577_p11 = pnand %p1576_p10, %p1570_p7 }
  0x65   :  { %1580 = shalt.err (!%p1577_p11)
}
  0x66   :  { %38 = dma.hbm_to_vmem [thread:$0]  %s2196_s29, 128, %s36_s7, [#allocation3]  }
  0x67   :  { %s1581_s28 = scalar_lea.hbm %s2173_s3, 512 }
  0x68   :  { %p1582_p12 = scmp.ne.s32.totalorder %s2173_s3, %s1581_s28  ;;  %p1585_p13 = scmp.lt.u32.totalorder %s1581_s28, %s2173_s3 }
  0x6a   :  { %p1587_p0 = pnand %p1585_p13, %p1582_p12 }
  0x6c   :  { %1590 = shalt.err (!%p1587_p0)
}
  0x6d   :  { %s1591_s21 = scalar_lea.vmem %s1854_s1, 512  ;;  %p1596_p2 = scmp.lt.s32.totalorder %s1854_s1, %s1854_s1 }
  0x6e   :  { %p1592_p1 = scmp.ne.s32.totalorder %s1854_s1, %s1591_s21  ;;  %p1597_p3 = scmp.lt.s32.totalorder %s1591_s21, %s1591_s21 }
  0x70   :  { %p1598_p4 = por %p1597_p3, %p1596_p2 }
  0x72   :  { %p1599_p5 = pnand %p1598_p4, %p1592_p1 }
  0x74   :  { %1602 = shalt.err (!%p1599_p5)
}
  0x75   :  { %62 = dma.hbm_to_vmem [thread:$0]  %s2173_s3, 512, %s1854_s1, [#allocation5], %s1683_s30, %s1683_s30, %s1684_s23  }
  0x76   :  { %s1687_s20 = smov [#allocation9]   ;;  %s1688_s11 = smov [#allocation12]  }
  0x77   :  { %s85_s22 = sshll.u32 %s1687_s20, 4  ;;  %s106_s27 = sshll.u32 %s1688_s11, 4  ;;  %s86_s22 = int_to_ptr.vmem [resolvable:$true] %s85_s22  ;;  %s1888_s27 = int_to_ptr.vmem [resolvable:$true] %s106_s27 }
  0x78   :  { %s1603_s2 = scalar_lea.hbm %s2178_s8, 16 }
  0x79   :  { %p1604_p6 = scmp.ne.s32.totalorder %s2178_s8, %s1603_s2  ;;  %p1607_p7 = scmp.lt.u32.totalorder %s1603_s2, %s2178_s8 }
  0x7b   :  { %p1609_p8 = pnand %p1607_p7, %p1604_p6 }
  0x7d   :  { %1612 = shalt.err (!%p1609_p8)
}
  0x7e   :  { %s1613_s3 = scalar_lea.vmem %s86_s22, 16  ;;  %s1617_s1 = scalar_lea.vmem %s86_s22, 32 }
  0x7f   :  { %p1614_p9 = scmp.ne.s32.totalorder %s86_s22, %s1613_s3  ;;  %p1618_p10 = scmp.lt.s32.totalorder %s86_s22, %s86_s22 }
  0x80   :  { %p1619_p11 = scmp.lt.s32.totalorder %s1617_s1, %s1613_s3 }
  0x82   :  { %p1620_p12 = por %p1619_p11, %p1618_p10 }
  0x84   :  { %p1621_p13 = pnand %p1620_p12, %p1614_p9 }
  0x86   :  { %1624 = shalt.err (!%p1621_p13)
}
  0x87   :  { %88 = dma.hbm_to_vmem [thread:$0]  %s2178_s8, 16, %s86_s22, [#allocation8]  }
  0x88   :  { %s1625_s20 = scalar_lea.hbm %s2180_s10, 256 }
  0x89   :  { %p1626_p0 = scmp.ne.s32.totalorder %s2180_s10, %s1625_s20  ;;  %p1629_p1 = scmp.lt.u32.totalorder %s1625_s20, %s2180_s10 }
  0x8b   :  { %p1631_p2 = pnand %p1629_p1, %p1626_p0 }
  0x8d   :  { %1634 = shalt.err (!%p1631_p2)
}
  0x8e   :  { %s1635_s28 = scalar_lea.vmem %s1888_s27, 256  ;;  %p1640_p4 = scmp.lt.s32.totalorder %s1888_s27, %s1888_s27 }
  0x8f   :  { %p1636_p3 = scmp.ne.s32.totalorder %s1888_s27, %s1635_s28  ;;  %p1641_p5 = scmp.lt.s32.totalorder %s1635_s28, %s1635_s28 }
  0x91   :  { %p1642_p6 = por %p1641_p5, %p1640_p4 }
  0x93   :  { %p1643_p7 = pnand %p1642_p6, %p1636_p3 }
  0x95   :  { %1646 = shalt.err (!%p1643_p7)
}
  0x96   :  { %112 = dma.hbm_to_vmem [thread:$0]  %s2180_s10, 256, %s1888_s27, [#allocation11], %s1683_s30, %s1683_s30, %s1684_s23  }
  0x97   :  { %s1689_s24 = smov [#allocation15]   ;;  %s1647_s1 = scalar_lea.hbm %s2182_s12, 256 }
  0x98   :  { %s130_s26 = sshll.u32 %s1689_s24, 4  ;;  %p1648_p8 = scmp.ne.s32.totalorder %s2182_s12, %s1647_s1  ;;  %s131_s26 = int_to_ptr.vmem [resolvable:$true] %s130_s26 }
  0x99   :  { %p1651_p9 = scmp.lt.u32.totalorder %s1647_s1, %s2182_s12 }
  0x9b   :  { %p1653_p10 = pnand %p1651_p9, %p1648_p8 }
  0x9d   :  { %1656 = shalt.err (!%p1653_p10)
}
  0x9e   :  { %s1657_s20 = scalar_lea.vmem %s131_s26, 256  ;;  %p1662_p12 = scmp.lt.s32.totalorder %s131_s26, %s131_s26 }
  0x9f   :  { %p1658_p11 = scmp.ne.s32.totalorder %s131_s26, %s1657_s20  ;;  %p1663_p13 = scmp.lt.s32.totalorder %s1657_s20, %s1657_s20 }
  0xa1   :  { %p1664_p0 = por %p1663_p13, %p1662_p12 }
  0xa3   :  { %p1665_p1 = pnand %p1664_p0, %p1658_p11 }
  0xa5   :  { %1668 = shalt.err (!%p1665_p1)
}
  0xa6   :  { %136 = dma.hbm_to_vmem [thread:$0]  %s2182_s12, 256, %s131_s26, [#allocation14], %s1683_s30, %s1683_s30, %s1684_s23  }
  0xa7   :  { %1669 = dma.done.wait [#allocation3], 128  }
  0xa8   :  { %1670 = vsyncadd [#allocation3], 4294967168 }
  0xa9   :  { %1671 = dma.done.wait [#allocation5], 640  }
  0xaa   :  { %1672 = vsyncadd [#allocation5], 4294966656 }
  0xab   :  { %1673 = dma.done.wait [#allocation8], 32  }
  0xac   :  { %1674 = vsyncadd [#allocation8], 4294967264 }
  0xad   :  { %1675 = dma.done.wait [#allocation11], 512  }
  0xae   :  { %1676 = vsyncadd [#allocation11], 4294966784 }
  0xaf   :  { %1677 = dma.done.wait [#allocation14], 512  }
  0xb0   :  { %1678 = vsyncadd [#allocation14], 4294966784  ;;  %v1690_v0 = vmov 0.0|0.0   ;;  %vm1691_vm0 = vmmov 0   ;;  %v1692_v1 = vmov 0.0   ;;  %vm171_vm1 = vcmask 1041408  }
  0xb1   :  { %1340 = vmatprep.subr.bf16.mxu0 %v1690_v0  ;;  %1344 = vmatprep.subr.bf16.mxu1 %v1690_v0  ;;  %vm1693_vm2 = vmmov 1   ;;  %s2199_s23 = sld [smem:[#allocation22_spill]]  ;;  %v268_v5 = vld [vmem:[#allocation10] sm:$0xff]  ;;  %v269_v7 = vld [vmem:[#allocation10 + $0x8] sm:$0x3]  ;;  %v164_v8 = vld [vmem:[#allocation2] sm:$0xff] }
  0xb2   :  { %1267 = vmatprep.mubr.msk.f32.mxu0 %vm1691_vm0, %v1692_v1  ;;  %1274 = vmatprep.mubr.msk.f32.mxu1 %vm1691_vm0, %v1692_v1  ;;  %vm1941_vm3 = vmpackc.low %vm171_vm1, %vm1693_vm2  ;;  %v1345_v9 = vpack.c.bf16 %v269_v7, %v268_v5  ;;  %v348_v10 = vld [vmem:[#allocation13] sm:$0xff]  ;;  %v349_v11 = vld [vmem:[#allocation13 + $0x8] sm:$0x3]  ;;  %vm167_vm4 = vcmask 80896   ;;  %vm423_vm5 = vcmask 261120   ;;  %vm346_vm6 = vcmask 523264  }
  0xb3   :  { %v425_v12 = vld [vmem:[#allocation12] sm:$0xff]  ;;  %v1349_v13 = vpack.c.bf16 %v349_v11, %v348_v10  ;;  %v426_v14 = vld [vmem:[#allocation12 + $0x8] sm:$0x3]  ;;  %v587_v21 = vld [vmem:[%s2176_s6 + $0x10] sm:$0xff]  ;;  %vm246_vm8 = vcmask 64512   ;;  %vm867_vm9 = vcmask 7168  }
  0xb4   :  { %v585_v15 = vld [vmem:[%s2176_s6] sm:$0xff]  ;;  %v586_v16 = vld [vmem:[%s2176_s6 + $0x8] sm:$0xff]  ;;  %1347 = vmatpush3.bf16.msk.msra.mxu1 %vm1941_vm3, %v1345_v9  ;;  %v1353_v18 = vpack.c.bf16 %v426_v14, %v425_v12  ;;  %v588_v23 = vld [vmem:[%s2176_s6 + $0x18] sm:$0xff]  ;;  %vm870_vm10 = vcmask 15360   ;;  %vm873_vm11 = vcmask 23552   ;;  %vm876_vm12 = vcmask 31744  }
  0xb5   :  { %v267_v17 = vld [vmem:[#allocation4] sm:$0xff]  ;;  %1352 = vmatprep.subr.bf16.mxu1 %v1690_v0  ;;  %v1360_v22 = vpack.c.bf16 %v586_v16, %v585_v15  ;;  %v722_v24 = vld [vmem:[%s2175_s5] sm:$0xff]  ;;  %v1364_v27 = vpack.c.bf16 %v588_v23, %v587_v21  ;;  %v724_v29 = vld [vmem:[%s2175_s5 + $0x10] sm:$0xff] }
  0xb6   :  { %v501_v19 = vld [vmem:[#allocation15] sm:$0xff]  ;;  %v502_v20 = vld [vmem:[#allocation15 + $0x8] sm:$0x3]  ;;  %v725_v30 = vld [vmem:[%s2175_s5 + $0x18] sm:$0xff] }
  0xb7   :  { %v165_v3 = vld [vmem:[%s2199_s23] sm:$0xff]  ;;  %v166_v4 = vld [vmem:[%s2199_s23 + $0x8] sm:$0x3]  ;;  %1275 = vmatmul.mubr.msk.f32.vlgmr.msra.gmra.mrb[0].mxu1 %vm167_vm4, %v267_v17  ;;  %v1357_v26 = vpack.c.bf16 %v502_v20, %v501_v19  ;;  %v1372_v32 = vpack.c.bf16 %v725_v30, %v724_v29  ;;  %v720_v33 = vld [vmem:[#allocation6] sm:$0xff] }
  0xb8   :  { %v1341_v6 = vpack.c.bf16 %v166_v4, %v165_v3  ;;  %v723_v25 = vld [vmem:[%s2175_s5 + $0x8] sm:$0xff]  ;;  %1355 = vmatpush3.bf16.msk.msra.mxu1 %vm1941_vm3, %v1353_v18  ;;  %1288 = vmatprep.mubr.msk.f32.mxu1 %vm1691_vm0, %v1692_v1  ;;  %v1996_v31 = vld [vmem:[%s2174_s4] sm:$0xff]  ;;  %v2012_v35 = vld [vmem:[%s2174_s4 + $0x10] sm:$0xff] }
  0xb9   :  { %v1368_v28 = vpack.c.bf16 %v723_v25, %v722_v24  ;;  %1361 = vmatprep.subr.bf16.mxu1 %v1360_v22  ;;  %v2007_v34 = vld [vmem:[%s2174_s4 + $0x8] sm:$0xff]  ;;  %v721_v36 = vld [vmem:[#allocation6 + $0x8] sm:$0xff]  ;;  %v2026_v38 = vld [vmem:[%s2174_s4 + $0x20] sm:$0xff] }
  0xba   :  { %1343 = vmatpush3.bf16.msk.msra.mxu0 %vm1941_vm3, %v1341_v6  ;;  %v2021_v37 = vld [vmem:[%s2174_s4 + $0x18] sm:$0xff]  ;;  %v952_v39 = vld [vmem:[#allocation6 + $0x10] sm:$0xff]  ;;  %v2036_v40 = vld [vmem:[%s2174_s4 + $0x28] sm:$0xff] }
  0xbb   :  { %1348 = vmatprep.subr.bf16.mxu0 %v1690_v0  ;;  %1289 = vmatmul.mubr.msk.f32.vlgmr.msra.gmra.mrb[2].mxu1 %vm167_vm4, %v267_v17  ;;  %v2041_v41 = vld [vmem:[%s2174_s4 + $0x30] sm:$0xff]  ;;  %v953_v42 = vld [vmem:[#allocation6 + $0x18] sm:$0xff]  ;;  %v2051_v43 = vld [vmem:[%s2174_s4 + $0x38] sm:$0xff] }
  0xbc   :  { %1363 = vmatpush3.bf16.msra.mxu1 %v1360_v22  ;;  %1306 = vmatprep.mubr.msk.f32.mxu1 %vm423_vm5, %v1996_v31  ;;  %v1216_v56 = vld [vmem:[#allocation7] ss:$0 sm:$0xff]  ;;  %v2072_v24 = vld [vmem:[#allocation9] ss:$0 sm:$0xff] }
  0xbd   :  { %1268 = vmatmul.mubr.msk.f32.vlgmr.msra.gmra.mrb[0].mxu0 %vm167_vm4, %v164_v8  ;;  %1365 = vmatprep.subr.bf16.mxu1 %v1364_v27 }
  0xbe   :  { %1351 = vmatpush3.bf16.msk.msra.mxu0 %vm1941_vm3, %v1349_v13  ;;  %1281 = vmatprep.mubr.msk.f32.mxu0 %vm1691_vm0, %v1692_v1 }
  0xbf   :  { %1356 = vmatprep.subr.bf16.mxu0 %v1690_v0 }
  0xc0   :  { %1367 = vmatpush3.bf16.msra.mxu1 %v1364_v27 }
  0xc1   :  { %1282 = vmatmul.mubr.msk.f32.vlgmr.msra.gmra.mrb[2].mxu0 %vm167_vm4, %v267_v17 }
  0xc2   :  { %1359 = vmatpush3.bf16.msk.msra.mxu0 %vm1941_vm3, %v1357_v26  ;;  %1295 = vmatprep.mubr.msk.f32.mxu0 %vm1691_vm0, %v1692_v1 }
  0xc3   :  { %1369 = vmatprep.subr.bf16.mxu0 %v1368_v28  ;;  %1307 = vmatmul.mubr.msk.f32.vlgmr.msra.gmra.mrb[4].mxu1 %vm423_vm5, %v2007_v34 }
  0xc4   :  { %1309 = vmatprep.mubr.msk.f32.mxu1 %vm423_vm5, %v2012_v35 }
  0xc5   :  { %1296 = vmatmul.mubr.msk.f32.vlgmr.msra.gmra.mrb[4].mxu0 %vm167_vm4, %v267_v17 }
  0xc6   :  { %1371 = vmatpush3.bf16.msra.mxu0 %v1368_v28  ;;  %1326 = vmatprep.mubr.msk.f32.mxu0 %vm423_vm5, %v720_v33 }
  0xc7   :  { %1373 = vmatprep.subr.bf16.mxu0 %v1372_v32  ;;  %1310 = vmatmul.mubr.msk.f32.gmra.mrb[6].mxu1 %vm423_vm5, %v2021_v37 }
  0xc8   :  { %1312 = vmatprep.mubr.msk.f32.mxu1 %vm423_vm5, %v2026_v38 }
  0xca   :  { %1375 = vmatpush3.bf16.msra.mxu0 %v1372_v32 }
  0xcb   :  { %1377 = vmatprep.subr.bf16.mxu0 %v1368_v28  ;;  %1313 = vmatmul.mubr.msk.f32.gmra.mrb[8].mxu1 %vm423_vm5, %v2036_v40 }
  0xcc   :  { %1315 = vmatprep.mubr.msk.f32.mxu1 %vm423_vm5, %v2041_v41 }
  0xcd   :  { %1327 = vmatmul.mubr.msk.f32.vlgmr.msra.gmra.mrb[6].mxu0 %vm423_vm5, %v721_v36 }
  0xce   :  { %1379 = vmatpush3.bf16.msra.mxu0 %v1368_v28  ;;  %1337 = vmatprep.mubr.msk.f32.mxu0 %vm423_vm5, %v952_v39 }
  0xcf   :  { %1381 = vmatprep.subr.bf16.mxu0 %v1372_v32  ;;  %1316 = vmatmul.mubr.msk.f32.gmra.mrb[10].mxu1 %vm423_vm5, %v2051_v43 }
  0xd2   :  { %1383 = vmatpush3.bf16.msra.mxu0 %v1372_v32 }
  0xd5   :  { %1338 = vmatmul.mubr.msk.f32.vlgmr.msra.gmra.mrb[8].mxu0 %vm423_vm5, %v953_v42 }
 0x18a   :  { %v342_v46 = vpop.f32.mrb[0].mxu1 }
 0x18b   :  { %347 = vst.msk [vmem:[%s2185_s15] sm:$0xff] %vm346_vm6, %v342_v46  ;;  %v1276_v47 = vpop.f32.mrb[1].mxu1 }
 0x18e   :  { %v496_v50 = vpop.f32.mrb[2].mxu1 }
 0x18f   :  { %500 = vst.msk [vmem:[%s2186_s16] sm:$0xff] %vm346_vm6, %v496_v50  ;;  %v1290_v51 = vpop.f32.mrb[3].mxu1 }
 0x190   :  { %v2056_v44 = vpop.f32.mrb[0].mxu0 }
 0x191   :  { %v1269_v45 = vpop.f32.mrb[1].mxu0 }
 0x194   :  { %v419_v48 = vpop.f32.mrb[2].mxu0 }
 0x195   :  { %424 = vst.msk [vmem:[%s2187_s17] sm:$0xff] %vm423_vm5, %v419_v48  ;;  %v1283_v49 = vpop.f32.mrb[3].mxu0 }
 0x196   :  { %v1308_v54 = vpop.f32.mrb[4].mxu1 }
 0x197   :  { %v679_v55 = vpop.f32.mrb[5].mxu1 }
 0x198   :  { %v572_v52 = vpop.f32.mrb[4].mxu0 }
 0x199   :  { %576 = vst.msk [vmem:[%s2188_s18] sm:$0xff] %vm423_vm5, %v572_v52  ;;  %v1297_v53 = vpop.f32.mrb[5].mxu0 }
 0x19a   :  { %v1311_v59 = vpop.f32.mrb[6].mxu1 }
 0x19b   :  { %v689_v62 = vpop.f32.mrb[7].mxu1 }
 0x19e   :  { %v1314_v4 = vpop.f32.mrb[8].mxu1 }
 0x19f   :  { %v699_v6 = vpop.f32.mrb[9].mxu1 }
 0x1a0   :  { %v1328_v57 = vpop.f32.mrb[6].mxu0 }
 0x1a1   :  { %v810_v58 = vadd.f32 %v1328_v57, %v1216_v56  ;;  %v804_v60 = vpop.f32.mrb[7].mxu0 }
 0x1a2   :  { %v805_v61 = vadd.f32 %v1216_v56, %v804_v60  ;;  %v1317_v9 = vpop.f32.mrb[10].mxu1 }
 0x1a3   :  { %v814_v63 = vadd.f32 %v1308_v54, %v810_v58  ;;  %v832_v0 = vadd.f32 %v1311_v59, %v810_v58  ;;  %v844_v5 = vadd.f32 %v1314_v4, %v810_v58  ;;  %v856_v12 = vadd.f32 %v1317_v9, %v810_v58  ;;  %v709_v13 = vpop.f32.mrb[11].mxu1 }
 0x1a4   :  { %v813_v2 = vadd.f32 %v805_v61, %v679_v55  ;;  %v831_v3 = vadd.f32 %v805_v61, %v689_v62  ;;  %v843_v7 = vadd.f32 %v805_v61, %v699_v6  ;;  %v855_v19 = vadd.f32 %v805_v61, %v709_v13 }
 0x1a5   :  { %1419 = vtanh.f32 %v814_v63 }
 0x1a6   :  { %1421 = vtanh.f32 %v832_v0 }
 0x1a7   :  { %1423 = vtanh.f32 %v813_v2 }
 0x1a8   :  { %1425 = vtanh.f32 %v831_v3  ;;  %v1339_v8 = vpop.f32.mrb[8].mxu0 }
 0x1a9   :  { %1427 = vtanh.f32 %v844_v5  ;;  %v1036_v10 = vadd.f32 %v1339_v8, %v1216_v56  ;;  %v1030_v11 = vpop.f32.mrb[9].mxu0 }
 0x1aa   :  { %1429 = vtanh.f32 %v843_v7  ;;  %v1031_v14 = vadd.f32 %v1216_v56, %v1030_v11 }
 0x1ab   :  { %v1040_v15 = vadd.f32 %v1308_v54, %v1036_v10  ;;  %v1052_v16 = vadd.f32 %v1311_v59, %v1036_v10  ;;  %v1064_v17 = vadd.f32 %v1314_v4, %v1036_v10  ;;  %v1076_v18 = vadd.f32 %v1317_v9, %v1036_v10 }
 0x1ac   :  { %v1039_v20 = vadd.f32 %v1031_v14, %v679_v55  ;;  %v1051_v21 = vadd.f32 %v1031_v14, %v689_v62  ;;  %v1063_v22 = vadd.f32 %v1031_v14, %v699_v6  ;;  %v1075_v23 = vadd.f32 %v1031_v14, %v709_v13 }
 0x1ad   :  { %1431 = vtanh.f32 %v856_v12 }
 0x1ae   :  { %1433 = vtanh.f32 %v1040_v15 }
 0x1af   :  { %v1420_v25 = vpop.eup %1419  ;;  %1435 = vtanh.f32 %v855_v19  ;;  %v258_v19 = vlaneseq }
 0x1b0   :  { %v1422_v26 = vpop.eup %1421  ;;  %v824_v27 = vmul.f32 %v1420_v25, %v2072_v24  ;;  %1437 = vtanh.f32 %v1039_v20 }
 0x1b1   :  { %v1424_v28 = vpop.eup %1423  ;;  %v836_v29 = vmul.f32 %v1422_v26, %v2072_v24  ;;  %1439 = vtanh.f32 %v1051_v21  ;;  %v259_v20 = vshrl.u32 %v258_v19, 7  ;;  %v261_v21 = vand.u32 127, %v258_v19 }
 0x1b2   :  { %v1426_v30 = vpop.eup %1425  ;;  %v828_v32 = vsel %vm423_vm5, %v824_v27, 0.0  ;;  %v823_v33 = vmul.f32 %v1424_v28, %v2072_v24  ;;  %1441 = vtanh.f32 %v1052_v16 }
 0x1b3   :  { %v1428_v36 = vpop.eup %1427  ;;  %v840_v39 = vsel %vm423_vm5, %v836_v29, 0.0  ;;  %829 = vadd.xlane.f32.xlu0 %v828_v32  ;;  %v835_v42 = vmul.f32 %v1426_v30, %v2072_v24  ;;  %1443 = vtanh.f32 %v1063_v22  ;;  %vm262_vm7 = vcmp.eq.s32.totalorder %v259_v20, %v261_v21 }
 0x1b4   :  { %v1430_v45 = vpop.eup %1429  ;;  %841 = vadd.xlane.f32.xlu1 %v840_v39  ;;  %v825_v46 = vsel %vm423_vm5, %v823_v33, 0.0  ;;  %v848_v49 = vmul.f32 %v1428_v36, %v2072_v24  ;;  %1445 = vtanh.f32 %v1064_v17  ;;  %v263_v22 = vsel %vm262_vm7, 1.0, %v1692_v1 }
 0x1b5   :  { %v847_v47 = vmul.f32 %v1430_v45, %v2072_v24  ;;  %v837_v48 = vsel %vm423_vm5, %v835_v42, 0.0  ;;  %1447 = vtanh.f32 %v1075_v23  ;;  %264 = vst.msk [vmem:[%s2183_s13] sm:$0xff] %vm246_vm8, %v263_v22 }
 0x1b6   :  { %v852_v54 = vsel %vm423_vm5, %v848_v49, 0.0  ;;  %1449 = vtanh.f32 %v1076_v18 }
 0x1b7   :  { %826 = vadd.xlane.f32.xlu0 %v825_v46  ;;  %v1432_v50 = vpop.eup %1431  ;;  %v849_v52 = vsel %vm423_vm5, %v847_v47, 0.0 }
 0x1b8   :  { %838 = vadd.xlane.f32.xlu1 %v837_v48  ;;  %v1434_v51 = vpop.eup %1433  ;;  %v860_v55 = vmul.f32 %v1432_v50, %v2072_v24 }
 0x1b9   :  { %v1436_v53 = vpop.eup %1435  ;;  %v1044_v62 = vmul.f32 %v1434_v51, %v2072_v24 }
 0x1ba   :  { %v1438_v56 = vpop.eup %1437  ;;  %v859_v57 = vmul.f32 %v1436_v53, %v2072_v24  ;;  %v864_v61 = vsel %vm423_vm5, %v860_v55, 0.0 }
 0x1bb   :  { %850 = vadd.xlane.f32.xlu0 %v849_v52  ;;  %v1043_v59 = vmul.f32 %v1438_v56, %v2072_v24  ;;  %v1440_v60 = vpop.eup %1439  ;;  %v1048_v4 = vsel %vm423_vm5, %v1044_v62, 0.0 }
 0x1bc   :  { %853 = vadd.xlane.f32.xlu1 %v852_v54  ;;  %v861_v58 = vsel %vm423_vm5, %v859_v57, 0.0  ;;  %v1442_v63 = vpop.eup %1441  ;;  %v1055_v2 = vmul.f32 %v1440_v60, %v2072_v24  ;;  %v245_v60 = vmax.f32 %v2056_v44, 0.0 }
 0x1bd   :  { %v1045_v0 = vsel %vm423_vm5, %v1043_v59, 0.0  ;;  %v1444_v3 = vpop.eup %1443  ;;  %v1056_v5 = vmul.f32 %v1442_v63, %v2072_v24 }
 0x1be   :  { %v1446_v6 = vpop.eup %1445  ;;  %v1057_v7 = vsel %vm423_vm5, %v1055_v2, 0.0  ;;  %v1067_v8 = vmul.f32 %v1444_v3, %v2072_v24 }
 0x1bf   :  { %862 = vadd.xlane.f32.xlu0 %v861_v58  ;;  %v1448_v9 = vpop.eup %1447  ;;  %v1060_v10 = vsel %vm423_vm5, %v1056_v5, 0.0  ;;  %v1068_v11 = vmul.f32 %v1446_v6, %v2072_v24 }
 0x1c0   :  { %865 = vadd.xlane.f32.xlu1 %v864_v61  ;;  %v1450_v12 = vpop.eup %1449  ;;  %v1069_v13 = vsel %vm423_vm5, %v1067_v8, 0.0  ;;  %v1079_v14 = vmul.f32 %v1448_v9, %v2072_v24 }
 0x1c1   :  { %v1072_v15 = vsel %vm423_vm5, %v1068_v11, 0.0  ;;  %v1080_v16 = vmul.f32 %v1450_v12, %v2072_v24 }
 0x1c2   :  { %v1081_v17 = vsel %vm423_vm5, %v1079_v14, 0.0 }
 0x1c3   :  { %1046 = vadd.xlane.f32.xlu0 %v1045_v0  ;;  %v1084_v18 = vsel %vm423_vm5, %v1080_v16, 0.0  ;;  %v247_v0 = vsel %vm246_vm8, %v245_v60, -inf }
 0x1c4   :  { %1049 = vadd.xlane.f32.xlu1 %v1048_v4 }
 0x1c7   :  { %1058 = vadd.xlane.f32.xlu0 %v1057_v7 }
 0x1c8   :  { %1061 = vadd.xlane.f32.xlu1 %v1060_v10 }
 0x1cb   :  { %1070 = vadd.xlane.f32.xlu0 %v1069_v13 }
 0x1cc   :  { %1073 = vadd.xlane.f32.xlu1 %v1072_v15 }
 0x1cf   :  { %1082 = vadd.xlane.f32.xlu0 %v1081_v17 }
 0x1d0   :  { %1085 = vadd.xlane.f32.xlu1 %v1084_v18 }
 0x240   :  { %v830_v23 = vpop.xlane.xlu0 %829 }
 0x241   :  { %v842_v24 = vpop.xlane.xlu1 %841 }
 0x242   :  { %v869_v30 = vsel %vm867_vm9, %v830_v23, %v842_v24  ;;  %v1694_v24 = vmov 0  }
 0x243   :  { %1407 = vset.pattern.permute.xlu0 %v1694_v24  ;;  %1403 = vset.pattern.permute.xlu1 %v1694_v24 }
 0x244   :  { %v827_v25 = vpop.xlane.xlu0 %826 }
 0x245   :  { %v839_v26 = vpop.xlane.xlu1 %838 }
 0x246   :  { %v868_v29 = vsel %vm867_vm9, %v827_v25, %v839_v26 }
 0x248   :  { %v851_v27 = vpop.xlane.xlu0 %850 }
 0x249   :  { %v854_v28 = vpop.xlane.xlu1 %853  ;;  %v871_v1 = vsel %vm870_vm10, %v868_v29, %v851_v27 }
 0x24a   :  { %v872_v33 = vsel %vm870_vm10, %v869_v30, %v854_v28 }
 0x24c   :  { %v863_v32 = vpop.xlane.xlu0 %862 }
 0x24d   :  { %v866_v36 = vpop.xlane.xlu1 %865  ;;  %v874_v39 = vsel %vm873_vm11, %v871_v1, %v863_v32 }
 0x24e   :  { %v875_v42 = vsel %vm873_vm11, %v872_v33, %v866_v36  ;;  %v877_v45 = vsel %vm876_vm12, %v874_v39, -inf }
 0x24f   :  { %v880_v46 = vsel %vm876_vm12, %v875_v42, -inf  ;;  %878 = vmax.xlane.f32.xlu0 %v877_v45 }
 0x250   :  { %881 = vmax.xlane.f32.xlu1 %v880_v46  ;;  %v1047_v47 = vpop.xlane.xlu0 %1046  ;;  %v1697_v46 = vmov 2  }
 0x251   :  { %v1050_v48 = vpop.xlane.xlu1 %1049 }
 0x254   :  { %v1059_v49 = vpop.xlane.xlu0 %1058 }
 0x255   :  { %v1062_v50 = vpop.xlane.xlu1 %1061  ;;  %v1087_v53 = vsel %vm867_vm9, %v1047_v47, %v1059_v49 }
 0x256   :  { %v1088_v54 = vsel %vm867_vm9, %v1050_v48, %v1062_v50 }
 0x258   :  { %v1071_v51 = vpop.xlane.xlu0 %1070 }
 0x259   :  { %v1074_v52 = vpop.xlane.xlu1 %1073  ;;  %v1089_v55 = vsel %vm870_vm10, %v1087_v53, %v1071_v51 }
 0x25a   :  { %v1090_v57 = vsel %vm870_vm10, %v1088_v54, %v1074_v52 }
 0x25c   :  { %v1083_v56 = vpop.xlane.xlu0 %1082 }
 0x25d   :  { %v1086_v58 = vpop.xlane.xlu1 %1085  ;;  %v1091_v59 = vsel %vm873_vm11, %v1089_v55, %v1083_v56 }
 0x25e   :  { %v1092_v61 = vsel %vm873_vm11, %v1090_v57, %v1086_v58  ;;  %v1093_v62 = vsel %vm876_vm12, %v1091_v59, -inf }
 0x25f   :  { %v1096_v63 = vsel %vm876_vm12, %v1092_v61, -inf  ;;  %1094 = vmax.xlane.f32.xlu0 %v1093_v62 }
 0x260   :  { %1097 = vmax.xlane.f32.xlu1 %v1096_v63 }
 0x263   :  { %248 = vmax.xlane.f32.xlu0 %v247_v0 }
 0x2dc   :  { %v879_v2 = vpop.xlane.xlu0 %878 }
 0x2dd   :  { %v882_v3 = vpop.xlane.xlu1 %881  ;;  %v883_v4 = vsub.f32 %v874_v39, %v879_v2  ;;  %v1695_v39 = vmov 3  }
 0x2de   :  { %v884_v5 = vsub.f32 %v875_v42, %v882_v3  ;;  %v1696_v42 = vmov 1  }
 0x2df   :  { %v885_v6 = vmul.f32 1.442695, %v883_v4 }
 0x2e0   :  { %v887_v7 = vmul.f32 1.442695, %v884_v5 }
 0x2e1   :  { %1451 = vpow2.f32 %v885_v6 }
 0x2e2   :  { %1453 = vpow2.f32 %v887_v7 }
 0x2eb   :  { %v1452_v44 = vpop.eup %1451 }
 0x2ec   :  { %v1454_v8 = vpop.eup %1453  ;;  %v1095_v9 = vpop.xlane.xlu0 %1094  ;;  %v889_v10 = vsel %vm876_vm12, %v1452_v44, 0.0 }
 0x2ed   :  { %v1098_v11 = vpop.xlane.xlu1 %1097  ;;  %v1099_v12 = vsub.f32 %v1091_v59, %v1095_v9  ;;  %v892_v13 = vsel %vm876_vm12, %v1454_v8, 0.0  ;;  %890 = vadd.xlane.f32.xlu1 %v889_v10 }
 0x2ee   :  { %v1100_v14 = vsub.f32 %v1092_v61, %v1098_v11  ;;  %893 = vadd.xlane.f32.xlu0 %v892_v13 }
 0x2ef   :  { %v1101_v15 = vmul.f32 1.442695, %v1099_v12 }
 0x2f0   :  { %v1103_v16 = vmul.f32 1.442695, %v1100_v14  ;;  %v249_v17 = vpop.xlane.xlu0 %248 }
 0x2f1   :  { %1455 = vpow2.f32 %v1101_v15  ;;  %v250_v18 = vsub.f32 %v245_v60, %v249_v17 }
 0x2f2   :  { %1457 = vpow2.f32 %v1103_v16 }
 0x2f3   :  { %v251_v19 = vmul.f32 1.442695, %v250_v18 }
 0x2f5   :  { %1459 = vpow2.f32 %v251_v19 }
 0x2fb   :  { %v1456_v20 = vpop.eup %1455 }
 0x2fc   :  { %v1458_v21 = vpop.eup %1457  ;;  %v1105_v22 = vsel %vm876_vm12, %v1456_v20, 0.0 }
 0x2fd   :  { %v1108_v23 = vsel %vm876_vm12, %v1458_v21, 0.0  ;;  %1106 = vadd.xlane.f32.xlu1 %v1105_v22 }
 0x2fe   :  { %1109 = vadd.xlane.f32.xlu0 %v1108_v23 }
 0x2ff   :  { %v1460_v25 = vpop.eup %1459 }
 0x300   :  { %v253_v26 = vsel %vm246_vm8, %v1460_v25, 0.0 }
 0x301   :  { %254 = vadd.xlane.f32.xlu1 %v253_v26 }
 0x37a   :  { %v891_v27 = vpop.xlane.xlu1 %890 }
 0x37b   :  { %1461 = vrcp.f32 %v891_v27  ;;  %v894_v28 = vpop.xlane.xlu0 %893 }
 0x37c   :  { %1463 = vrcp.f32 %v894_v28 }
 0x385   :  { %v1462_v29 = vpop.eup %1461 }
 0x386   :  { %v1464_v30 = vpop.eup %1463  ;;  %v896_v1 = vmul.f32 %v1462_v29, %v1452_v44 }
 0x387   :  { %v898_v32 = vmul.f32 %v1464_v30, %v1454_v8 }
 0x388   :  { %901 = vperm.xlu0 %1407, %v896_v1  }
 0x389   :  { %906 = vperm.xlu1 %1403, %v898_v32  }
 0x38a   :  { %v1107_v33 = vpop.xlane.xlu1 %1106 }
 0x38b   :  { %v1110_v36 = vpop.xlane.xlu0 %1109 }
 0x38c   :  { %1465 = vrcp.f32 %v1110_v36  ;;  %1410 = vset.pattern.permute.xlu0 %v1695_v39 }
 0x38d   :  { %1404 = vset.pattern.permute.xlu1 %v1696_v42  ;;  %938 = vperm.xlu0 %1410, %v896_v1  }
 0x38e   :  { %918 = vperm.xlu1 %1404, %v898_v32   ;;  %v255_v45 = vpop.xlane.xlu1 %254 }
 0x38f   :  { %1467 = vrcp.f32 %v255_v45 }
 0x390   :  { %1469 = vrcp.f32 %v1107_v33 }
 0x391   :  { %1412 = vset.pattern.permute.xlu0 %v1696_v42 }
 0x392   :  { %1405 = vset.pattern.permute.xlu1 %v1697_v46 }
 0x393   :  { %930 = vperm.xlu1 %1405, %v898_v32  }
 0x396   :  { %v1466_v47 = vpop.eup %1465 }
 0x397   :  { %1406 = vset.pattern.permute.xlu1 %v1695_v39  ;;  %v1114_v48 = vmul.f32 %v1466_v47, %v1458_v21 }
 0x398   :  { %942 = vperm.xlu1 %1406, %v898_v32  }
 0x399   :  { %v1468_v49 = vpop.eup %1467  ;;  %1134 = vperm.xlu0 %1412, %v1114_v48  }
 0x39a   :  { %v257_v50 = vmul.f32 %v1468_v49, %v1460_v25  ;;  %v1470_v51 = vpop.eup %1469 }
 0x39b   :  { %v1112_v52 = vmul.f32 %v1470_v51, %v1456_v20 }
 0x39c   :  { %1199 = vst.msk [vmem:[%s2183_s13 + $0x8] sm:$0xff] %vm246_vm8, %v257_v50  ;;  %1408 = vset.pattern.permute.xlu1 %v1696_v42 }
 0x39d   :  { %914 = vperm.xlu1 %1408, %v896_v1   ;;  %1418 = vset.pattern.permute.xlu0 %v1695_v39 }
 0x39e   :  { %1158 = vperm.xlu0 %1418, %v1114_v48  }
 0x3a1   :  { %1409 = vset.pattern.permute.xlu1 %v1697_v46 }
 0x3a2   :  { %926 = vperm.xlu1 %1409, %v896_v1  }
 0x3a6   :  { %1411 = vset.pattern.permute.xlu1 %v1694_v24 }
 0x3a7   :  { %1122 = vperm.xlu1 %1411, %v1114_v48  }
 0x3ab   :  { %1413 = vset.pattern.permute.xlu1 %v1697_v46 }
 0x3ac   :  { %1146 = vperm.xlu1 %1413, %v1114_v48  }
 0x3b0   :  { %1414 = vset.pattern.permute.xlu1 %v1694_v24 }
 0x3b1   :  { %1117 = vperm.xlu1 %1414, %v1112_v52  }
 0x3b5   :  { %1415 = vset.pattern.permute.xlu1 %v1696_v42 }
 0x3b6   :  { %1130 = vperm.xlu1 %1415, %v1112_v52  }
 0x3ba   :  { %1416 = vset.pattern.permute.xlu1 %v1697_v46 }
 0x3bb   :  { %1142 = vperm.xlu1 %1416, %v1112_v52  }
 0x3bf   :  { %1417 = vset.pattern.permute.xlu1 %v1695_v39 }
 0x3c0   :  { %1154 = vperm.xlu1 %1417, %v1112_v52  }
 0x407   :  { %v902_v0 = vpop.permute.xlu0 %901 }
 0x408   :  { %v907_v53 = vpop.permute.xlu1 %906  ;;  %v909_v4 = vmul.f32 %v902_v0, %v1996_v31 }
 0x409   :  { %v910_v57 = vmul.f32 %v907_v53, %v2007_v34 }
 0x40c   :  { %v939_v5 = vpop.permute.xlu0 %938 }
 0x40d   :  { %v919_v54 = vpop.permute.xlu1 %918  ;;  %v945_v8 = vmul.f32 %v939_v5, %v2041_v41 }
 0x40e   :  { %v922_v55 = vmul.f32 %v919_v54, %v2021_v37 }
 0x410   :  { %v924_v59 = vadd.f32 %v922_v55, %v910_v57 }
 0x412   :  { %v931_v56 = vpop.permute.xlu1 %930 }
 0x413   :  { %v934_v58 = vmul.f32 %v931_v56, %v2036_v40 }
 0x415   :  { %v936_v61 = vadd.f32 %v934_v58, %v924_v59 }
 0x417   :  { %v943_v60 = vpop.permute.xlu1 %942 }
 0x418   :  { %v946_v62 = vmul.f32 %v943_v60, %v2051_v43  ;;  %v1135_v10 = vpop.permute.xlu0 %1134 }
 0x419   :  { %v1138_v14 = vmul.f32 %v1135_v10, %v2021_v37 }
 0x41a   :  { %v948_v63 = vadd.f32 %v946_v62, %v936_v61 }
 0x41c   :  { %950 = vst.msk [vmem:[%s2184_s14 + $0x8] sm:$0xff] %vm423_vm5, %v948_v63  ;;  %v915_v2 = vpop.permute.xlu1 %914 }
 0x41d   :  { %v921_v3 = vmul.f32 %v915_v2, %v2012_v35  ;;  %v1159_v15 = vpop.permute.xlu0 %1158 }
 0x41e   :  { %v1162_v19 = vmul.f32 %v1159_v15, %v2051_v43 }
 0x41f   :  { %v923_v7 = vadd.f32 %v921_v3, %v909_v4 }
 0x421   :  { %v927_v6 = vpop.permute.xlu1 %926 }
 0x422   :  { %v933_v44 = vmul.f32 %v927_v6, %v2026_v38 }
 0x424   :  { %v935_v9 = vadd.f32 %v933_v44, %v923_v7 }
 0x426   :  { %v947_v11 = vadd.f32 %v945_v8, %v935_v9  ;;  %v1123_v12 = vpop.permute.xlu1 %1122 }
 0x427   :  { %v1126_v13 = vmul.f32 %v1123_v12, %v2007_v34 }
 0x428   :  { %949 = vst.msk [vmem:[%s2184_s14] sm:$0xff] %vm423_vm5, %v947_v11 }
 0x429   :  { %v1140_v17 = vadd.f32 %v1138_v14, %v1126_v13 }
 0x42b   :  { %v1147_v16 = vpop.permute.xlu1 %1146 }
 0x42c   :  { %v1150_v18 = vmul.f32 %v1147_v16, %v2036_v40 }
 0x42e   :  { %v1152_v20 = vadd.f32 %v1150_v18, %v1140_v17 }
 0x430   :  { %v1164_v21 = vadd.f32 %v1162_v19, %v1152_v20  ;;  %v1118_v22 = vpop.permute.xlu1 %1117 }
 0x431   :  { %v1125_v37 = vmul.f32 %v1118_v22, %v1996_v31 }
 0x432   :  { %1223 = vst.msk [vmem:[%s2184_s14 + $0x18] sm:$0xff] %vm423_vm5, %v1164_v21 }
 0x435   :  { %v1131_v23 = vpop.permute.xlu1 %1130 }
 0x436   :  { %v1137_v34 = vmul.f32 %v1131_v23, %v2012_v35 }
 0x438   :  { %v1139_v26 = vadd.f32 %v1137_v34, %v1125_v37 }
 0x43a   :  { %v1143_v24 = vpop.permute.xlu1 %1142 }
 0x43b   :  { %v1149_v25 = vmul.f32 %v1143_v24, %v2026_v38 }
 0x43d   :  { %v1151_v27 = vadd.f32 %v1149_v25, %v1139_v26 }
 0x43f   :  { %v1155_v40 = vpop.permute.xlu1 %1154 }
 0x440   :  { %v1161_v43 = vmul.f32 %v1155_v40, %v2041_v41 }
 0x442   :  { %v1163_v28 = vadd.f32 %v1161_v43, %v1151_v27 }
 0x444   :  { %1222 = vst.msk [vmem:[%s2184_s14 + $0x10] sm:$0xff] %vm423_vm5, %v1163_v28 }
 0x445   :  { %1192 = vsyncpa [#allocation3], 1 }
 0x446   :  { %1193 = vsyncpa [#allocation5], 1 }
 0x447   :  { %1194 = vsyncpa [#allocation8], 1 }
 0x448   :  { %1195 = vsyncpa [#allocation11], 1 }
 0x449   :  { %1196 = vsyncpa [#allocation14], 1 }

// kernel: atgru_decoder_forward.3
= control target key start
LH: loop header
LB: loop body
LE: loop exit
PB: predicated region body
PF: predicated region fallthrough
CT: control target
= control target key end

     0   :  { %s3885_s29 = smov 0   ;;  %s5468_s0 = inlined_call_operand.vmem [shape: f32[16,4], index: 0, kind: input, shape index: {}]   ;;  %s5469_s1 = inlined_call_operand.vmem [shape: f32[2,16,3], index: 1, kind: input, shape index: {}]   ;;  %s5470_s2 = inlined_call_operand.vmem [shape: f32[16,8], index: 2, kind: input, shape index: {}]   ;;  %s5471_s3 = inlined_call_operand.vmem [shape: f32[16,10], index: 3, kind: input, shape index: {}]   ;;  %s5472_s4 = inlined_call_operand.vmem [shape: f32[16,32], index: 4, kind: input, shape index: {}]   ;;  %s5473_s5 = inlined_call_operand.vmem [shape: f32[16,32], index: 5, kind: input, shape index: {}]   ;;  %s5474_s6 = inlined_call_operand.vmem [shape: f32[136,640], index: 6, kind: input, shape index: {}]   ;;  %s5475_s7 = inlined_call_operand.vmem [shape: f32[16,64], index: 7, kind: input, shape index: {}]   ;;  %s5476_s8 = inlined_call_operand.vmem [shape: f32[136,320], index: 8, kind: input, shape index: {}]   ;;  %s5477_s9 = inlined_call_operand.vmem [shape: f32[16,32], index: 9, kind: input, shape index: {}]   ;;  %s5478_s10 = inlined_call_operand.vmem [shape: f32[16,32], index: 10, kind: input, shape index: {}]   ;;  %s5479_s11 = inlined_call_operand.vmem [shape: f32[16,32], index: 11, kind: input, shape index: {}]   ;;  %s5480_s12 = inlined_call_operand.vmem [shape: f32[192,640], index: 12, kind: input, shape index: {}]   ;;  %s5481_s13 = inlined_call_operand.vmem [shape: f32[16,64], index: 13, kind: input, shape index: {}]   ;;  %s5482_s14 = inlined_call_operand.vmem [shape: f32[192,320], index: 14, kind: input, shape index: {}]   ;;  %s5483_s15 = inlined_call_operand.vmem [shape: f32[16,32], index: 15, kind: input, shape index: {}]   ;;  %s5484_s16 = inlined_call_operand.vmem [shape: f32[96,1], index: 16, kind: input, shape index: {}]   ;;  %s5485_s17 = inlined_call_operand.<no memory space> [shape: f32[1,1], index: 17, kind: input, shape index: {}]   ;;  %s5486_s18 = inlined_call_operand.vmem [shape: f32[2,16,1], index: 18, kind: output, shape index: {}]  }
   0x1   :  { %5499 = sst [smem:[#allocation4_spill]] %s5468_s0  ;;  %v23_v0 = vstv %s5485_s17 }
   0x2   :  { %5500 = sst [smem:[#allocation5_spill]] %s5469_s1  ;;  %24 = vst [vmem:[#allocation3] sm:$0x1] %v23_v0 }
   0x3   :  { %5501 = sst [smem:[#allocation6_spill]] %s5470_s2 }
   0x4   :  { %5502 = sst [smem:[#allocation7_spill]] %s5471_s3 }
   0x5   :  { %5503 = sst [smem:[#allocation8_spill]] %s5472_s4 }
   0x6 LB: > { %s3136_s30 = sadd.s32 4294967295, %s3766_s29   ;;  %p3140_p0 = scmp.ge.s32.totalorder %s3766_s29, 1  ;;  %s3766_s29 = sphi %s3885_s29, %s30_s29  }
   0x7   : > { %p514_p1 = scmp.lt.s32.totalorder %s3766_s29, 3 }
   0x9   : > { %p515_p2 = pnand %p3140_p0, %p514_p1 }
   0xa   : > { %p568_p3 = scmp.lt.s32.totalorder (!%p515_p2), %s3136_s30, 1  ;;  %s5504_s20 = sld [smem:[#allocation5_spill]] (!%p515_p2) }
   0xb   : > { %518 = sbr.rel (%p515_p2) target bundleno = 3925 (0xf55), region = 92  ;;  %p3145_p4 = scmp.ne.s32.totalorder (!%p515_p2), %s3136_s30, 0 }
  0x12   : > { %s569_s0 = scalar_select %p568_p3, %s3136_s30, 1 }
  0x13   : > { %581 = sbr.rel (%p3145_p4) target bundleno = 27 (0x1b), region = 96  ;;  %s5505_s26 = sld [smem:[#allocation4_spill]] (!%p3145_p4)  ;;  %vm584_vm0 = vcmask (!%p3145_p4), 31744  }
  0x14   : > { %s3191_s19 = sshll.u32 %s569_s0, 4 }
  0x15   : > { %s3896_s21 = scalar_lea.vmem %s5504_s20, %s3191_s19  ;;  %s3901_s23 = scalar_lea.vmem %s5486_s18, %s3191_s19 }
  0x19   : > { %v582_v1 = vld [vmem:[%s5505_s26] sm:$0xff] (!%p3145_p4)  ;;  %v583_v2 = vld [vmem:[%s5505_s26 + $0x8] sm:$0xff] (!%p3145_p4) }
  0x1a   : > { %585 = vst.msk [vmem:[#allocation2] sm:$0xff] %vm584_vm0, %v582_v1  ;;  %586 = vst.msk [vmem:[#allocation2 + $0x8] sm:$0xff] %vm584_vm0, %v583_v2 }
  0x1b PF: > { %s5506_s4 = sld [smem:[#allocation8_spill]]  ;;  %s3768_s30 = smov 4   ;;  %vm619_vm1 = vcmask 64512   ;;  %v3918_v5 = vld [vmem:[%s5473_s5] sm:$0xff]  ;;  %v3923_v6 = vld [vmem:[%s5473_s5 + $0x8] sm:$0xff]  ;;  %vm605_vm2 = vcmask 31744  }
  0x1c   : > { %s5507_s28 = sld [smem:[#allocation6_spill]]  ;;  %s5489_s0 = smov 36   ;;  %vm616_vm3 = vcmask 293888   ;;  %v788_v19 = vld [vmem:[%s5474_s6 + $0x8] sm:$0xff]  ;;  %v793_v20 = vld [vmem:[%s5474_s6 + $0x30] sm:$0xff]  ;;  %v787_v21 = vld [vmem:[%s5474_s6] sm:$0xff] }
  0x1d   : > { %v3298_v22 = vpack.c.bf16 %v793_v20, %v788_v19  ;;  %v792_v23 = vld [vmem:[%s5474_s6 + $0x28] sm:$0xff]  ;;  %v790_v24 = vld [vmem:[%s5474_s6 + $0x18] sm:$0xff]  ;;  %v795_v25 = vld [vmem:[%s5474_s6 + $0x40] sm:$0xff]  ;;  %s5493_s2 = smov 68   ;;  %s5508_s3 = sld [smem:[#allocation7_spill]]  ;;  %vm705_vm4 = vcmask 556032  }
  0x1e   : > { %v3300_v26 = vpack.c.bf16 %v792_v23, %v787_v21  ;;  %v3330_v27 = vpack.c.bf16 %v795_v25, %v790_v24  ;;  %v789_v28 = vld [vmem:[%s5474_s6 + $0x10] sm:$0xff]  ;;  %v794_v29 = vld [vmem:[%s5474_s6 + $0x38] sm:$0xff]  ;;  %v803_v32 = vld [vmem:[%s5474_s6 + $0x80] sm:$0xff]  ;;  %s5491_s20 = smov 64   ;;  %s5509_s17 = smov 36   ;;  %vm1802_vm5 = vcmask 261120  }
  0x1f   : > { %v798_v30 = vld [vmem:[%s5474_s6 + $0x58] sm:$0xff]  ;;  %v3332_v31 = vpack.c.bf16 %v794_v29, %v789_v28  ;;  %v797_v33 = vld [vmem:[%s5474_s6 + $0x50] sm:$0xff]  ;;  %v800_v37 = vld [vmem:[%s5474_s6 + $0x68] sm:$0xff]  ;;  %s5511_s25 = smov 64   ;;  %s5495_s27 = smov 32   ;;  %vm1813_vm6 = vcmask 523264  }
  0x20   : > { %v802_v34 = vld [vmem:[%s5474_s6 + $0x78] sm:$0xff]  ;;  %3331 = vmatprep.subr.bf16.mxu1 %v3330_v27  ;;  %v3302_v35 = vpack.c.bf16 %v803_v32, %v798_v30  ;;  %v805_v38 = vld [vmem:[%s5474_s6 + $0x90] sm:$0xff]  ;;  %v799_v39 = vld [vmem:[%s5474_s6 + $0x60] sm:$0xff]  ;;  %s5512_s24 = smov 96   ;;  %vm1895_vm7 = vcmask 785408   ;;  %vm3064_vm8 = vcmask 7168  }
  0x21   : > { %v595_v3 = vld [vmem:[%s5506_s4] sm:$0xff]  ;;  %v596_v4 = vld [vmem:[%s5506_s4 + $0x8] sm:$0xff]  ;;  %v3304_v36 = vpack.c.bf16 %v802_v34, %v797_v33  ;;  %3333 = vmatpush1.bf16.msra.mxu1 %v3332_v31  ;;  %v3334_v40 = vpack.c.bf16 %v805_v38, %v800_v37  ;;  %v813_v43 = vld [vmem:[%s5474_s6 + $0xd0] sm:$0xff] }
  0x22   : > { %599 = vrot.lane.b32.xlu0 %v595_v3, %s3768_s30  ;;  %601 = vrot.lane.b32.xlu1 %v596_v4, %s3768_s30  ;;  %v3928_v7 = vld [vmem:[%s5507_s28] sm:$0xff]  ;;  %v592_v8 = vld [vmem:[#allocation2 + $0x8] sm:$0xff]  ;;  %v810_v48 = vld [vmem:[%s5474_s6 + $0xb8] sm:$0xff]  ;;  %s5510_s30 = smov 68  }
  0x23   : > { %3233 = vmatprep.mubr.msk.f32.mxu0 %vm619_vm1, %v3928_v7  ;;  %v591_v11 = vld [vmem:[#allocation2] sm:$0xff]  ;;  %v3947_v17 = vld [vmem:[%s5507_s28 + $0x8] sm:$0xff]  ;;  %3335 = vmatprep.subr.bf16.mxu1 %v3334_v40  ;;  %v809_v50 = vld [vmem:[%s5474_s6 + $0xb0] sm:$0xff] }
  0x24   : > { %v804_v41 = vld [vmem:[%s5474_s6 + $0x88] sm:$0xff]  ;;  %v807_v46 = vld [vmem:[%s5474_s6 + $0xa0] sm:$0xff]  ;;  %v814_v51 = vld [vmem:[%s5474_s6 + $0xd8] sm:$0xff] }
  0x25   : > { %v808_v42 = vld [vmem:[%s5474_s6 + $0xa8] sm:$0xff]  ;;  %v3336_v44 = vpack.c.bf16 %v804_v41, %v799_v39  ;;  %v815_v49 = vld [vmem:[%s5474_s6 + $0xe0] sm:$0xff]  ;;  %v818_v54 = vld [vmem:[%s5474_s6 + $0xf8] sm:$0xff]  ;;  %v3340_v57 = vpack.c.bf16 %v814_v51, %v809_v50 }
  0x26   : > { %610 = vrot.lane.b32.xlu0 %v3918_v5, %s5489_s0  ;;  %612 = vrot.lane.b32.xlu1 %v3923_v6, %s5489_s0  ;;  %v3306_v45 = vpack.c.bf16 %v813_v43, %v808_v42  ;;  %v812_v47 = vld [vmem:[%s5474_s6 + $0xc8] sm:$0xff]  ;;  %v3338_v53 = vpack.c.bf16 %v815_v49, %v810_v48  ;;  %v823_v55 = vld [vmem:[%s5474_s6 + $0x120] sm:$0xff] }
  0x27   : > { %v3308_v52 = vpack.c.bf16 %v812_v47, %v807_v46  ;;  %v817_v56 = vld [vmem:[%s5474_s6 + $0xf0] sm:$0xff]  ;;  %3337 = vmatpush1.bf16.msra.mxu1 %v3336_v44  ;;  %v3310_v58 = vpack.c.bf16 %v823_v55, %v818_v54  ;;  %v822_v59 = vld [vmem:[%s5474_s6 + $0x118] sm:$0xff]  ;;  %v820_v60 = vld [vmem:[%s5474_s6 + $0x108] sm:$0xff] }
  0x28   : > { %v825_v61 = vld [vmem:[%s5474_s6 + $0x130] sm:$0xff]  ;;  %3339 = vmatprep.subr.bf16.mxu1 %v3338_v53  ;;  %v819_v63 = vld [vmem:[%s5474_s6 + $0x100] sm:$0xff]  ;;  %v824_v0 = vld [vmem:[%s5474_s6 + $0x128] sm:$0xff]  ;;  %v3312_v3 = vpack.c.bf16 %v822_v59, %v817_v56 }
  0x29   : > { %v3342_v62 = vpack.c.bf16 %v825_v61, %v820_v60  ;;  %v828_v1 = vld [vmem:[%s5474_s6 + $0x148] sm:$0xff]  ;;  %v833_v2 = vld [vmem:[%s5474_s6 + $0x170] sm:$0xff]  ;;  %v830_v4 = vld [vmem:[%s5474_s6 + $0x158] sm:$0xff]  ;;  %v3770_v61 = vmov 0.0|0.0  }
  0x2a   : > { %v838_v19 = vld [vmem:[%s5474_s6 + $0x198] sm:$0xff]  ;;  %v843_v20 = vld [vmem:[%s5474_s6 + $0x1c0] sm:$0xff]  ;;  %v840_v21 = vld [vmem:[%s5474_s6 + $0x1a8] sm:$0xff] }
  0x2b   : > { %3341 = vmatpush1.bf16.msra.mxu1 %v3340_v57  ;;  %v3318_v25 = vpack.c.bf16 %v843_v20, %v838_v19  ;;  %v842_v27 = vld [vmem:[%s5474_s6 + $0x1b8] sm:$0xff]  ;;  %v839_v28 = vld [vmem:[%s5474_s6 + $0x1a0] sm:$0xff]  ;;  %v844_v30 = vld [vmem:[%s5474_s6 + $0x1c8] sm:$0xff] }
  0x2c   : > { %3343 = vmatprep.subr.bf16.mxu1 %v3342_v62  ;;  %v848_v31 = vld [vmem:[%s5474_s6 + $0x1e8] sm:$0xff]  ;;  %v853_v32 = vld [vmem:[%s5474_s6 + $0x210] sm:$0xff]  ;;  %v850_v33 = vld [vmem:[%s5474_s6 + $0x1f8] sm:$0xff] }
  0x2d   : > { %v855_v34 = vld [vmem:[%s5474_s6 + $0x220] sm:$0xff]  ;;  %v3322_v37 = vpack.c.bf16 %v853_v32, %v848_v31  ;;  %v852_v39 = vld [vmem:[%s5474_s6 + $0x208] sm:$0xff]  ;;  %v849_v40 = vld [vmem:[%s5474_s6 + $0x1f0] sm:$0xff] }
  0x2e   : > { %v847_v38 = vld [vmem:[%s5474_s6 + $0x1e0] sm:$0xff]  ;;  %v3354_v41 = vpack.c.bf16 %v855_v34, %v850_v33  ;;  %v854_v42 = vld [vmem:[%s5474_s6 + $0x218] sm:$0xff]  ;;  %v865_v46 = vld [vmem:[%s5474_s6 + $0x270] sm:$0xff] }
  0x2f   : > { %v858_v43 = vld [vmem:[%s5474_s6 + $0x238] sm:$0xff]  ;;  %v863_v44 = vld [vmem:[%s5474_s6 + $0x260] sm:$0xff]  ;;  %v3324_v47 = vpack.c.bf16 %v852_v39, %v847_v38  ;;  %v3356_v48 = vpack.c.bf16 %v854_v42, %v849_v40  ;;  %v857_v50 = vld [vmem:[%s5474_s6 + $0x230] sm:$0xff] }
  0x30   : > { %v3326_v49 = vpack.c.bf16 %v863_v44, %v858_v43  ;;  %v862_v51 = vld [vmem:[%s5474_s6 + $0x258] sm:$0xff]  ;;  %v859_v53 = vld [vmem:[%s5474_s6 + $0x240] sm:$0xff]  ;;  %v864_v54 = vld [vmem:[%s5474_s6 + $0x268] sm:$0xff] }
  0x31   : > { %v3328_v55 = vpack.c.bf16 %v862_v51, %v857_v50  ;;  %v3360_v56 = vpack.c.bf16 %v864_v54, %v859_v53  ;;  %v868_v57 = vld [vmem:[%s5474_s6 + $0x288] sm:$0xff]  ;;  %v867_v59 = vld [vmem:[%s5474_s6 + $0x280] sm:$0xff]  ;;  %v869_v60 = vld [vmem:[%s5474_s6 + $0x290] sm:$0xff] }
  0x32   : > { %v796_v19 = vld [vmem:[%s5474_s6 + $0x48] sm:$0xff]  ;;  %v821_v31 = vld [vmem:[%s5474_s6 + $0x110] sm:$0xff]  ;;  %v826_v32 = vld [vmem:[%s5474_s6 + $0x138] sm:$0xff] }
  0x33   : > { %v3372_v33 = vpack.c.bf16 %v826_v32, %v821_v31  ;;  %v831_v34 = vld [vmem:[%s5474_s6 + $0x160] sm:$0xff]  ;;  %v846_v38 = vld [vmem:[%s5474_s6 + $0x1d8] sm:$0xff]  ;;  %v861_v43 = vld [vmem:[%s5474_s6 + $0x250] sm:$0xff] }
  0x34   : > { %v851_v40 = vld [vmem:[%s5474_s6 + $0x200] sm:$0xff]  ;;  %v866_v44 = vld [vmem:[%s5474_s6 + $0x278] sm:$0xff] }
  0x94   : > { %v600_v9 = vpop.permute.xlu0 %599  ;;  %v602_v10 = vpop.permute.xlu1 %601 }
  0x95   : > { %v3937_v12 = vsel %vm605_vm2, %v592_v8, %v602_v10  ;;  %v3940_v13 = vsel %vm605_vm2, %v591_v11, %v600_v9  ;;  %v835_v8 = vld [vmem:[%s5474_s6 + $0x180] sm:$0xff]  ;;  %v3344_v9 = vpack.c.bf16 %v824_v0, %v819_v63  ;;  %v3314_v10 = vpack.c.bf16 %v833_v2, %v828_v1 }
  0x96   : > { %v827_v11 = vld [vmem:[%s5474_s6 + $0x140] sm:$0xff] }
  0x97   : > { %3345 = vmatpush1.bf16.msra.mxu1 %v3344_v9  ;;  %v4167_v2 = vld [vmem:[%s5508_s3] sm:$0xff]  ;;  %v3775_v9 = vmov 7  }
  0x98   : > { %v611_v14 = vpop.permute.xlu0 %610  ;;  %v613_v15 = vpop.permute.xlu1 %612 }
  0x99   : > { %v617_v16 = vsel %vm616_vm3, %v3940_v13, %v611_v14  ;;  %v618_v18 = vsel %vm616_vm3, %v3937_v12, %v613_v15  ;;  %v832_v14 = vld [vmem:[%s5474_s6 + $0x168] sm:$0xff]  ;;  %v829_v15 = vld [vmem:[%s5474_s6 + $0x150] sm:$0xff] }
  0x9a   : > { %3231 = vmatprep.subr.mxu0 %v617_v16  ;;  %v3316_v23 = vpack.c.bf16 %v832_v14, %v827_v11  ;;  %v4177_v11 = vld [vmem:[%s5508_s3 + $0x8] sm:$0xff]  ;;  %v3777_v14 = vmov 4   ;;  %s5513_s3 = smov 32  }
  0x9b   : > { %3232 = vmatpush3.msra.mxu0 %v617_v16  ;;  %v3346_v16 = vpack.c.bf16 %v835_v8, %v830_v4  ;;  %v3773_v4 = vmov 1   ;;  %v3774_v8 = vmov 5  }
  0x9c   : > { %3234 = vmatmul.mubr.msk.f32.vlgmr.msra.gmra.mrb[0].mxu0 %vm619_vm1, %v3947_v17  ;;  %3236 = vmatprep.subr.mxu0 %v618_v18 }
  0x9d   : > { %3237 = vmatpush3.msra.mxu0 %v618_v18  ;;  %3238 = vmatprep.mubr.msk.f32.mxu0 %vm619_vm1, %v3928_v7  ;;  %v834_v18 = vld [vmem:[%s5474_s6 + $0x178] sm:$0xff] }
  0x9e   : > { %3299 = vmatprep.subr.bf16.mxu0 %v3298_v22  ;;  %v845_v22 = vld [vmem:[%s5474_s6 + $0x1d0] sm:$0xff]  ;;  %v3348_v24 = vpack.c.bf16 %v834_v18, %v829_v15  ;;  %3347 = vmatprep.subr.bf16.mxu1 %v3346_v16  ;;  %v3778_v15 = vmov 2   ;;  %v3779_v16 = vmov 0   ;;  %v791_v18 = vld [vmem:[%s5474_s6 + $0x20] sm:$0xff] }
  0x9f   : > { %v3350_v29 = vpack.c.bf16 %v845_v22, %v840_v21  ;;  %3709 = vset.pattern.permute.xlu0 %v3773_v4  ;;  %v3363_v20 = vpack.c.bf16 %v796_v19, %v791_v18  ;;  %v801_v22 = vld [vmem:[%s5474_s6 + $0x70] sm:$0xff] }
  0xa0   : > { %3239 = vmatmul.mubr.msk.f32.vlgmr.msra.gmra.mrb[2].mxu0 %vm619_vm1, %v3947_v17  ;;  %3349 = vmatpush1.bf16.msra.mxu1 %v3348_v24 }
  0xa1   : > { %3301 = vmatpush1.bf16.msra.mxu0 %v3300_v26  ;;  %v837_v26 = vld [vmem:[%s5474_s6 + $0x190] sm:$0xff]  ;;  %3351 = vmatprep.subr.bf16.mxu1 %v3350_v29 }
  0xa2   : > { %3303 = vmatprep.subr.bf16.mxu0 %v3302_v35  ;;  %v3320_v35 = vpack.c.bf16 %v842_v27, %v837_v26  ;;  %v811_v27 = vld [vmem:[%s5474_s6 + $0xc0] sm:$0xff] }
  0xa5   : > { %3305 = vmatpush1.bf16.msra.mxu0 %v3304_v36  ;;  %v3352_v36 = vpack.c.bf16 %v844_v30, %v839_v28  ;;  %v816_v28 = vld [vmem:[%s5474_s6 + $0xe8] sm:$0xff] }
  0xa6   : > { %3307 = vmatprep.subr.bf16.mxu0 %v3306_v45  ;;  %v860_v45 = vld [vmem:[%s5474_s6 + $0x248] sm:$0xff]  ;;  %v3369_v30 = vpack.c.bf16 %v816_v28, %v811_v27 }
  0xa7   : > { %3353 = vmatpush1.bf16.msra.mxu1 %v3352_v36 }
  0xa8   : > { %3355 = vmatprep.subr.bf16.mxu1 %v3354_v41  ;;  %v856_v41 = vld [vmem:[%s5474_s6 + $0x228] sm:$0xff] }
  0xa9   : > { %3309 = vmatpush1.bf16.msra.mxu0 %v3308_v52  ;;  %v3358_v52 = vpack.c.bf16 %v865_v46, %v860_v45  ;;  %v3381_v42 = vpack.c.bf16 %v856_v41, %v851_v40  ;;  %v3384_v45 = vpack.c.bf16 %v866_v44, %v861_v43  ;;  %v3780_v46 = vmov 0.0  }
  0xaa   : > { %3311 = vmatprep.subr.bf16.mxu0 %v3310_v58  ;;  %v870_v58 = vld [vmem:[%s5474_s6 + $0x298] sm:$0xff] }
  0xab   : > { %3357 = vmatpush1.bf16.msra.mxu1 %v3356_v48  ;;  %v3781_v48 = vmov 6  }
  0xac   : > { %3359 = vmatprep.subr.bf16.mxu1 %v3358_v52 }
  0xad   : > { %3313 = vmatpush1.bf16.msra.mxu0 %v3312_v3  ;;  %v3772_v3 = vmov 3  }
  0xae   : > { %3315 = vmatprep.subr.bf16.mxu0 %v3314_v10  ;;  %3710 = vset.pattern.permute.xlu1 %v3772_v3  ;;  %v3776_v10 = vmov 9  }
  0xaf   : > { %3361 = vmatpush1.bf16.msra.mxu1 %v3360_v56 }
  0xb0   : > { %985 = vmatprep.subr.mxu1 %v870_v58 }
  0xb1   : > { %3317 = vmatpush1.bf16.msra.mxu0 %v3316_v23  ;;  %v806_v23 = vld [vmem:[%s5474_s6 + $0x98] sm:$0xff] }
  0xb2   : > { %3319 = vmatprep.subr.bf16.mxu0 %v3318_v25  ;;  %v3366_v25 = vpack.c.bf16 %v806_v23, %v801_v22 }
  0xb3   : > { %986 = vmatpush1.msra.mxu1 %v869_v60 }
  0xb5   : > { %3321 = vmatpush1.bf16.msra.mxu0 %v3320_v35  ;;  %v836_v35 = vld [vmem:[%s5474_s6 + $0x188] sm:$0xff] }
  0xb6   : > { %3323 = vmatprep.subr.bf16.mxu0 %v3322_v37  ;;  %v3375_v36 = vpack.c.bf16 %v836_v35, %v831_v34  ;;  %v841_v37 = vld [vmem:[%s5474_s6 + $0x1b0] sm:$0xff] }
  0xb7   : > { %v3378_v39 = vpack.c.bf16 %v846_v38, %v841_v37 }
  0xb9   : > { %3325 = vmatpush1.bf16.msra.mxu0 %v3324_v47  ;;  %v871_v47 = vld [vmem:[%s5474_s6 + $0x2a0] sm:$0xff] }
  0xba   : > { %3327 = vmatprep.subr.bf16.mxu0 %v3326_v49 }
  0xbd   : > { %3329 = vmatpush1.bf16.msra.mxu0 %v3328_v55 }
  0xbe   : > { %908 = vmatprep.subr.mxu0 %v868_v57 }
  0xc1   : > { %909 = vmatpush1.msra.mxu0 %v867_v59 }
  0xc2   : > { %3362 = vmatprep.subr.bf16.mxu0 %v3770_v61 }
 0x16f   : > { %v3235_v62 = vpop.f32.mrb[0].mxu0 }
 0x170   : > { %702 = vrot.lane.b32.xlu0 %v3235_v62, %s5493_s2  ;;  %v692_v63 = vpop.f32.mrb[1].mxu0 }
 0x173   : > { %v3240_v0 = vpop.f32.mrb[2].mxu0 }
 0x174   : > { %783 = vrot.lane.b32.xlu1 %v3240_v0, %s5493_s2  ;;  %v773_v1 = vpop.f32.mrb[3].mxu0  ;;  %1122 = vperm.xlu0 %3709, %v4167_v2   ;;  %v3783_v0 = vmov 8  }
 0x178   : > { %1154 = vperm.xlu1 %3710, %v4167_v2   ;;  %3712 = vset.pattern.permute.xlu0 %v3775_v9 }
 0x179   : > { %1218 = vperm.xlu0 %3712, %v4167_v2  }
 0x17c   : > { %3711 = vset.pattern.permute.xlu1 %v3774_v8 }
 0x17d   : > { %1186 = vperm.xlu1 %3711, %v4167_v2   ;;  %3715 = vset.pattern.permute.xlu0 %v3772_v3 }
 0x17e   : > { %1158 = vperm.xlu0 %3715, %v4177_v11  }
 0x181   : > { %3713 = vset.pattern.permute.xlu1 %v3776_v10 }
 0x182   : > { %1250 = vperm.xlu1 %3713, %v4167_v2   ;;  %3718 = vset.pattern.permute.xlu0 %v3776_v10 }
 0x183   : > { %1254 = vperm.xlu0 %3718, %v4177_v11  }
 0x186   : > { %3714 = vset.pattern.permute.xlu1 %v3773_v4 }
 0x187   : > { %1126 = vperm.xlu1 %3714, %v4177_v11   ;;  %3721 = vset.pattern.permute.xlu0 %v3777_v14 }
 0x188   : > { %1174 = vperm.xlu0 %3721, %v4167_v2  }
 0x18b   : > { %3716 = vset.pattern.permute.xlu1 %v3774_v8 }
 0x18c   : > { %1190 = vperm.xlu1 %3716, %v4177_v11   ;;  %3725 = vset.pattern.permute.xlu0 %v3778_v15 }
 0x190   : > { %3717 = vset.pattern.permute.xlu1 %v3775_v9 }
 0x191   : > { %1222 = vperm.xlu1 %3717, %v4177_v11  }
 0x195   : > { %3719 = vset.pattern.permute.xlu1 %v3779_v16 }
 0x196   : > { %1109 = vperm.xlu1 %3719, %v4167_v2  }
 0x19a   : > { %3720 = vset.pattern.permute.xlu1 %v3778_v15 }
 0x19b   : > { %1142 = vperm.xlu1 %3720, %v4167_v2  }
 0x19f   : > { %3722 = vset.pattern.permute.xlu1 %v3781_v48 }
 0x1e2   : > { %v703_v21 = vpop.permute.xlu0 %702 }
 0x1e3   : > { %3150 = vmatprep.mubr.msk.f32.mxu0 %vm619_vm1, %v703_v21  ;;  %3152 = vmatprep.mubr.msk.f32.mxu1 %vm619_vm1, %v703_v21  ;;  %v706_v24 = vsel %vm705_vm4, %v692_v63, %v703_v21 }
 0x1e4   : > { %941 = vmatmul.mubr.f32.vlgmr.msra.gmra.mrb[4].mxu0 %v706_v24  ;;  %1018 = vmatmul.mubr.f32.vlgmr.msra.gmra.mrb[0].mxu1 %v706_v24 }
 0x1e5   : > { %3364 = vmatpush1.bf16.msra.mxu0 %v3363_v20 }
 0x1e6   : > { %v784_v26 = vpop.permute.xlu1 %783  ;;  %3365 = vmatprep.subr.bf16.mxu0 %v3770_v61 }
 0x1e7   : > { %3151 = vmatprep.mubr.msk.f32.mxu0 %vm619_vm1, %v784_v26  ;;  %3153 = vmatprep.mubr.msk.f32.mxu1 %vm619_vm1, %v784_v26  ;;  %v786_v29 = vsel %vm705_vm4, %v773_v1, %v784_v26 }
 0x1e8   : > { %947 = vmatmul.mubr.f32.gmra.mrb[6].mxu0 %v786_v29  ;;  %1024 = vmatmul.mubr.f32.gmra.mrb[2].mxu1 %v786_v29 }
 0x1e9   : > { %3367 = vmatpush1.bf16.msra.mxu0 %v3366_v25  ;;  %3154 = vmatprep.mubr.msk.f32.mxu0 %vm619_vm1, %v703_v21 }
 0x1ea   : > { %3368 = vmatprep.subr.bf16.mxu0 %v3770_v61  ;;  %3243 = vmatprep.mubr.msk.f32.mxu1 %vm619_vm1, %v3928_v7 }
 0x1ed   : > { %3370 = vmatpush1.bf16.msra.mxu0 %v3369_v30 }
 0x1ee   : > { %3371 = vmatprep.subr.bf16.mxu0 %v3770_v61 }
 0x1f1   : > { %3373 = vmatpush1.bf16.msra.mxu0 %v3372_v33 }
 0x1f2   : > { %3374 = vmatprep.subr.bf16.mxu0 %v3770_v61 }
 0x1f3   : > { %v4263_v50 = vpop.permute.xlu0 %1122 }
 0x1f5   : > { %3376 = vmatpush1.bf16.msra.mxu0 %v3375_v36 }
 0x1f6   : > { %3377 = vmatprep.subr.bf16.mxu0 %v3770_v61 }
 0x1f7   : > { %v4261_v49 = vpop.permute.xlu1 %1154 }
 0x1f8   : > { %v4288_v1 = vpop.permute.xlu0 %1218 }
 0x1f9   : > { %3379 = vmatpush1.bf16.msra.mxu0 %v3378_v39 }
 0x1fa   : > { %3380 = vmatprep.subr.bf16.mxu0 %v3770_v61 }
 0x1fc   : > { %v4271_v57 = vpop.permute.xlu1 %1186 }
 0x1fd   : > { %3382 = vmatpush1.bf16.msra.mxu0 %v3381_v42  ;;  %v4304_v9 = vpop.permute.xlu0 %1158 }
 0x1fe   : > { %3383 = vmatprep.subr.bf16.mxu0 %v3770_v61 }
 0x201   : > { %3385 = vmatpush1.bf16.msra.mxu0 %v3384_v45  ;;  %v4294_v4 = vpop.permute.xlu1 %1250 }
 0x202   : > { %1062 = vmatprep.subr.mxu0 %v3780_v46  ;;  %v4326_v25 = vpop.permute.xlu0 %1254 }
 0x205   : > { %1063 = vmatpush1.msra.mxu0 %v871_v47 }
 0x206   : > { %1095 = vmatmul.mubr.f32.vlgmr.msra.gmra.mrb[8].mxu0 %v706_v24  ;;  %3418 = vmatprep.subr.bf16.mxu0 %v3770_v61  ;;  %v4299_v8 = vpop.permute.xlu1 %1126 }
 0x207   : > { %3155 = vmatprep.mubr.msk.f32.mxu0 %vm619_vm1, %v784_v26  ;;  %v4340_v31 = vpop.permute.xlu0 %1174 }
 0x20a   : > { %1100 = vmatmul.mubr.f32.gmra.mrb[10].mxu0 %v786_v29 }
 0x2b7   : > { %v942_v51 = vpop.f32.mrb[4].mxu0  ;;  %v4265_v52 = vpop.f32.mrb[0].mxu1 }
 0x2b8   : > { %v1129_v53 = vmul.f32 %v4263_v50, %v942_v51  ;;  %v944_v54 = vpop.f32.mrb[5].mxu0  ;;  %v4268_v55 = vpop.f32.mrb[1].mxu1  ;;  %v1193_v63 = vmul.f32 %v4271_v57, %v4265_v52  ;;  %v1181_v36 = vmul.f32 %v4340_v31, %v4265_v52 }
 0x2b9   : > { %v1161_v56 = vmul.f32 %v4261_v49, %v944_v54  ;;  %v1225_v3 = vmul.f32 %v4288_v1, %v4268_v55 }
 0x2ba   : > { %1133 = vrot.lane.b32.xlu1 %v1129_v53, %s5491_s20 }
 0x2bb   : > { %v4274_v58 = vpop.f32.mrb[2].mxu1  ;;  %1165 = vrot.lane.b32.xlu0 %v1161_v56, %s5491_s20  ;;  %v4277_v59 = vpop.f32.mrb[6].mxu0 }
 0x2bc   : > { %v4279_v60 = vpop.f32.mrb[7].mxu0  ;;  %v4281_v62 = vpop.f32.mrb[3].mxu1 }
 0x2bd   : > { %v1162_v15 = vmul.f32 %v4304_v9, %v4279_v60 }
 0x2be   : > { %1206 = vperm.xlu1 %3722, %v4167_v2  }
 0x2bf   : > { %1197 = vrot.lane.b32.xlu0 %v1193_v63, %s5491_s20 }
 0x2c2   : > { %3723 = vset.pattern.permute.xlu1 %v3783_v0 }
 0x2c3   : > { %1238 = vperm.xlu1 %3723, %v4167_v2   ;;  %v1130_v2 = vmul.f32 %v4299_v8, %v4277_v59 }
 0x2c7   : > { %1229 = vrot.lane.b32.xlu1 %v1225_v3, %s5491_s20  ;;  %v1106_v3 = vld [vmem:[%s5475_s7 + $0x8] sm:$0xff] }
 0x2c8   : > { %3724 = vset.pattern.permute.xlu1 %v3779_v16  ;;  %v4308_v16 = vpop.permute.xlu1 %1190 }
 0x2c9   : > { %v1194_v24 = vmul.f32 %v4308_v16, %v4274_v58 }
 0x2cb   : > { %1114 = vperm.xlu1 %3724, %v4177_v11  }
 0x2cc   : > { %v4314_v20 = vpop.permute.xlu1 %1222 }
 0x2cd   : > { %v1226_v22 = vmul.f32 %v4314_v20, %v4281_v62 }
 0x2cf   : > { %3726 = vset.pattern.permute.xlu1 %v3777_v14 }
 0x2d0   : > { %1178 = vperm.xlu1 %3726, %v4177_v11   ;;  %v4332_v27 = vpop.permute.xlu1 %1109 }
 0x2d1   : > { %v1117_v28 = vmul.f32 %v4332_v27, %v942_v51 }
 0x2d4   : > { %1135 = vrot.lane.b32.xlu1 %v1130_v2, %s5491_s20  ;;  %v4335_v29 = vpop.permute.xlu1 %1142 }
 0x2d5   : > { %3728 = vset.pattern.permute.xlu1 %v3783_v0 }
 0x2d8   : > { %1167 = vrot.lane.b32.xlu1 %v1162_v15, %s5491_s20 }
 0x2d9   : > { %v1096_v14 = vpop.f32.mrb[8].mxu0 }
 0x2da   : > { %v1257_v18 = vmul.f32 %v4294_v4, %v1096_v14  ;;  %v1098_v19 = vpop.f32.mrb[9].mxu0 }
 0x2dc   : > { %1261 = vrot.lane.b32.xlu0 %v1257_v18, %s5491_s20  ;;  %1242 = vperm.xlu1 %3728, %v4177_v11  }
 0x2dd   : > { %v4316_v21 = vpop.f32.mrb[10].mxu0 }
 0x2de   : > { %v1103_v23 = vpop.f32.mrb[11].mxu0  ;;  %v1258_v26 = vmul.f32 %v4326_v25, %v4316_v21 }
 0x2e0   : > { %1146 = vperm.xlu0 %3725, %v4177_v11   ;;  %1231 = vrot.lane.b32.xlu1 %v1226_v22, %s5491_s20 }
 0x2e4   : > { %3727 = vset.pattern.permute.xlu0 %v3781_v48 }
 0x2e5   : > { %1210 = vperm.xlu0 %3727, %v4177_v11   ;;  %v1105_v11 = vld [vmem:[%s5475_s7] sm:$0xff] }
 0x2e6   : > { %v1119_v30 = vadd.f32 %v1117_v28, %v1105_v11 }
 0x2e9   : > { %1199 = vrot.lane.b32.xlu0 %v1194_v24, %s5491_s20 }
 0x2ea   : > { %3729 = vset.pattern.permute.xlu0 %v3776_v10  ;;  %v1149_v10 = vmul.f32 %v4335_v29, %v944_v54 }
 0x2ed   : > { %1263 = vrot.lane.b32.xlu0 %v1258_v26, %s5491_s20  ;;  %s5497_s20 = smov 96  }
 0x32c   : > { %v1134_v32 = vpop.permute.xlu1 %1133 }
 0x32d   : > { %v1139_v33 = vadd.f32 %v1134_v32, %v1119_v30  ;;  %v1166_v35 = vpop.permute.xlu0 %1165 }
 0x32f   : > { %v1151_v34 = vadd.f32 %v1149_v10, %v1139_v33 }
 0x331   : > { %v1171_v37 = vadd.f32 %v1166_v35, %v1151_v34  ;;  %v1198_v39 = vpop.permute.xlu0 %1197 }
 0x333   : > { %v1183_v38 = vadd.f32 %v1181_v36, %v1171_v37 }
 0x335   : > { %v1203_v41 = vadd.f32 %v1198_v39, %v1183_v38 }
 0x33d   : > { %v4345_v40 = vpop.permute.xlu1 %1206 }
 0x33e   : > { %v1213_v42 = vmul.f32 %v4345_v40, %v4268_v55 }
 0x340   : > { %v1215_v43 = vadd.f32 %v1213_v42, %v1203_v41 }
 0x342   : > { %v4349_v44 = vpop.permute.xlu1 %1238 }
 0x343   : > { %v1245_v48 = vmul.f32 %v4349_v44, %v1096_v14 }
 0x346   : > { %v1230_v45 = vpop.permute.xlu1 %1229 }
 0x347   : > { %v1235_v47 = vadd.f32 %v1230_v45, %v1215_v43 }
 0x349   : > { %v1247_v51 = vadd.f32 %v1245_v48, %v1235_v47 }
 0x34a   : > { %v4352_v53 = vpop.permute.xlu1 %1114 }
 0x34b   : > { %v1118_v55 = vmul.f32 %v4352_v53, %v4277_v59 }
 0x34d   : > { %v1120_v14 = vadd.f32 %v1118_v55, %v1106_v3  ;;  %v1460_v55 = vld [vmem:[%s5476_s8 + $0x38] sm:$0xff]  ;;  %v1463_v3 = vld [vmem:[%s5476_s8 + $0x50] sm:$0xff] }
 0x34e   : > { %v1262_v52 = vpop.permute.xlu0 %1261 }
 0x34f   : > { %v1267_v54 = vadd.f32 %v1262_v52, %v1247_v51  ;;  %v4354_v63 = vpop.permute.xlu1 %1178 }
 0x350   : > { %v1182_v59 = vmul.f32 %v4354_v63, %v4274_v58 }
 0x351   : > { %v3156_v56 = vmul.f32 -1.442695, %v1267_v54  ;;  %v1458_v54 = vld [vmem:[%s5476_s8 + $0x28] sm:$0xff] }
 0x353   : > { %3730 = vpow2.f32 %v3156_v56  ;;  %v1136_v0 = vpop.permute.xlu1 %1135 }
 0x354   : > { %v1140_v19 = vadd.f32 %v1136_v0, %v1120_v14  ;;  %v1462_v14 = vld [vmem:[%s5476_s8 + $0x48] sm:$0xff] }
 0x357   : > { %v1168_v22 = vpop.permute.xlu1 %1167 }
 0x35b   : > { %v4369_v11 = vpop.permute.xlu1 %1242 }
 0x35c   : > { %v1246_v38 = vmul.f32 %v4369_v11, %v4316_v21 }
 0x35d   : > { %v3731_v2 = vpop.eup %3730 }
 0x35e   : > { %v1275_v15 = vadd.f32 1.0, %v3731_v2  ;;  %v1459_v2 = vld [vmem:[%s5476_s8 + $0x30] sm:$0xff] }
 0x35f   : > { %v4361_v18 = vpop.permute.xlu0 %1146  ;;  %v1232_v36 = vpop.permute.xlu1 %1231 }
 0x360   : > { %3732 = vrcp.f32 %v1275_v15  ;;  %v1150_v23 = vmul.f32 %v4361_v18, %v4279_v60  ;;  %v3390_v15 = vpack.c.bf16 %v1463_v3, %v1460_v55  ;;  %v1486_v55 = vld [vmem:[%s5476_s8 + $0x108] sm:$0xff]  ;;  %v1485_v3 = vld [vmem:[%s5476_s8 + $0x100] sm:$0xff] }
 0x362   : > { %v1152_v24 = vadd.f32 %v1150_v23, %v1140_v19  ;;  %v1461_v19 = vld [vmem:[%s5476_s8 + $0x40] sm:$0xff]  ;;  %v3392_v23 = vpack.c.bf16 %v1462_v14, %v1459_v2  ;;  %v1488_v2 = vld [vmem:[%s5476_s8 + $0x118] sm:$0xff] }
 0x363   : > { %v1493_v14 = vld [vmem:[%s5476_s8 + $0x140] sm:$0xff] }
 0x364   : > { %v4365_v26 = vpop.permute.xlu0 %1210  ;;  %v1172_v28 = vadd.f32 %v1168_v22, %v1152_v24  ;;  %v1464_v22 = vld [vmem:[%s5476_s8 + $0x58] sm:$0xff] }
 0x365   : > { %v1214_v10 = vmul.f32 %v4365_v26, %v4281_v62  ;;  %v3422_v24 = vpack.c.bf16 %v1464_v22, %v1461_v19  ;;  %v3434_v22 = vpack.c.bf16 %v1488_v2, %v1485_v3 }
 0x366   : > { %v1184_v30 = vadd.f32 %v1182_v59, %v1172_v28  ;;  %v1466_v28 = vld [vmem:[%s5476_s8 + $0x68] sm:$0xff]  ;;  %v1469_v59 = vld [vmem:[%s5476_s8 + $0x80] sm:$0xff] }
 0x368   : > { %v1200_v32 = vpop.permute.xlu0 %1199 }
 0x369   : > { %v1204_v33 = vadd.f32 %v1200_v32, %v1184_v30  ;;  %v1465_v30 = vld [vmem:[%s5476_s8 + $0x60] sm:$0xff]  ;;  %v3394_v32 = vpack.c.bf16 %v1469_v59, %v1466_v28  ;;  %v1492_v28 = vld [vmem:[%s5476_s8 + $0x138] sm:$0xff]  ;;  %v1491_v59 = vld [vmem:[%s5476_s8 + $0x130] sm:$0xff] }
 0x36a   : > { %v4373_v34 = vpop.eup %3732 }
 0x36b   : > { %v1216_v35 = vadd.f32 %v1214_v10, %v1204_v33  ;;  %v1281_v60 = vmul.f32 %v4373_v34, %v3918_v5  ;;  %v1468_v10 = vld [vmem:[%s5476_s8 + $0x78] sm:$0xff]  ;;  %v1467_v33 = vld [vmem:[%s5476_s8 + $0x70] sm:$0xff] }
 0x36c   : > { %v1264_v39 = vpop.permute.xlu0 %1263 }
 0x36d   : > { %v1236_v37 = vadd.f32 %v1232_v36, %v1216_v35  ;;  %1285 = vrot.lane.b32.xlu1 %v1281_v60, %s5509_s17  ;;  %v1470_v35 = vld [vmem:[%s5476_s8 + $0x88] sm:$0xff]  ;;  %v1472_v60 = vld [vmem:[%s5476_s8 + $0x98] sm:$0xff]  ;;  %v1475_v36 = vld [vmem:[%s5476_s8 + $0xb0] sm:$0xff] }
 0x36f   : > { %v1248_v58 = vadd.f32 %v1246_v38, %v1236_v37  ;;  %v3396_v37 = vpack.c.bf16 %v1468_v10, %v1465_v30  ;;  %v3425_v38 = vpack.c.bf16 %v1470_v35, %v1467_v33  ;;  %v1494_v30 = vld [vmem:[%s5476_s8 + $0x148] sm:$0xff]  ;;  %v1499_v10 = vld [vmem:[%s5476_s8 + $0x170] sm:$0xff] }
 0x370   : > { %v3437_v35 = vpack.c.bf16 %v1494_v30, %v1491_v59 }
 0x371   : > { %v1268_v41 = vadd.f32 %v1264_v39, %v1248_v58  ;;  %v1471_v58 = vld [vmem:[%s5476_s8 + $0x90] sm:$0xff]  ;;  %v3398_v39 = vpack.c.bf16 %v1475_v36, %v1472_v60 }
 0x372   : > { %v1495_v60 = vld [vmem:[%s5476_s8 + $0x150] sm:$0xff] }
 0x373   : > { %v3157_v42 = vmul.f32 -1.442695, %v1268_v41  ;;  %v1474_v41 = vld [vmem:[%s5476_s8 + $0xa8] sm:$0xff] }
 0x375   : > { %3734 = vpow2.f32 %v3157_v42  ;;  %v1473_v42 = vld [vmem:[%s5476_s8 + $0xa0] sm:$0xff] }
 0x37f   : > { %v3735_v62 = vpop.eup %3734 }
 0x380   : > { %v1276_v43 = vadd.f32 1.0, %v3735_v62  ;;  %v1476_v62 = vld [vmem:[%s5476_s8 + $0xb8] sm:$0xff] }
 0x382   : > { %3736 = vrcp.f32 %v1276_v43  ;;  %v1478_v43 = vld [vmem:[%s5476_s8 + $0xc8] sm:$0xff] }
 0x38c   : > { %v4380_v45 = vpop.eup %3736 }
 0x38d   : > { %v1282_v5 = vmul.f32 %v4380_v45, %v3923_v6  ;;  %v1454_v6 = vld [vmem:[%s5476_s8 + $0x8] sm:$0xff] }
 0x38f   : > { %1287 = vrot.lane.b32.xlu0 %v1282_v5, %s5509_s17  ;;  %v1481_v5 = vld [vmem:[%s5476_s8 + $0xe0] sm:$0xff] }
 0x3df   : > { %v1286_v47 = vpop.permute.xlu1 %1285 }
 0x3e0   : > { %v1291_v21 = vsel %vm616_vm3, %v3940_v13, %v1286_v47  ;;  %v1457_v13 = vld [vmem:[%s5476_s8 + $0x20] sm:$0xff]  ;;  %v3400_v47 = vpack.c.bf16 %v1474_v41, %v1471_v58  ;;  %v1500_v58 = vld [vmem:[%s5476_s8 + $0x178] sm:$0xff] }
 0x3e1   : > { %3241 = vmatprep.subr.mxu1 %v1291_v21  ;;  %v3386_v52 = vpack.c.bf16 %v1457_v13, %v1454_v6  ;;  %v1480_v6 = vld [vmem:[%s5476_s8 + $0xd8] sm:$0xff]  ;;  %v1479_v13 = vld [vmem:[%s5476_s8 + $0xd0] sm:$0xff] }
 0x3e2   : > { %3242 = vmatpush3.msra.mxu1 %v1291_v21  ;;  %v3428_v21 = vpack.c.bf16 %v1476_v62, %v1473_v42  ;;  %v1502_v42 = vld [vmem:[%s5476_s8 + $0x188] sm:$0xff]  ;;  %v1501_v62 = vld [vmem:[%s5476_s8 + $0x180] sm:$0xff] }
 0x3e3   : > { %3244 = vmatmul.mubr.msk.f32.vlgmr.msra.gmra.mrb[4].mxu1 %vm619_vm1, %v3947_v17 }
 0x3e4   : > { %3248 = vmatprep.mubr.msk.f32.mxu1 %vm619_vm1, %v3928_v7  ;;  %v1453_v7 = vld [vmem:[%s5476_s8] sm:$0xff] }
 0x401   : > { %v1288_v48 = vpop.permute.xlu0 %1287 }
 0x402   : > { %v1292_v51 = vsel %vm616_vm3, %v3937_v12, %v1288_v48  ;;  %v1456_v12 = vld [vmem:[%s5476_s8 + $0x18] sm:$0xff]  ;;  %v1477_v48 = vld [vmem:[%s5476_s8 + $0xc0] sm:$0xff] }
 0x403   : > { %3246 = vmatprep.subr.mxu1 %v1292_v51  ;;  %v3388_v56 = vpack.c.bf16 %v1456_v12, %v1453_v7  ;;  %v1482_v7 = vld [vmem:[%s5476_s8 + $0xe8] sm:$0xff]  ;;  %v1487_v12 = vld [vmem:[%s5476_s8 + $0x110] sm:$0xff] }
 0x404   : > { %3247 = vmatpush3.msra.mxu1 %v1292_v51  ;;  %v3402_v51 = vpack.c.bf16 %v1481_v5, %v1478_v43  ;;  %v1503_v43 = vld [vmem:[%s5476_s8 + $0x190] sm:$0xff] }
 0x405   : > { %3249 = vmatmul.mubr.msk.f32.vlgmr.msra.gmra.mrb[6].mxu1 %vm619_vm1, %v3947_v17  ;;  %v1455_v17 = vld [vmem:[%s5476_s8 + $0x10] sm:$0xff]  ;;  %3387 = vmatprep.subr.bf16.mxu1 %v3386_v52  ;;  %v1484_v52 = vld [vmem:[%s5476_s8 + $0xf8] sm:$0xff] }
 0x406   : > { %v3419_v0 = vpack.c.bf16 %v1458_v54, %v1455_v17  ;;  %3389 = vmatpush1.bf16.msra.mxu1 %v3388_v56  ;;  %v3404_v17 = vpack.c.bf16 %v1480_v6, %v1477_v48  ;;  %v3431_v54 = vpack.c.bf16 %v1482_v7, %v1479_v13  ;;  %v1483_v56 = vld [vmem:[%s5476_s8 + $0xf0] sm:$0xff]  ;;  %v4567_v7 = vld [vmem:[%s5507_s28] sm:$0xff] }
 0x407   : > { %3391 = vmatprep.subr.bf16.mxu1 %v3390_v15  ;;  %v1490_v15 = vld [vmem:[%s5476_s8 + $0x128] sm:$0xff]  ;;  %v3408_v19 = vpack.c.bf16 %v1486_v55, %v1483_v56 }
 0x408   : > { %3420 = vmatpush1.bf16.msra.mxu0 %v3419_v0  ;;  %v3406_v0 = vpack.c.bf16 %v1487_v12, %v1484_v52 }
 0x409   : > { %3421 = vmatprep.subr.bf16.mxu0 %v3770_v61 }
 0x40a   : > { %3393 = vmatpush1.bf16.msra.mxu1 %v3392_v23  ;;  %v1489_v23 = vld [vmem:[%s5476_s8 + $0x120] sm:$0xff] }
 0x40b   : > { %3395 = vmatprep.subr.bf16.mxu1 %v3394_v32  ;;  %v1496_v32 = vld [vmem:[%s5476_s8 + $0x158] sm:$0xff]  ;;  %v3412_v33 = vpack.c.bf16 %v1492_v28, %v1489_v23 }
 0x40c   : > { %3423 = vmatpush1.bf16.msra.mxu0 %v3422_v24  ;;  %v3410_v24 = vpack.c.bf16 %v1493_v14, %v1490_v15  ;;  %v3414_v36 = vpack.c.bf16 %v1499_v10, %v1496_v32 }
 0x40d   : > { %3424 = vmatprep.subr.bf16.mxu0 %v3770_v61 }
 0x40e   : > { %3397 = vmatpush1.bf16.msra.mxu1 %v3396_v37  ;;  %v1498_v37 = vld [vmem:[%s5476_s8 + $0x168] sm:$0xff] }
 0x40f   : > { %3399 = vmatprep.subr.bf16.mxu1 %v3398_v39  ;;  %v3416_v39 = vpack.c.bf16 %v1498_v37, %v1495_v60  ;;  %v3755_v60 = vld [vmem:[%s5473_s5] sm:$0xff] }
 0x410   : > { %3426 = vmatpush1.bf16.msra.mxu0 %v3425_v38  ;;  %v1497_v38 = vld [vmem:[%s5476_s8 + $0x160] sm:$0xff] }
 0x411   : > { %3427 = vmatprep.subr.bf16.mxu0 %v3770_v61  ;;  %v3440_v41 = vpack.c.bf16 %v1500_v58, %v1497_v38  ;;  %v1660_v38 = vld [vmem:[%s5477_s9] sm:$0xff] }
 0x412   : > { %3401 = vmatpush1.bf16.msra.mxu1 %v3400_v47 }
 0x413   : > { %3403 = vmatprep.subr.bf16.mxu1 %v3402_v51 }
 0x414   : > { %3429 = vmatpush1.bf16.msra.mxu0 %v3428_v21 }
 0x415   : > { %3430 = vmatprep.subr.bf16.mxu0 %v3770_v61 }
 0x416   : > { %3405 = vmatpush1.bf16.msra.mxu1 %v3404_v17 }
 0x417   : > { %3407 = vmatprep.subr.bf16.mxu1 %v3406_v0 }
 0x418   : > { %3432 = vmatpush1.bf16.msra.mxu0 %v3431_v54 }
 0x419   : > { %3433 = vmatprep.subr.bf16.mxu0 %v3770_v61 }
 0x41a   : > { %3409 = vmatpush1.bf16.msra.mxu1 %v3408_v19 }
 0x41b   : > { %3411 = vmatprep.subr.bf16.mxu1 %v3410_v24 }
 0x41c   : > { %3435 = vmatpush1.bf16.msra.mxu0 %v3434_v22 }
 0x41d   : > { %3436 = vmatprep.subr.bf16.mxu0 %v3770_v61 }
 0x41e   : > { %3413 = vmatpush1.bf16.msra.mxu1 %v3412_v33 }
 0x41f   : > { %3415 = vmatprep.subr.bf16.mxu1 %v3414_v36  ;;  %v3756_v36 = vld [vmem:[%s5473_s5 + $0x8] sm:$0xff] }
 0x420   : > { %3438 = vmatpush1.bf16.msra.mxu0 %v3437_v35 }
 0x421   : > { %3439 = vmatprep.subr.bf16.mxu0 %v3770_v61 }
 0x422   : > { %3417 = vmatpush1.bf16.msra.mxu1 %v3416_v39 }
 0x423   : > { %1540 = vmatprep.subr.mxu1 %v1502_v42 }
 0x424   : > { %3441 = vmatpush1.bf16.msra.mxu0 %v3440_v41 }
 0x425   : > { %1617 = vmatprep.subr.mxu0 %v3780_v46 }
 0x426   : > { %1541 = vmatpush1.msra.mxu1 %v1501_v62 }
 0x428   : > { %1618 = vmatpush1.msra.mxu0 %v1503_v43 }
 0x4b6   : > { %v3245_v5 = vpop.f32.mrb[4].mxu1 }
 0x4b7   : > { %1369 = vrot.lane.b32.xlu1 %v3245_v5, %s5510_s30  ;;  %v1359_v47 = vpop.f32.mrb[5].mxu1 }
 0x4d8   : > { %v3250_v46 = vpop.f32.mrb[6].mxu1 }
 0x4d9   : > { %1449 = vrot.lane.b32.xlu0 %v3250_v46, %s5510_s30  ;;  %v1439_v21 = vpop.f32.mrb[7].mxu1 }
 0x529   : > { %v1370_v48 = vpop.permute.xlu1 %1369 }
 0x52a   : > { %3162 = vmatprep.mubr.msk.f32.mxu1 %vm619_vm1, %v1370_v48  ;;  %3164 = vmatprep.mubr.msk.f32.mxu0 %vm619_vm1, %v1370_v48  ;;  %v1372_v51 = vsel %vm705_vm4, %v1359_v47, %v1370_v48 }
 0x52b   : > { %1573 = vmatmul.mubr.f32.vlgmr.msra.gmra.mrb[8].mxu1 %v1372_v51  ;;  %1650 = vmatmul.mubr.f32.vlgmr.msra.gmra.mrb[12].mxu0 %v1372_v51 }
 0x54b   : > { %v1450_v6 = vpop.permute.xlu0 %1449 }
 0x54c   : > { %3163 = vmatprep.mubr.msk.f32.mxu1 %vm619_vm1, %v1450_v6  ;;  %3165 = vmatprep.mubr.msk.f32.mxu0 %vm619_vm1, %v1450_v6  ;;  %v1452_v13 = vsel %vm705_vm4, %v1439_v21, %v1450_v6 }
 0x54d   : > { %1579 = vmatmul.mubr.f32.gmra.mrb[10].mxu1 %v1452_v13  ;;  %1655 = vmatmul.mubr.f32.gmra.mrb[14].mxu0 %v1452_v13 }
 0x54e   : > { %3253 = vmatprep.mubr.msk.f32.mxu1 %vm619_vm1, %v4567_v7 }
 0x5fe   : > { %v1574_v52 = vpop.f32.mrb[8].mxu1  ;;  %v1651_v12 = vpop.f32.mrb[12].mxu0 }
 0x5ff   : > { %v1576_v17 = vpop.f32.mrb[9].mxu1  ;;  %v1653_v54 = vpop.f32.mrb[13].mxu0  ;;  %v1678_v56 = vmul.f32 %v1574_v52, %v4335_v29  ;;  %v1666_v0 = vmul.f32 %v1574_v52, %v4263_v50  ;;  %v1690_v55 = vmul.f32 %v1574_v52, %v4261_v49  ;;  %v1746_v14 = vmul.f32 %v1651_v12, %v4294_v4 }
 0x600   : > { %v1706_v3 = vmul.f32 %v1576_v17, %v4271_v57  ;;  %v1718_v2 = vmul.f32 %v1576_v17, %v4345_v40  ;;  %v1730_v15 = vmul.f32 %v1576_v17, %v4288_v1  ;;  %v1662_v37 = vmul.f32 %v1574_v52, %v4332_v27 }
 0x601   : > { %1682 = vrot.lane.b32.xlu0 %v1678_v56, %s5511_s25  ;;  %1670 = vrot.lane.b32.xlu1 %v1666_v0, %s5497_s20  ;;  %v1702_v47 = vmul.f32 %v1576_v17, %v4340_v31  ;;  %v1742_v52 = vmul.f32 %v1651_v12, %v4349_v44  ;;  %v1661_v17 = vld [vmem:[%s5477_s9 + $0x8] sm:$0xff] }
 0x602   : > { %v1664_v58 = vadd.f32 %v1662_v37, %v1660_v38 }
 0x605   : > { %1694 = vrot.lane.b32.xlu1 %v1690_v55, %s5495_s27  ;;  %1710 = vrot.lane.b32.xlu0 %v1706_v3, %s5497_s20 }
 0x609   : > { %1722 = vrot.lane.b32.xlu1 %v1718_v2, %s5511_s25  ;;  %1734 = vrot.lane.b32.xlu0 %v1730_v15, %s5495_s27 }
 0x60d   : > { %1750 = vrot.lane.b32.xlu1 %v1746_v14, %s5497_s20 }
 0x620   : > { %v1580_v19 = vpop.f32.mrb[10].mxu1  ;;  %v1656_v22 = vpop.f32.mrb[14].mxu0 }
 0x621   : > { %v1582_v23 = vpop.f32.mrb[11].mxu1  ;;  %v1658_v24 = vpop.f32.mrb[15].mxu0  ;;  %v1667_v28 = vmul.f32 %v1580_v19, %v4299_v8  ;;  %v1679_v59 = vmul.f32 %v1580_v19, %v4361_v18  ;;  %v1691_v30 = vmul.f32 %v1580_v19, %v4304_v9  ;;  %v1747_v35 = vmul.f32 %v1656_v22, %v4326_v25 }
 0x622   : > { %v1707_v32 = vmul.f32 %v1582_v23, %v4308_v16  ;;  %v1719_v10 = vmul.f32 %v1582_v23, %v4365_v26  ;;  %v1731_v33 = vmul.f32 %v1582_v23, %v4314_v20  ;;  %v1663_v2 = vmul.f32 %v1580_v19, %v4352_v53 }
 0x623   : > { %1672 = vrot.lane.b32.xlu0 %v1667_v28, %s5497_s20  ;;  %1684 = vrot.lane.b32.xlu1 %v1679_v59, %s5511_s25  ;;  %v1743_v37 = vmul.f32 %v1656_v22, %v4369_v11 }
 0x624   : > { %v1665_v15 = vadd.f32 %v1663_v2, %v1661_v17  ;;  %v4657_v17 = vld [vmem:[%s5507_s28 + $0x8] sm:$0xff] }
 0x627   : > { %1696 = vrot.lane.b32.xlu0 %v1691_v30, %s5495_s27  ;;  %1712 = vrot.lane.b32.xlu1 %v1707_v32, %s5497_s20  ;;  %v1703_v32 = vmul.f32 %v1582_v23, %v4354_v63  ;;  %v1784_v23 = vld [vmem:[%s5478_s10] sm:$0xff] }
 0x62b   : > { %1724 = vrot.lane.b32.xlu0 %v1719_v10, %s5511_s25  ;;  %1736 = vrot.lane.b32.xlu1 %v1731_v33, %s5495_s27 }
 0x62f   : > { %1760 = vrot.lane.b32.xlu1 %v3755_v60, %s5495_s27  ;;  %1752 = vrot.lane.b32.xlu0 %v1747_v35, %s5497_s20 }
 0x633   : > { %1762 = vrot.lane.b32.xlu1 %v3756_v36, %s5495_s27 }
 0x673   : > { %v1683_v39 = vpop.permute.xlu0 %1682  ;;  %v1671_v41 = vpop.permute.xlu1 %1670 }
 0x674   : > { %v1676_v42 = vadd.f32 %v1671_v41, %v1664_v58 }
 0x676   : > { %v1688_v62 = vadd.f32 %v1683_v39, %v1676_v42 }
 0x677   : > { %v1695_v43 = vpop.permute.xlu1 %1694  ;;  %v1711_v46 = vpop.permute.xlu0 %1710 }
 0x678   : > { %v1700_v5 = vadd.f32 %v1695_v43, %v1688_v62  ;;  %v1768_v43 = vsub.f32 1.0, %v4373_v34 }
 0x67a   : > { %v1704_v21 = vadd.f32 %v1702_v47, %v1700_v5 }
 0x67b   : > { %v1723_v51 = vpop.permute.xlu1 %1722  ;;  %v1735_v13 = vpop.permute.xlu0 %1734 }
 0x67c   : > { %v1716_v48 = vadd.f32 %v1711_v46, %v1704_v21  ;;  %v4631_v21 = vld [vmem:[%s5479_s11] sm:$0xff] }
 0x67e   : > { %v1728_v6 = vadd.f32 %v1723_v51, %v1716_v48  ;;  %v1785_v48 = vld [vmem:[%s5478_s10 + $0x8] sm:$0xff] }
 0x67f   : > { %v1751_v0 = vpop.permute.xlu1 %1750 }
 0x680   : > { %v1740_v54 = vadd.f32 %v1735_v13, %v1728_v6 }
 0x682   : > { %v1744_v56 = vadd.f32 %v1742_v52, %v1740_v54 }
 0x684   : > { %v1756_v55 = vadd.f32 %v1751_v0, %v1744_v56  ;;  %v4645_v56 = vld [vmem:[%s5479_s11 + $0x8] sm:$0xff] }
 0x686   : > { %3738 = vtanh.f32 %v1756_v55 }
 0x690   : > { %v3739_v3 = vpop.eup %3738 }
 0x691   : > { %1772 = vrot.lane.b32.xlu0 %v3739_v3, %s5495_s27 }
 0x695   : > { %v1673_v14 = vpop.permute.xlu0 %1672  ;;  %v1685_v24 = vpop.permute.xlu1 %1684 }
 0x696   : > { %v1677_v28 = vadd.f32 %v1673_v14, %v1665_v15 }
 0x698   : > { %v1689_v59 = vadd.f32 %v1685_v24, %v1677_v28 }
 0x699   : > { %v1697_v12 = vpop.permute.xlu0 %1696  ;;  %v1713_v10 = vpop.permute.xlu1 %1712 }
 0x69a   : > { %v1701_v30 = vadd.f32 %v1697_v12, %v1689_v59  ;;  %v1978_v12 = vld [vmem:[%s5480_s12 + $0x8] sm:$0xff] }
 0x69c   : > { %v1705_v33 = vadd.f32 %v1703_v32, %v1701_v30  ;;  %v1983_v30 = vld [vmem:[%s5480_s12 + $0x30] sm:$0xff]  ;;  %v1977_v32 = vld [vmem:[%s5480_s12] sm:$0xff] }
 0x69d   : > { %v1725_v60 = vpop.permute.xlu0 %1724  ;;  %v1737_v36 = vpop.permute.xlu1 %1736 }
 0x69e   : > { %v1717_v35 = vadd.f32 %v1713_v10, %v1705_v33  ;;  %v3442_v10 = vpack.c.bf16 %v1983_v30, %v1978_v12  ;;  %v1982_v33 = vld [vmem:[%s5480_s12 + $0x28] sm:$0xff]  ;;  %v2007_v12 = vld [vmem:[%s5480_s12 + $0xf0] sm:$0xff] }
 0x6a0   : > { %v1729_v19 = vadd.f32 %v1725_v60, %v1717_v35  ;;  %v1980_v35 = vld [vmem:[%s5480_s12 + $0x18] sm:$0xff]  ;;  %v1985_v60 = vld [vmem:[%s5480_s12 + $0x40] sm:$0xff] }
 0x6a1   : > { %v1753_v39 = vpop.permute.xlu0 %1752  ;;  %v1761_v62 = vpop.permute.xlu1 %1760 }
 0x6a2   : > { %v1741_v38 = vadd.f32 %v1737_v36, %v1729_v19  ;;  %v1766_v22 = vmul.f32 %v4373_v34, %v1761_v62  ;;  %v1769_v34 = vsub.f32 1.0, %v4380_v45  ;;  %v3444_v19 = vpack.c.bf16 %v1982_v33, %v1977_v32  ;;  %v2010_v33 = vld [vmem:[%s5480_s12 + $0x108] sm:$0xff] }
 0x6a3   : > { %v3490_v36 = vpack.c.bf16 %v1985_v60, %v1980_v35  ;;  %v2015_v35 = vld [vmem:[%s5480_s12 + $0x130] sm:$0xff] }
 0x6a4   : > { %v1745_v58 = vadd.f32 %v1743_v37, %v1741_v38  ;;  %v1979_v37 = vld [vmem:[%s5480_s12 + $0x10] sm:$0xff]  ;;  %v1984_v38 = vld [vmem:[%s5480_s12 + $0x38] sm:$0xff]  ;;  %v3502_v60 = vpack.c.bf16 %v2015_v35, %v2010_v33  ;;  %v2042_v33 = vld [vmem:[%s5480_s12 + $0x208] sm:$0xff] }
 0x6a5   : > { %v1763_v51 = vpop.permute.xlu1 %1762  ;;  %3491 = vmatprep.subr.bf16.mxu0 %v3490_v36  ;;  %v2014_v36 = vld [vmem:[%s5480_s12 + $0x128] sm:$0xff]  ;;  %v2039_v35 = vld [vmem:[%s5480_s12 + $0x1f0] sm:$0xff] }
 0x6a6   : > { %v1757_v41 = vadd.f32 %v1753_v39, %v1745_v58  ;;  %v1767_v13 = vmul.f32 %v4380_v45, %v1763_v51  ;;  %v1988_v58 = vld [vmem:[%s5480_s12 + $0x58] sm:$0xff]  ;;  %v3492_v39 = vpack.c.bf16 %v1984_v38, %v1979_v37  ;;  %v1998_v51 = vld [vmem:[%s5480_s12 + $0xa8] sm:$0xff]  ;;  %v2023_v38 = vld [vmem:[%s5480_s12 + $0x170] sm:$0xff] }
 0x6a7   : > { %v2018_v37 = vld [vmem:[%s5480_s12 + $0x148] sm:$0xff] }
 0x6a8   : > { %3740 = vtanh.f32 %v1757_v41  ;;  %v1993_v41 = vld [vmem:[%s5480_s12 + $0x80] sm:$0xff]  ;;  %3493 = vmatpush1.bf16.msra.mxu0 %v3492_v39  ;;  %v2020_v39 = vld [vmem:[%s5480_s12 + $0x158] sm:$0xff] }
 0x6a9   : > { %v3446_v62 = vpack.c.bf16 %v1993_v41, %v1988_v58  ;;  %v2025_v41 = vld [vmem:[%s5480_s12 + $0x180] sm:$0xff] }
 0x6b2   : > { %v3741_v42 = vpop.eup %3740 }
 0x6b3   : > { %1774 = vrot.lane.b32.xlu0 %v3741_v42, %s5495_s27  ;;  %v1987_v42 = vld [vmem:[%s5480_s12 + $0x50] sm:$0xff] }
 0x6b7   : > { %1796 = vrot.lane.b32.xlu0 %v1784_v23, %s5495_s27  ;;  %v1992_v23 = vld [vmem:[%s5480_s12 + $0x78] sm:$0xff] }
 0x703   : > { %v1773_v5 = vpop.permute.xlu0 %1772 }
 0x704   : > { %v1778_v47 = vmul.f32 %v1773_v5, %v1768_v43  ;;  %v3448_v43 = vpack.c.bf16 %v1992_v23, %v1987_v42  ;;  %v1990_v5 = vld [vmem:[%s5480_s12 + $0x68] sm:$0xff]  ;;  %v3458_v23 = vpack.c.bf16 %v2023_v38, %v2018_v37  ;;  %v2053_v37 = vld [vmem:[%s5480_s12 + $0x260] sm:$0xff] }
 0x705   : > { %v2050_v38 = vld [vmem:[%s5480_s12 + $0x248] sm:$0xff] }
 0x706   : > { %v1780_v46 = vadd.f32 %v1778_v47, %v1766_v22  ;;  %v1995_v22 = vld [vmem:[%s5480_s12 + $0x90] sm:$0xff]  ;;  %v1989_v47 = vld [vmem:[%s5480_s12 + $0x60] sm:$0xff] }
 0x708   : > { %1788 = vrot.lane.b32.xlu1 %v1780_v46, %s5497_s20  ;;  %v3494_v46 = vpack.c.bf16 %v1995_v22, %v1990_v5  ;;  %v2019_v5 = vld [vmem:[%s5480_s12 + $0x150] sm:$0xff]  ;;  %v3506_v22 = vpack.c.bf16 %v2025_v41, %v2020_v39 }
 0x70a   : > { %3495 = vmatprep.subr.bf16.mxu0 %v3494_v46  ;;  %v2028_v46 = vld [vmem:[%s5480_s12 + $0x198] sm:$0xff] }
 0x70c   : > { %1807 = vrot.lane.b32.xlu1 %v4631_v21, %s5511_s25 }
 0x710   : > { %1798 = vrot.lane.b32.xlu1 %v1785_v48, %s5495_s27  ;;  %v1994_v48 = vld [vmem:[%s5480_s12 + $0x88] sm:$0xff]  ;;  %s3786_s27 = smov 1  }
 0x725   : > { %v1775_v6 = vpop.permute.xlu0 %1774 }
 0x726   : > { %v1779_v52 = vmul.f32 %v1775_v6, %v1769_v34  ;;  %v2003_v34 = vld [vmem:[%s5480_s12 + $0xd0] sm:$0xff]  ;;  %v3496_v6 = vpack.c.bf16 %v1994_v48, %v1989_v47  ;;  %v2024_v47 = vld [vmem:[%s5480_s12 + $0x178] sm:$0xff]  ;;  %v2033_v48 = vld [vmem:[%s5480_s12 + $0x1c0] sm:$0xff] }
 0x728   : > { %v1781_v54 = vadd.f32 %v1779_v52, %v1767_v13  ;;  %v3450_v13 = vpack.c.bf16 %v2003_v34, %v1998_v51  ;;  %v1997_v52 = vld [vmem:[%s5480_s12 + $0xa0] sm:$0xff]  ;;  %3497 = vmatpush1.bf16.msra.mxu0 %v3496_v6  ;;  %v2030_v51 = vld [vmem:[%s5480_s12 + $0x1a8] sm:$0xff]  ;;  %v2035_v34 = vld [vmem:[%s5480_s12 + $0x1d0] sm:$0xff] }
 0x729   : > { %v1797_v55 = vpop.permute.xlu0 %1796 }
 0x72a   : > { %1790 = vrot.lane.b32.xlu0 %v1781_v54, %s5497_s20  ;;  %v2002_v54 = vld [vmem:[%s5480_s12 + $0xc8] sm:$0xff] }
 0x72e   : > { %1809 = vrot.lane.b32.xlu0 %v4645_v56, %s5511_s25 }
 0x77a   : > { %v1789_v0 = vpop.permute.xlu1 %1788 }
 0x77b   : > { %v4650_v3 = vsel %vm1802_vm5, %v1789_v0, %v1797_v55  ;;  %v2000_v0 = vld [vmem:[%s5480_s12 + $0xb8] sm:$0xff]  ;;  %v2005_v55 = vld [vmem:[%s5480_s12 + $0xe0] sm:$0xff] }
 0x77e   : > { %v1808_v45 = vpop.permute.xlu1 %1807 }
 0x77f   : > { %v1814_v2 = vsel %vm1813_vm6, %v4650_v3, %v1808_v45  ;;  %v1999_v45 = vld [vmem:[%s5480_s12 + $0xb0] sm:$0xff] }
 0x780   : > { %3251 = vmatprep.subr.mxu1 %v1814_v2 }
 0x781   : > { %3252 = vmatpush3.msra.mxu1 %v1814_v2  ;;  %v2004_v2 = vld [vmem:[%s5480_s12 + $0xd8] sm:$0xff] }
 0x782   : > { %3254 = vmatmul.mubr.msk.f32.vlgmr.msra.gmra.mrb[12].mxu1 %vm619_vm1, %v4657_v17  ;;  %v1799_v14 = vpop.permute.xlu1 %1798  ;;  %v3500_v30 = vpack.c.bf16 %v2004_v2, %v1999_v45  ;;  %v3510_v45 = vpack.c.bf16 %v2035_v34, %v2030_v51  ;;  %v2034_v2 = vld [vmem:[%s5480_s12 + $0x1c8] sm:$0xff]  ;;  %v2065_v51 = vld [vmem:[%s5480_s12 + $0x2c0] sm:$0xff] }
 0x783   : > { %3258 = vmatprep.mubr.msk.f32.mxu1 %vm619_vm1, %v4567_v7 }
 0x79c   : > { %v1791_v15 = vpop.permute.xlu0 %1790 }
 0x79d   : > { %v4664_v24 = vsel %vm1802_vm5, %v1791_v15, %v1799_v14  ;;  %v3452_v15 = vpack.c.bf16 %v2002_v54, %v1997_v52  ;;  %v3498_v14 = vpack.c.bf16 %v2005_v55, %v2000_v0  ;;  %v3462_v52 = vpack.c.bf16 %v2033_v48, %v2028_v46  ;;  %v2027_v54 = vld [vmem:[%s5480_s12 + $0x190] sm:$0xff]  ;;  %v2032_v0 = vld [vmem:[%s5480_s12 + $0x1b8] sm:$0xff]  ;;  %v2029_v55 = vld [vmem:[%s5480_s12 + $0x1a0] sm:$0xff] }
 0x79e   : > { %v2063_v46 = vld [vmem:[%s5480_s12 + $0x2b0] sm:$0xff]  ;;  %v2060_v48 = vld [vmem:[%s5480_s12 + $0x298] sm:$0xff] }
 0x79f   : > { %3499 = vmatprep.subr.bf16.mxu0 %v3498_v14  ;;  %v2043_v14 = vld [vmem:[%s5480_s12 + $0x210] sm:$0xff] }
 0x7a0   : > { %v1810_v28 = vpop.permute.xlu0 %1809  ;;  %3501 = vmatpush1.bf16.msra.mxu0 %v3500_v30  ;;  %v3512_v30 = vpack.c.bf16 %v2034_v2, %v2029_v55  ;;  %v3522_v55 = vpack.c.bf16 %v2065_v51, %v2060_v48  ;;  %v2068_v2 = vld [vmem:[%s5480_s12 + $0x2d8] sm:$0xff]  ;;  %v2095_v48 = vld [vmem:[%s5480_s12 + $0x3b0] sm:$0xff] }
 0x7a1   : > { %v1815_v59 = vsel %vm1813_vm6, %v4664_v24, %v1810_v28  ;;  %v2008_v28 = vld [vmem:[%s5480_s12 + $0xf8] sm:$0xff]  ;;  %3503 = vmatprep.subr.bf16.mxu0 %v3502_v60 }
 0x7a2   : > { %3256 = vmatprep.subr.mxu1 %v1815_v59 }
 0x7a3   : > { %3257 = vmatpush3.msra.mxu1 %v1815_v59  ;;  %v2013_v59 = vld [vmem:[%s5480_s12 + $0x120] sm:$0xff] }
 0x7a4   : > { %3259 = vmatmul.mubr.msk.f32.vlgmr.msra.gmra.mrb[14].mxu1 %vm619_vm1, %v4657_v17  ;;  %3443 = vmatprep.subr.bf16.mxu1 %v3442_v10  ;;  %v3454_v32 = vpack.c.bf16 %v2013_v59, %v2008_v28  ;;  %v2012_v10 = vld [vmem:[%s5480_s12 + $0x118] sm:$0xff]  ;;  %v2045_v59 = vld [vmem:[%s5480_s12 + $0x220] sm:$0xff] }
 0x7a5   : > { %3445 = vmatpush1.bf16.msra.mxu1 %v3444_v19  ;;  %v2009_v19 = vld [vmem:[%s5480_s12 + $0x100] sm:$0xff]  ;;  %v3456_v58 = vpack.c.bf16 %v2012_v10, %v2007_v12  ;;  %v2040_v28 = vld [vmem:[%s5480_s12 + $0x1f8] sm:$0xff]  ;;  %v3464_v12 = vpack.c.bf16 %v2032_v0, %v2027_v54  ;;  %v2062_v54 = vld [vmem:[%s5480_s12 + $0x2a8] sm:$0xff] }
 0x7a6   : > { %3447 = vmatprep.subr.bf16.mxu1 %v3446_v62  ;;  %v3504_v42 = vpack.c.bf16 %v2014_v36, %v2009_v19  ;;  %v2017_v62 = vld [vmem:[%s5480_s12 + $0x140] sm:$0xff]  ;;  %v3514_v60 = vpack.c.bf16 %v2045_v59, %v2040_v28  ;;  %v2044_v19 = vld [vmem:[%s5480_s12 + $0x218] sm:$0xff]  ;;  %v2059_v0 = vld [vmem:[%s5480_s12 + $0x290] sm:$0xff] }
 0x7a7   : > { %v2037_v10 = vld [vmem:[%s5480_s12 + $0x1e0] sm:$0xff]  ;;  %v2048_v36 = vld [vmem:[%s5480_s12 + $0x238] sm:$0xff]  ;;  %v3516_v41 = vpack.c.bf16 %v2044_v19, %v2039_v35  ;;  %v2075_v28 = vld [vmem:[%s5480_s12 + $0x310] sm:$0xff] }
 0x7a8   : > { %3505 = vmatpush1.bf16.msra.mxu0 %v3504_v42  ;;  %v3468_v39 = vpack.c.bf16 %v2042_v33, %v2037_v10  ;;  %v3470_v42 = vpack.c.bf16 %v2053_v37, %v2048_v36  ;;  %v2072_v10 = vld [vmem:[%s5480_s12 + $0x2f8] sm:$0xff]  ;;  %v2069_v33 = vld [vmem:[%s5480_s12 + $0x2e0] sm:$0xff]  ;;  %v2078_v19 = vld [vmem:[%s5480_s12 + $0x328] sm:$0xff] }
 0x7a9   : > { %3449 = vmatpush1.bf16.msra.mxu1 %v3448_v43  ;;  %v2022_v43 = vld [vmem:[%s5480_s12 + $0x168] sm:$0xff]  ;;  %3507 = vmatprep.subr.bf16.mxu0 %v3506_v22  ;;  %v2083_v36 = vld [vmem:[%s5480_s12 + $0x350] sm:$0xff]  ;;  %v2080_v37 = vld [vmem:[%s5480_s12 + $0x338] sm:$0xff] }
 0x7aa   : > { %3451 = vmatprep.subr.bf16.mxu1 %v3450_v13  ;;  %v3460_v6 = vpack.c.bf16 %v2022_v43, %v2017_v62  ;;  %v3508_v13 = vpack.c.bf16 %v2024_v47, %v2019_v5  ;;  %v2052_v62 = vld [vmem:[%s5480_s12 + $0x258] sm:$0xff]  ;;  %v2049_v43 = vld [vmem:[%s5480_s12 + $0x240] sm:$0xff]  ;;  %v2054_v22 = vld [vmem:[%s5480_s12 + $0x268] sm:$0xff] }
 0x7ab   : > { %v2058_v47 = vld [vmem:[%s5480_s12 + $0x288] sm:$0xff] }
 0x7ac   : > { %3509 = vmatpush1.bf16.msra.mxu0 %v3508_v13  ;;  %v3474_v13 = vpack.c.bf16 %v2063_v46, %v2058_v47  ;;  %v2093_v47 = vld [vmem:[%s5480_s12 + $0x3a0] sm:$0xff]  ;;  %v2090_v46 = vld [vmem:[%s5480_s12 + $0x388] sm:$0xff] }
 0x7ad   : > { %3453 = vmatpush1.bf16.msra.mxu1 %v3452_v15  ;;  %v2038_v15 = vld [vmem:[%s5480_s12 + $0x1e8] sm:$0xff]  ;;  %3511 = vmatprep.subr.bf16.mxu0 %v3510_v45  ;;  %v2064_v45 = vld [vmem:[%s5480_s12 + $0x2b8] sm:$0xff] }
 0x7ae   : > { %3455 = vmatprep.subr.bf16.mxu1 %v3454_v32  ;;  %v3466_v32 = vpack.c.bf16 %v2043_v14, %v2038_v15  ;;  %v2073_v15 = vld [vmem:[%s5480_s12 + $0x300] sm:$0xff]  ;;  %v2070_v14 = vld [vmem:[%s5480_s12 + $0x2e8] sm:$0xff] }
 0x7af   : > { %v3526_v35 = vpack.c.bf16 %v2075_v28, %v2070_v14 }
 0x7b0   : > { %3513 = vmatpush1.bf16.msra.mxu0 %v3512_v30  ;;  %v3478_v30 = vpack.c.bf16 %v2073_v15, %v2068_v2 }
 0x7b1   : > { %3457 = vmatpush1.bf16.msra.mxu1 %v3456_v58  ;;  %v2055_v58 = vld [vmem:[%s5480_s12 + $0x270] sm:$0xff]  ;;  %3515 = vmatprep.subr.bf16.mxu0 %v3514_v60  ;;  %v2074_v60 = vld [vmem:[%s5480_s12 + $0x308] sm:$0xff] }
 0x7b2   : > { %3459 = vmatprep.subr.bf16.mxu1 %v3458_v23  ;;  %v2047_v23 = vld [vmem:[%s5480_s12 + $0x230] sm:$0xff]  ;;  %v3518_v5 = vpack.c.bf16 %v2055_v58, %v2050_v38  ;;  %v2085_v38 = vld [vmem:[%s5480_s12 + $0x360] sm:$0xff] }
 0x7b3   : > { %v3472_v34 = vpack.c.bf16 %v2052_v62, %v2047_v23  ;;  %v2082_v23 = vld [vmem:[%s5480_s12 + $0x348] sm:$0xff]  ;;  %v2079_v62 = vld [vmem:[%s5480_s12 + $0x330] sm:$0xff] }
 0x7b4   : > { %3517 = vmatpush1.bf16.msra.mxu0 %v3516_v41  ;;  %v3482_v41 = vpack.c.bf16 %v2083_v36, %v2078_v19  ;;  %v2001_v36 = vld [vmem:[%s5480_s12 + $0xc0] sm:$0xff] }
 0x7b5   : > { %3461 = vmatpush1.bf16.msra.mxu1 %v3460_v6  ;;  %v3520_v6 = vpack.c.bf16 %v2054_v22, %v2049_v43  ;;  %3519 = vmatprep.subr.bf16.mxu0 %v3518_v5  ;;  %v3530_v43 = vpack.c.bf16 %v2085_v38, %v2080_v37  ;;  %v2084_v5 = vld [vmem:[%s5480_s12 + $0x358] sm:$0xff]  ;;  %v2006_v37 = vld [vmem:[%s5480_s12 + $0xe8] sm:$0xff] }
 0x7b6   : > { %3463 = vmatprep.subr.bf16.mxu1 %v3462_v52  ;;  %v2057_v52 = vld [vmem:[%s5480_s12 + $0x280] sm:$0xff]  ;;  %v2088_v22 = vld [vmem:[%s5480_s12 + $0x378] sm:$0xff]  ;;  %v3545_v38 = vpack.c.bf16 %v2006_v37, %v2001_v36 }
 0x7b7   : > { %v3476_v59 = vpack.c.bf16 %v2062_v54, %v2057_v52  ;;  %v2092_v52 = vld [vmem:[%s5480_s12 + $0x398] sm:$0xff]  ;;  %v3534_v54 = vpack.c.bf16 %v2095_v48, %v2090_v46  ;;  %v2046_v46 = vld [vmem:[%s5480_s12 + $0x228] sm:$0xff] }
 0x7b8   : > { %3521 = vmatpush1.bf16.msra.mxu0 %v3520_v6  ;;  %v3486_v6 = vpack.c.bf16 %v2093_v47, %v2088_v22  ;;  %v2041_v47 = vld [vmem:[%s5480_s12 + $0x200] sm:$0xff] }
 0x7b9   : > { %3465 = vmatpush1.bf16.msra.mxu1 %v3464_v12  ;;  %v3524_v12 = vpack.c.bf16 %v2064_v45, %v2059_v0  ;;  %3523 = vmatprep.subr.bf16.mxu0 %v3522_v55  ;;  %v2089_v0 = vld [vmem:[%s5480_s12 + $0x380] sm:$0xff]  ;;  %v2094_v55 = vld [vmem:[%s5480_s12 + $0x3a8] sm:$0xff]  ;;  %v3557_v48 = vpack.c.bf16 %v2046_v46, %v2041_v47 }
 0x7ba   : > { %3467 = vmatprep.subr.bf16.mxu1 %v3466_v32  ;;  %v2067_v32 = vld [vmem:[%s5480_s12 + $0x2d0] sm:$0xff]  ;;  %v3536_v2 = vpack.c.bf16 %v2094_v55, %v2089_v0  ;;  %v2076_v55 = vld [vmem:[%s5480_s12 + $0x318] sm:$0xff] }
 0x7bb   : > { %v3480_v58 = vpack.c.bf16 %v2072_v10, %v2067_v32  ;;  %v2071_v0 = vld [vmem:[%s5480_s12 + $0x2f0] sm:$0xff] }
 0x7bc   : > { %3525 = vmatpush1.bf16.msra.mxu0 %v3524_v12  ;;  %v1981_v12 = vld [vmem:[%s5480_s12 + $0x20] sm:$0xff] }
 0x7bd   : > { %3469 = vmatpush1.bf16.msra.mxu1 %v3468_v39  ;;  %v3528_v39 = vpack.c.bf16 %v2074_v60, %v2069_v33  ;;  %3527 = vmatprep.subr.bf16.mxu0 %v3526_v35  ;;  %v1991_v33 = vld [vmem:[%s5480_s12 + $0x70] sm:$0xff]  ;;  %v1996_v35 = vld [vmem:[%s5480_s12 + $0x98] sm:$0xff] }
 0x7be   : > { %3471 = vmatprep.subr.bf16.mxu1 %v3470_v42  ;;  %v2077_v42 = vld [vmem:[%s5480_s12 + $0x320] sm:$0xff]  ;;  %v3542_v19 = vpack.c.bf16 %v1996_v35, %v1991_v33 }
 0x7bf   : > { %v3484_v51 = vpack.c.bf16 %v2082_v23, %v2077_v42  ;;  %v2021_v42 = vld [vmem:[%s5480_s12 + $0x160] sm:$0xff]  ;;  %v2026_v23 = vld [vmem:[%s5480_s12 + $0x188] sm:$0xff] }
 0x7c0   : > { %3529 = vmatpush1.bf16.msra.mxu0 %v3528_v39  ;;  %v2016_v39 = vld [vmem:[%s5480_s12 + $0x138] sm:$0xff] }
 0x7c1   : > { %3473 = vmatpush1.bf16.msra.mxu1 %v3472_v34  ;;  %v3532_v34 = vpack.c.bf16 %v2084_v5, %v2079_v62  ;;  %3531 = vmatprep.subr.bf16.mxu0 %v3530_v43  ;;  %v3551_v62 = vpack.c.bf16 %v2026_v23, %v2021_v42  ;;  %v2031_v43 = vld [vmem:[%s5480_s12 + $0x1b0] sm:$0xff]  ;;  %v2036_v5 = vld [vmem:[%s5480_s12 + $0x1d8] sm:$0xff] }
 0x7c2   : > { %3475 = vmatprep.subr.bf16.mxu1 %v3474_v13  ;;  %v2087_v13 = vld [vmem:[%s5480_s12 + $0x370] sm:$0xff]  ;;  %v3554_v22 = vpack.c.bf16 %v2036_v5, %v2031_v43 }
 0x7c3   : > { %v3488_v45 = vpack.c.bf16 %v2092_v52, %v2087_v13  ;;  %v2061_v13 = vld [vmem:[%s5480_s12 + $0x2a0] sm:$0xff]  ;;  %v2066_v52 = vld [vmem:[%s5480_s12 + $0x2c8] sm:$0xff] }
 0x7c4   : > { %3533 = vmatpush1.bf16.msra.mxu0 %v3532_v34  ;;  %v2056_v34 = vld [vmem:[%s5480_s12 + $0x278] sm:$0xff] }
 0x7c5   : > { %3477 = vmatpush1.bf16.msra.mxu1 %v3476_v59  ;;  %3535 = vmatprep.subr.bf16.mxu0 %v3534_v54  ;;  %v3563_v54 = vpack.c.bf16 %v2066_v52, %v2061_v13  ;;  %v2330_v13 = vld [vmem:[%s5481_s13] sm:$0xff] }
 0x7c6   : > { %3479 = vmatprep.subr.bf16.mxu1 %v3478_v30  ;;  %v1986_v30 = vld [vmem:[%s5480_s12 + $0x48] sm:$0xff] }
 0x7c7   : > { %v3539_v32 = vpack.c.bf16 %v1986_v30, %v1981_v12  ;;  %v2091_v12 = vld [vmem:[%s5480_s12 + $0x390] sm:$0xff]  ;;  %v2096_v30 = vld [vmem:[%s5480_s12 + $0x3b8] sm:$0xff] }
 0x7c8   : > { %3537 = vmatpush1.bf16.msra.mxu0 %v3536_v2 }
 0x7c9   : > { %3481 = vmatpush1.bf16.msra.mxu1 %v3480_v58  ;;  %v2011_v58 = vld [vmem:[%s5480_s12 + $0x110] sm:$0xff] }
 0x7ca   : > { %3483 = vmatprep.subr.bf16.mxu1 %v3482_v41  ;;  %v3548_v41 = vpack.c.bf16 %v2016_v39, %v2011_v58 }
 0x7cd   : > { %3485 = vmatpush1.bf16.msra.mxu1 %v3484_v51  ;;  %v2051_v51 = vld [vmem:[%s5480_s12 + $0x250] sm:$0xff] }
 0x7ce   : > { %3487 = vmatprep.subr.bf16.mxu1 %v3486_v6  ;;  %v3560_v6 = vpack.c.bf16 %v2056_v34, %v2051_v51 }
 0x7d1   : > { %3489 = vmatpush1.bf16.msra.mxu1 %v3488_v45 }
 0x7d2   : > { %3538 = vmatprep.subr.bf16.mxu1 %v3770_v61 }
 0x855   : > { %v3255_v15 = vpop.f32.mrb[12].mxu1 }
 0x856   : > { %1892 = vrot.lane.b32.xlu1 %v3255_v15, %s5512_s24  ;;  %v1882_v14 = vpop.f32.mrb[13].mxu1  ;;  %v3566_v15 = vpack.c.bf16 %v2076_v55, %v2071_v0 }
 0x877   : > { %v3260_v28 = vpop.f32.mrb[14].mxu1 }
 0x878   : > { %1973 = vrot.lane.b32.xlu0 %v3260_v28, %s5512_s24  ;;  %v1963_v59 = vpop.f32.mrb[15].mxu1  ;;  %v2086_v28 = vld [vmem:[%s5480_s12 + $0x368] sm:$0xff] }
 0x8c8   : > { %v1893_v10 = vpop.permute.xlu1 %1892 }
 0x8c9   : > { %3170 = vmatprep.mubr.msk.f32.mxu1 %vm1813_vm6, %v1893_v10  ;;  %3172 = vmatprep.mubr.msk.f32.mxu0 %vm1813_vm6, %v1893_v10  ;;  %v4976_v60 = vsel %vm1895_vm7, %v1882_v14, %v1893_v10  ;;  %v2081_v14 = vld [vmem:[%s5480_s12 + $0x340] sm:$0xff] }
 0x8ca   : > { %2166 = vmatmul.mubr.f32.vlgmr.msra.gmra.mrb[16].mxu1 %v4976_v60  ;;  %2243 = vmatmul.mubr.f32.vlgmr.msra.gmra.mrb[16].mxu0 %v4976_v60 }
 0x8cb   : > { %3540 = vmatpush1.bf16.msra.mxu1 %v3539_v32  ;;  %v3572_v32 = vpack.c.bf16 %v2096_v30, %v2091_v12 }
 0x8cc   : > { %3541 = vmatprep.subr.bf16.mxu1 %v3770_v61 }
 0x8cf   : > { %3543 = vmatpush1.bf16.msra.mxu1 %v3542_v19 }
 0x8d0   : > { %3544 = vmatprep.subr.bf16.mxu1 %v3770_v61 }
 0x8d3   : > { %3546 = vmatpush1.bf16.msra.mxu1 %v3545_v38 }
 0x8d4   : > { %3547 = vmatprep.subr.bf16.mxu1 %v3770_v61 }
 0x8d7   : > { %3549 = vmatpush1.bf16.msra.mxu1 %v3548_v41 }
 0x8d8   : > { %3550 = vmatprep.subr.bf16.mxu1 %v3770_v61 }
 0x8db   : > { %3552 = vmatpush1.bf16.msra.mxu1 %v3551_v62 }
 0x8dc   : > { %3553 = vmatprep.subr.bf16.mxu1 %v3770_v61 }
 0x8df   : > { %3555 = vmatpush1.bf16.msra.mxu1 %v3554_v22 }
 0x8e0   : > { %3556 = vmatprep.subr.bf16.mxu1 %v3770_v61 }
 0x8e3   : > { %3558 = vmatpush1.bf16.msra.mxu1 %v3557_v48 }
 0x8e4   : > { %3559 = vmatprep.subr.bf16.mxu1 %v3770_v61 }
 0x8e7   : > { %3561 = vmatpush1.bf16.msra.mxu1 %v3560_v6 }
 0x8e8   : > { %3562 = vmatprep.subr.bf16.mxu1 %v3770_v61 }
 0x8ea   : > { %v1974_v45 = vpop.permute.xlu0 %1973 }
 0x8eb   : > { %3564 = vmatpush1.bf16.msra.mxu1 %v3563_v54  ;;  %3171 = vmatprep.mubr.msk.f32.mxu1 %vm1813_vm6, %v1974_v45  ;;  %v1976_v2 = vsel %vm1895_vm7, %v1963_v59, %v1974_v45  ;;  %v3569_v59 = vpack.c.bf16 %v2086_v28, %v2081_v14 }
 0x8ec   : > { %3173 = vmatprep.mubr.msk.f32.mxu0 %vm1813_vm6, %v1974_v45  ;;  %2172 = vmatmul.mubr.f32.gmra.mrb[18].mxu1 %v1976_v2 }
 0x8ed   : > { %2249 = vmatmul.mubr.f32.gmra.mrb[18].mxu0 %v1976_v2  ;;  %3565 = vmatprep.subr.bf16.mxu1 %v3770_v61 }
 0x8ee   : > { %3174 = vmatprep.mubr.msk.f32.mxu1 %vm1813_vm6, %v1893_v10  ;;  %3263 = vmatprep.mubr.msk.f32.mxu0 %vm619_vm1, %v4567_v7 }
 0x8ef   : > { %3567 = vmatpush1.bf16.msra.mxu1 %v3566_v15 }
 0x8f0   : > { %3568 = vmatprep.subr.bf16.mxu1 %v3770_v61 }
 0x8f3   : > { %3570 = vmatpush1.bf16.msra.mxu1 %v3569_v59 }
 0x8f4   : > { %3571 = vmatprep.subr.bf16.mxu1 %v3770_v61 }
 0x8f7   : > { %3573 = vmatpush1.bf16.msra.mxu1 %v3572_v32 }
 0x8f8   : > { %3622 = vmatprep.subr.bf16.mxu1 %v3770_v61 }
 0x8fa   : > { %2320 = vmatmul.mubr.f32.vlgmr.msra.gmra.mrb[20].mxu1 %v4976_v60 }
 0x8fb   : > { %3175 = vmatprep.mubr.msk.f32.mxu1 %vm1813_vm6, %v1974_v45 }
 0x8fe   : > { %2325 = vmatmul.mubr.f32.gmra.mrb[22].mxu1 %v1976_v2 }
 0x99d   : > { %v2167_v10 = vpop.f32.mrb[16].mxu1  ;;  %v2244_v33 = vpop.f32.mrb[16].mxu0 }
 0x99e   : > { %v2336_v35 = vmul.f32 %v2167_v10, %v4263_v50  ;;  %v2169_v19 = vpop.f32.mrb[17].mxu1  ;;  %v2246_v36 = vpop.f32.mrb[17].mxu0  ;;  %v2368_v38 = vmul.f32 %v2244_v33, %v4271_v57  ;;  %v2332_v6 = vmul.f32 %v2167_v10, %v4332_v27  ;;  %v2364_v15 = vmul.f32 %v2244_v33, %v4340_v31 }
 0x99f   : > { %v2352_v37 = vmul.f32 %v2169_v19, %v4261_v49  ;;  %v2384_v60 = vmul.f32 %v2246_v36, %v4288_v1  ;;  %v2348_v0 = vmul.f32 %v2169_v19, %v4335_v29  ;;  %v2380_v12 = vmul.f32 %v2246_v36, %v4345_v40  ;;  %v2331_v19 = vld [vmem:[%s5481_s13 + $0x8] sm:$0xff] }
 0x9a0   : > { %2340 = vrot.lane.b32.xlu1 %v2336_v35, %s5511_s25  ;;  %v2334_v52 = vadd.f32 %v2332_v6, %v2330_v13 }
 0x9a4   : > { %2356 = vrot.lane.b32.xlu1 %v2352_v37, %s5511_s25 }
 0x9a8   : > { %2372 = vrot.lane.b32.xlu1 %v2368_v38, %s5511_s25 }
 0x9ac   : > { %2388 = vrot.lane.b32.xlu1 %v2384_v60, %s5511_s25 }
 0x9bf   : > { %v2173_v58 = vpop.f32.mrb[18].mxu1 }
 0x9c0   : > { %v2337_v39 = vmul.f32 %v2173_v58, %v4299_v8  ;;  %v2250_v41 = vpop.f32.mrb[18].mxu0  ;;  %v2175_v42 = vpop.f32.mrb[19].mxu1  ;;  %v2333_v60 = vmul.f32 %v2173_v58, %v4352_v53 }
 0x9c1   : > { %v2252_v23 = vpop.f32.mrb[19].mxu0  ;;  %v2353_v62 = vmul.f32 %v2175_v42, %v4304_v9  ;;  %v2369_v43 = vmul.f32 %v2250_v41, %v4308_v16 }
 0x9c2   : > { %2342 = vrot.lane.b32.xlu0 %v2337_v39, %s5511_s25  ;;  %v2385_v5 = vmul.f32 %v2252_v23, %v4314_v20  ;;  %v2335_v39 = vadd.f32 %v2333_v60, %v2331_v19  ;;  %v2596_v60 = vld [vmem:[%s5482_s14] sm:$0xff] }
 0x9c6   : > { %2358 = vrot.lane.b32.xlu0 %v2353_v62, %s5511_s25  ;;  %v2349_v62 = vmul.f32 %v2175_v42, %v4361_v18 }
 0x9ca   : > { %2374 = vrot.lane.b32.xlu0 %v2369_v43, %s5511_s25 }
 0x9cd   : > { %v2321_v22 = vpop.f32.mrb[20].mxu1 }
 0x9ce   : > { %v2400_v47 = vmul.f32 %v2321_v22, %v4294_v4  ;;  %v2323_v46 = vpop.f32.mrb[21].mxu1  ;;  %2390 = vrot.lane.b32.xlu0 %v2385_v5, %s5511_s25  ;;  %v2396_v35 = vmul.f32 %v2321_v22, %v4349_v44 }
 0x9d0   : > { %2404 = vrot.lane.b32.xlu1 %v2400_v47, %s5511_s25  ;;  %v2365_v47 = vmul.f32 %v2250_v41, %v4354_v63 }
 0x9d1   : > { %v2326_v48 = vpop.f32.mrb[22].mxu1 }
 0x9d2   : > { %v2401_v51 = vmul.f32 %v2326_v48, %v4326_v25  ;;  %v2328_v34 = vpop.f32.mrb[23].mxu1 }
 0x9d3   : > { %v2381_v34 = vmul.f32 %v2252_v23, %v4365_v26 }
 0x9d4   : > { %2406 = vrot.lane.b32.xlu0 %v2401_v51, %s5511_s25 }
 0xa12   : > { %v2341_v54 = vpop.permute.xlu1 %2340 }
 0xa13   : > { %v2346_v55 = vadd.f32 %v2341_v54, %v2334_v52  ;;  %v2397_v52 = vmul.f32 %v2326_v48, %v4369_v11 }
 0xa15   : > { %v2350_v45 = vadd.f32 %v2348_v0, %v2346_v55 }
 0xa16   : > { %v2357_v2 = vpop.permute.xlu1 %2356 }
 0xa17   : > { %v2362_v14 = vadd.f32 %v2357_v2, %v2350_v45 }
 0xa19   : > { %v2366_v28 = vadd.f32 %v2364_v15, %v2362_v14 }
 0xa1a   : > { %v2373_v59 = vpop.permute.xlu1 %2372 }
 0xa1b   : > { %v2378_v30 = vadd.f32 %v2373_v59, %v2366_v28 }
 0xa1d   : > { %v2382_v32 = vadd.f32 %v2380_v12, %v2378_v30 }
 0xa1e   : > { %v2389_v10 = vpop.permute.xlu1 %2388 }
 0xa1f   : > { %v2394_v37 = vadd.f32 %v2389_v10, %v2382_v32 }
 0xa21   : > { %v2398_v38 = vadd.f32 %v2396_v35, %v2394_v37 }
 0xa34   : > { %v2343_v33 = vpop.permute.xlu0 %2342 }
 0xa35   : > { %v2347_v43 = vadd.f32 %v2343_v33, %v2335_v39  ;;  %v2601_v39 = vld [vmem:[%s5482_s14 + $0x28] sm:$0xff] }
 0xa37   : > { %v2351_v5 = vadd.f32 %v2349_v62, %v2347_v43  ;;  %v2603_v43 = vld [vmem:[%s5482_s14 + $0x38] sm:$0xff] }
 0xa38   : > { %v2359_v36 = vpop.permute.xlu0 %2358 }
 0xa39   : > { %v2363_v46 = vadd.f32 %v2359_v36, %v2351_v5  ;;  %v2606_v5 = vld [vmem:[%s5482_s14 + $0x50] sm:$0xff] }
 0xa3a   : > { %v2602_v36 = vld [vmem:[%s5482_s14 + $0x30] sm:$0xff] }
 0xa3b   : > { %v2367_v51 = vadd.f32 %v2365_v47, %v2363_v46  ;;  %v3578_v47 = vpack.c.bf16 %v2606_v5, %v2603_v43  ;;  %v2605_v46 = vld [vmem:[%s5482_s14 + $0x48] sm:$0xff] }
 0xa3c   : > { %v2375_v22 = vpop.permute.xlu0 %2374  ;;  %v2629_v5 = vld [vmem:[%s5482_s14 + $0x108] sm:$0xff] }
 0xa3d   : > { %v2379_v6 = vadd.f32 %v2375_v22, %v2367_v51  ;;  %v2604_v51 = vld [vmem:[%s5482_s14 + $0x40] sm:$0xff]  ;;  %v2607_v22 = vld [vmem:[%s5482_s14 + $0x58] sm:$0xff] }
 0xa3f   : > { %v2383_v58 = vadd.f32 %v2381_v34, %v2379_v6  ;;  %v3580_v34 = vpack.c.bf16 %v2605_v46, %v2602_v36  ;;  %v3626_v6 = vpack.c.bf16 %v2607_v22, %v2604_v51  ;;  %v2628_v36 = vld [vmem:[%s5482_s14 + $0x100] sm:$0xff]  ;;  %v2633_v46 = vld [vmem:[%s5482_s14 + $0x128] sm:$0xff] }
 0xa40   : > { %v2391_v13 = vpop.permute.xlu0 %2390  ;;  %v2636_v51 = vld [vmem:[%s5482_s14 + $0x140] sm:$0xff] }
 0xa41   : > { %v2395_v54 = vadd.f32 %v2391_v13, %v2383_v58  ;;  %v2609_v58 = vld [vmem:[%s5482_s14 + $0x68] sm:$0xff]  ;;  %v2612_v13 = vld [vmem:[%s5482_s14 + $0x80] sm:$0xff] }
 0xa42   : > { %v2405_v0 = vpop.permute.xlu1 %2404 }
 0xa43   : > { %v2410_v55 = vadd.f32 %v2405_v0, %v2398_v38  ;;  %v2399_v45 = vadd.f32 %v2397_v52, %v2395_v54  ;;  %v2600_v38 = vld [vmem:[%s5482_s14 + $0x20] sm:$0xff]  ;;  %v3582_v54 = vpack.c.bf16 %v2612_v13, %v2609_v58  ;;  %v2611_v0 = vld [vmem:[%s5482_s14 + $0x78] sm:$0xff]  ;;  %v3598_v58 = vpack.c.bf16 %v2636_v51, %v2633_v46 }
 0xa44   : > { %v2608_v52 = vld [vmem:[%s5482_s14 + $0x60] sm:$0xff]  ;;  %v2635_v13 = vld [vmem:[%s5482_s14 + $0x138] sm:$0xff] }
 0xa45   : > { %v3176_v42 = vmul.f32 -1.442695, %v2410_v55  ;;  %v2610_v55 = vld [vmem:[%s5482_s14 + $0x70] sm:$0xff]  ;;  %v2656_v51 = vld [vmem:[%s5482_s14 + $0x1e0] sm:$0xff] }
 0xa46   : > { %v2407_v2 = vpop.permute.xlu0 %2406 }
 0xa47   : > { %3742 = vpow2.f32 %v3176_v42  ;;  %v2411_v15 = vadd.f32 %v2407_v2, %v2399_v45  ;;  %v2613_v45 = vld [vmem:[%s5482_s14 + $0x88] sm:$0xff]  ;;  %v2615_v42 = vld [vmem:[%s5482_s14 + $0x98] sm:$0xff]  ;;  %v2618_v2 = vld [vmem:[%s5482_s14 + $0xb0] sm:$0xff] }
 0xa49   : > { %v3177_v14 = vmul.f32 -1.442695, %v2411_v15  ;;  %v3584_v15 = vpack.c.bf16 %v2611_v0, %v2608_v52  ;;  %v2634_v52 = vld [vmem:[%s5482_s14 + $0x130] sm:$0xff]  ;;  %v2639_v0 = vld [vmem:[%s5482_s14 + $0x158] sm:$0xff] }
 0xa4b   : > { %3744 = vpow2.f32 %v3177_v14  ;;  %v3629_v14 = vpack.c.bf16 %v2613_v45, %v2610_v55  ;;  %v2642_v55 = vld [vmem:[%s5482_s14 + $0x170] sm:$0xff] }
 0xa51   : > { %v3743_v41 = vpop.eup %3742 }
 0xa52   : > { %v2418_v28 = vadd.f32 1.0, %v3743_v41  ;;  %v2614_v41 = vld [vmem:[%s5482_s14 + $0x90] sm:$0xff] }
 0xa54   : > { %3746 = vrcp.f32 %v2418_v28  ;;  %v3586_v28 = vpack.c.bf16 %v2618_v2, %v2615_v42  ;;  %v2638_v2 = vld [vmem:[%s5482_s14 + $0x150] sm:$0xff] }
 0xa55   : > { %v3745_v59 = vpop.eup %3744 }
 0xa56   : > { %v2419_v23 = vadd.f32 1.0, %v3745_v59  ;;  %v2617_v59 = vld [vmem:[%s5482_s14 + $0xa8] sm:$0xff] }
 0xa58   : > { %3748 = vrcp.f32 %v2419_v23  ;;  %v2616_v23 = vld [vmem:[%s5482_s14 + $0xa0] sm:$0xff] }
 0xa5e   : > { %v5096_v12 = vpop.eup %3746 }
 0xa5f   : > { %v2424_v48 = vmul.f32 %v5096_v12, %v4631_v21 }
 0xa61   : > { %2428 = vrot.lane.b32.xlu1 %v2424_v48, %s5511_s25  ;;  %v2619_v48 = vld [vmem:[%s5482_s14 + $0xb8] sm:$0xff] }
 0xa62   : > { %v5101_v30 = vpop.eup %3748 }
 0xa63   : > { %v2425_v32 = vmul.f32 %v5101_v30, %v4645_v56  ;;  %v2597_v56 = vld [vmem:[%s5482_s14 + $0x8] sm:$0xff] }
 0xa64   : > { %v3574_v19 = vpack.c.bf16 %v2600_v38, %v2597_v56  ;;  %v2623_v38 = vld [vmem:[%s5482_s14 + $0xd8] sm:$0xff] }
 0xa65   : > { %2430 = vrot.lane.b32.xlu0 %v2425_v32, %s5511_s25  ;;  %v2621_v32 = vld [vmem:[%s5482_s14 + $0xc8] sm:$0xff] }
 0xad3   : > { %v2429_v10 = vpop.permute.xlu1 %2428 }
 0xad4   : > { %v2434_v35 = vsel %vm1813_vm6, %v4650_v3, %v2429_v10  ;;  %v2624_v10 = vld [vmem:[%s5482_s14 + $0xe0] sm:$0xff] }
 0xad5   : > { %3261 = vmatprep.subr.mxu0 %v2434_v35  ;;  %v3590_v56 = vpack.c.bf16 %v2624_v10, %v2621_v32  ;;  %v2644_v10 = vld [vmem:[%s5482_s14 + $0x180] sm:$0xff] }
 0xad6   : > { %3262 = vmatpush3.msra.mxu0 %v2434_v35  ;;  %v3588_v35 = vpack.c.bf16 %v2617_v59, %v2614_v41  ;;  %v2640_v41 = vld [vmem:[%s5482_s14 + $0x160] sm:$0xff]  ;;  %v2645_v59 = vld [vmem:[%s5482_s14 + $0x188] sm:$0xff] }
 0xad7   : > { %3264 = vmatmul.mubr.msk.f32.vlgmr.msra.gmra.mrb[20].mxu0 %vm619_vm1, %v4657_v17  ;;  %v2431_v37 = vpop.permute.xlu0 %2430 }
 0xad8   : > { %v2435_v21 = vsel %vm1813_vm6, %v4664_v24, %v2431_v37  ;;  %3268 = vmatprep.mubr.msk.f32.mxu0 %vm619_vm1, %v4567_v7  ;;  %v2599_v7 = vld [vmem:[%s5482_s14 + $0x18] sm:$0xff]  ;;  %v3632_v37 = vpack.c.bf16 %v2619_v48, %v2616_v23  ;;  %v2648_v23 = vld [vmem:[%s5482_s14 + $0x1a0] sm:$0xff] }
 0xad9   : > { %3266 = vmatprep.subr.mxu0 %v2435_v21  ;;  %v3576_v33 = vpack.c.bf16 %v2599_v7, %v2596_v60  ;;  %v2622_v60 = vld [vmem:[%s5482_s14 + $0xd0] sm:$0xff]  ;;  %v2627_v7 = vld [vmem:[%s5482_s14 + $0xf8] sm:$0xff] }
 0xada   : > { %3267 = vmatpush3.msra.mxu0 %v2435_v21  ;;  %v2620_v21 = vld [vmem:[%s5482_s14 + $0xc0] sm:$0xff] }
 0xadb   : > { %3269 = vmatmul.mubr.msk.f32.vlgmr.msra.gmra.mrb[22].mxu0 %vm619_vm1, %v4657_v17  ;;  %v2598_v17 = vld [vmem:[%s5482_s14 + $0x10] sm:$0xff]  ;;  %3575 = vmatprep.subr.bf16.mxu0 %v3574_v19  ;;  %v2625_v19 = vld [vmem:[%s5482_s14 + $0xe8] sm:$0xff] }
 0xadc   : > { %v3623_v62 = vpack.c.bf16 %v2601_v39, %v2598_v17  ;;  %3577 = vmatpush1.bf16.msra.mxu0 %v3576_v33  ;;  %v2630_v17 = vld [vmem:[%s5482_s14 + $0x110] sm:$0xff]  ;;  %v3592_v39 = vpack.c.bf16 %v2623_v38, %v2620_v21  ;;  %v3635_v33 = vpack.c.bf16 %v2625_v19, %v2622_v60  ;;  %v2651_v38 = vld [vmem:[%s5482_s14 + $0x1b8] sm:$0xff] }
 0xadd   : > { %3579 = vmatprep.subr.bf16.mxu0 %v3578_v47  ;;  %v3594_v43 = vpack.c.bf16 %v2630_v17, %v2627_v7  ;;  %v2631_v47 = vld [vmem:[%s5482_s14 + $0x118] sm:$0xff]  ;;  %v2646_v21 = vld [vmem:[%s5482_s14 + $0x190] sm:$0xff] }
 0xade   : > { %3624 = vmatpush1.bf16.msra.mxu1 %v3623_v62  ;;  %v2626_v62 = vld [vmem:[%s5482_s14 + $0xf0] sm:$0xff] }
 0xadf   : > { %3625 = vmatprep.subr.bf16.mxu1 %v3770_v61  ;;  %v3596_v22 = vpack.c.bf16 %v2629_v5, %v2626_v62  ;;  %v2654_v60 = vld [vmem:[%s5482_s14 + $0x1d0] sm:$0xff]  ;;  %v2652_v62 = vld [vmem:[%s5482_s14 + $0x1c0] sm:$0xff]  ;;  %v2657_v5 = vld [vmem:[%s5482_s14 + $0x1e8] sm:$0xff] }
 0xae0   : > { %3581 = vmatpush1.bf16.msra.mxu0 %v3580_v34  ;;  %v3638_v34 = vpack.c.bf16 %v2631_v47, %v2628_v36  ;;  %v2650_v17 = vld [vmem:[%s5482_s14 + $0x1b0] sm:$0xff]  ;;  %v2660_v36 = vld [vmem:[%s5482_s14 + $0x200] sm:$0xff] }
 0xae1   : > { %3583 = vmatprep.subr.bf16.mxu0 %v3582_v54  ;;  %v2637_v54 = vld [vmem:[%s5482_s14 + $0x148] sm:$0xff] }
 0xae2   : > { %3627 = vmatpush1.bf16.msra.mxu1 %v3626_v6  ;;  %v2632_v6 = vld [vmem:[%s5482_s14 + $0x120] sm:$0xff]  ;;  %v3641_v42 = vpack.c.bf16 %v2637_v54, %v2634_v52  ;;  %v2666_v52 = vld [vmem:[%s5482_s14 + $0x230] sm:$0xff] }
 0xae3   : > { %3628 = vmatprep.subr.bf16.mxu1 %v3770_v61  ;;  %v3600_v45 = vpack.c.bf16 %v2635_v13, %v2632_v6  ;;  %v2658_v6 = vld [vmem:[%s5482_s14 + $0x1f0] sm:$0xff]  ;;  %v2663_v13 = vld [vmem:[%s5482_s14 + $0x218] sm:$0xff] }
 0xae4   : > { %3585 = vmatpush1.bf16.msra.mxu0 %v3584_v15  ;;  %v3602_v15 = vpack.c.bf16 %v2642_v55, %v2639_v0  ;;  %v2662_v55 = vld [vmem:[%s5482_s14 + $0x210] sm:$0xff] }
 0xae5   : > { %3587 = vmatprep.subr.bf16.mxu0 %v3586_v28  ;;  %v2643_v28 = vld [vmem:[%s5482_s14 + $0x178] sm:$0xff] }
 0xae6   : > { %3630 = vmatpush1.bf16.msra.mxu1 %v3629_v14  ;;  %v2641_v14 = vld [vmem:[%s5482_s14 + $0x168] sm:$0xff]  ;;  %v3644_v32 = vpack.c.bf16 %v2643_v28, %v2640_v41 }
 0xae7   : > { %3631 = vmatprep.subr.bf16.mxu1 %v3770_v61  ;;  %v3604_v48 = vpack.c.bf16 %v2641_v14, %v2638_v2  ;;  %v2664_v2 = vld [vmem:[%s5482_s14 + $0x220] sm:$0xff] }
 0xae8   : > { %3589 = vmatpush1.bf16.msra.mxu0 %v3588_v35  ;;  %v3606_v35 = vpack.c.bf16 %v2648_v23, %v2645_v59 }
 0xae9   : > { %3591 = vmatprep.subr.bf16.mxu0 %v3590_v56  ;;  %v2649_v56 = vld [vmem:[%s5482_s14 + $0x1a8] sm:$0xff] }
 0xaea   : > { %3633 = vmatpush1.bf16.msra.mxu1 %v3632_v37  ;;  %v2647_v37 = vld [vmem:[%s5482_s14 + $0x198] sm:$0xff]  ;;  %v3647_v7 = vpack.c.bf16 %v2649_v56, %v2646_v21 }
 0xaeb   : > { %3634 = vmatprep.subr.bf16.mxu1 %v3770_v61  ;;  %v3608_v19 = vpack.c.bf16 %v2647_v37, %v2644_v10 }
 0xaec   : > { %3593 = vmatpush1.bf16.msra.mxu0 %v3592_v39  ;;  %v3610_v39 = vpack.c.bf16 %v2654_v60, %v2651_v38 }
 0xaed   : > { %3595 = vmatprep.subr.bf16.mxu0 %v3594_v43  ;;  %v2655_v43 = vld [vmem:[%s5482_s14 + $0x1d8] sm:$0xff] }
 0xaee   : > { %3636 = vmatpush1.bf16.msra.mxu1 %v3635_v33  ;;  %v2653_v33 = vld [vmem:[%s5482_s14 + $0x1c8] sm:$0xff]  ;;  %v3650_v46 = vpack.c.bf16 %v2655_v43, %v2652_v62 }
 0xaef   : > { %3637 = vmatprep.subr.bf16.mxu1 %v3770_v61  ;;  %v3612_v47 = vpack.c.bf16 %v2653_v33, %v2650_v17 }
 0xaf0   : > { %3597 = vmatpush1.bf16.msra.mxu0 %v3596_v22  ;;  %v3614_v22 = vpack.c.bf16 %v2660_v36, %v2657_v5 }
 0xaf1   : > { %3599 = vmatprep.subr.bf16.mxu0 %v3598_v58  ;;  %v2661_v58 = vld [vmem:[%s5482_s14 + $0x208] sm:$0xff] }
 0xaf2   : > { %3639 = vmatpush1.bf16.msra.mxu1 %v3638_v34  ;;  %v2659_v34 = vld [vmem:[%s5482_s14 + $0x1f8] sm:$0xff]  ;;  %v3653_v0 = vpack.c.bf16 %v2661_v58, %v2658_v6 }
 0xaf3   : > { %3640 = vmatprep.subr.bf16.mxu1 %v3770_v61  ;;  %v3616_v54 = vpack.c.bf16 %v2659_v34, %v2656_v51  ;;  %v2825_v51 = vld [vmem:[%s5483_s15 + $0x8] sm:$0xff] }
 0xaf4   : > { %3601 = vmatpush1.bf16.msra.mxu0 %v3600_v45  ;;  %v3618_v45 = vpack.c.bf16 %v2666_v52, %v2663_v13 }
 0xaf5   : > { %3603 = vmatprep.subr.bf16.mxu0 %v3602_v15  ;;  %v2667_v15 = vld [vmem:[%s5482_s14 + $0x238] sm:$0xff] }
 0xaf6   : > { %3642 = vmatpush1.bf16.msra.mxu1 %v3641_v42  ;;  %v2665_v42 = vld [vmem:[%s5482_s14 + $0x228] sm:$0xff]  ;;  %v3656_v41 = vpack.c.bf16 %v2667_v15, %v2664_v2 }
 0xaf7   : > { %3643 = vmatprep.subr.bf16.mxu1 %v3770_v61  ;;  %v3620_v14 = vpack.c.bf16 %v2665_v42, %v2662_v55 }
 0xaf8   : > { %3605 = vmatpush1.bf16.msra.mxu0 %v3604_v48 }
 0xaf9   : > { %3607 = vmatprep.subr.bf16.mxu0 %v3606_v35 }
 0xafa   : > { %3645 = vmatpush1.bf16.msra.mxu1 %v3644_v32 }
 0xafb   : > { %3646 = vmatprep.subr.bf16.mxu1 %v3770_v61 }
 0xafc   : > { %3609 = vmatpush1.bf16.msra.mxu0 %v3608_v19 }
 0xafd   : > { %3611 = vmatprep.subr.bf16.mxu0 %v3610_v39 }
 0xafe   : > { %3648 = vmatpush1.bf16.msra.mxu1 %v3647_v7 }
 0xaff   : > { %3649 = vmatprep.subr.bf16.mxu1 %v3770_v61 }
 0xb00   : > { %3613 = vmatpush1.bf16.msra.mxu0 %v3612_v47 }
 0xb01   : > { %3615 = vmatprep.subr.bf16.mxu0 %v3614_v22 }
 0xb02   : > { %3651 = vmatpush1.bf16.msra.mxu1 %v3650_v46 }
 0xb03   : > { %3652 = vmatprep.subr.bf16.mxu1 %v3770_v61 }
 0xb04   : > { %3617 = vmatpush1.bf16.msra.mxu0 %v3616_v54 }
 0xb05   : > { %3619 = vmatprep.subr.bf16.mxu0 %v3618_v45 }
 0xb06   : > { %3654 = vmatpush1.bf16.msra.mxu1 %v3653_v0 }
 0xb07   : > { %3655 = vmatprep.subr.bf16.mxu1 %v3770_v61 }
 0xb08   : > { %3621 = vmatpush1.bf16.msra.mxu0 %v3620_v14 }
 0xb0a   : > { %3657 = vmatpush1.bf16.msra.mxu1 %v3656_v41 }
 0xbaa   : > { %v3265_v28 = vpop.f32.mrb[20].mxu0 }
 0xbab   : > { %2512 = vrot.lane.b32.xlu1 %v3265_v28, %s5512_s24  ;;  %v2502_v59 = vpop.f32.mrb[21].mxu0 }
 0xbae   : > { %v3270_v23 = vpop.f32.mrb[22].mxu0 }
 0xbaf   : > { %2592 = vrot.lane.b32.xlu0 %v3270_v23, %s5512_s24  ;;  %v2582_v48 = vpop.f32.mrb[23].mxu0 }
 0xc1d   : > { %v2513_v32 = vpop.permute.xlu1 %2512 }
 0xc1e   : > { %3182 = vmatprep.mubr.msk.f32.mxu0 %vm1813_vm6, %v2513_v32  ;;  %3184 = vmatprep.mubr.msk.f32.mxu1 %vm1813_vm6, %v2513_v32  ;;  %v2515_v10 = vsel %vm1895_vm7, %v2502_v59, %v2513_v32 }
 0xc1f   : > { %2737 = vmatmul.mubr.f32.vlgmr.msra.gmra.mrb[24].mxu0 %v2515_v10  ;;  %2814 = vmatmul.mubr.f32.vlgmr.msra.gmra.mrb[24].mxu1 %v2515_v10 }
 0xc21   : > { %v2593_v61 = vpop.permute.xlu0 %2592 }
 0xc22   : > { %3183 = vmatprep.mubr.msk.f32.mxu0 %vm1813_vm6, %v2593_v61  ;;  %3185 = vmatprep.mubr.msk.f32.mxu1 %vm1813_vm6, %v2593_v61  ;;  %v2595_v35 = vsel %vm1895_vm7, %v2582_v48, %v2593_v61 }
 0xc23   : > { %2743 = vmatmul.mubr.f32.gmra.mrb[26].mxu0 %v2595_v35  ;;  %2819 = vmatmul.mubr.f32.gmra.mrb[26].mxu1 %v2595_v35 }
 0xcf2   : > { %v2738_v37 = vpop.f32.mrb[24].mxu0  ;;  %v5351_v21 = vpop.f32.mrb[24].mxu1 }
 0xcf3   : > { %v2740_v56 = vpop.f32.mrb[25].mxu0  ;;  %v2817_v38 = vpop.f32.mrb[25].mxu1  ;;  %v2830_v60 = vmul.f32 %v2738_v37, %v4263_v50  ;;  %v2842_v33 = vmul.f32 %v2738_v37, %v4335_v29  ;;  %v2854_v43 = vmul.f32 %v2738_v37, %v4261_v49  ;;  %v2906_v10 = vmul.f32 %v5351_v21, %v4349_v44  ;;  %v2964_v44 = vld [vmem:[%s5484_s16] sm:$0xff] }
 0xcf4   : > { %v2870_v50 = vmul.f32 %v2740_v56, %v4271_v57  ;;  %v2894_v49 = vmul.f32 %v2740_v56, %v4288_v1  ;;  %v2910_v57 = vmul.f32 %v5351_v21, %v4294_v4  ;;  %v3758_v1 = vld [vmem:[%s5479_s11] sm:$0xff]  ;;  %v3759_v4 = vld [vmem:[%s5479_s11 + $0x8] sm:$0xff]  ;;  %v2866_v0 = vmul.f32 %v2740_v56, %v4340_v31 }
 0xcf5   : > { %2834 = vrot.lane.b32.xlu1 %v2830_v60, %s5512_s24  ;;  %v2965_v21 = vld [vmem:[%s5484_s16 + $0x8] sm:$0xff] }
 0xcf6   : > { %v2744_v19 = vpop.f32.mrb[26].mxu0  ;;  %v5355_v7 = vpop.f32.mrb[26].mxu1 }
 0xcf7   : > { %v2746_v17 = vpop.f32.mrb[27].mxu0  ;;  %v2822_v39 = vpop.f32.mrb[27].mxu1  ;;  %v2831_v62 = vmul.f32 %v2744_v19, %v4299_v8  ;;  %v2843_v5 = vmul.f32 %v2744_v19, %v4361_v18  ;;  %v2855_v36 = vmul.f32 %v2744_v19, %v4304_v9  ;;  %v2882_v8 = vmul.f32 %v2740_v56, %v4345_v40 }
 0xcf8   : > { %v2871_v29 = vmul.f32 %v2746_v17, %v4308_v16  ;;  %v2883_v18 = vmul.f32 %v2746_v17, %v4365_v26  ;;  %v2895_v9 = vmul.f32 %v2746_v17, %v4314_v20  ;;  %v2911_v16 = vmul.f32 %v5355_v7, %v4326_v25  ;;  %v2824_v25 = vld [vmem:[%s5483_s15] sm:$0xff] }
 0xcf9   : > { %2846 = vrot.lane.b32.xlu1 %v2842_v33, %s5511_s25  ;;  %2836 = vrot.lane.b32.xlu0 %v2831_v62, %s5512_s24  ;;  %v2826_v20 = vmul.f32 %v2738_v37, %v4332_v27  ;;  %v2827_v47 = vmul.f32 %v2744_v19, %v4352_v53  ;;  %v2867_v15 = vmul.f32 %v2746_v17, %v4354_v63  ;;  %v2966_v62 = vld [vmem:[%s5484_s16 + $0x10] sm:$0xff] }
 0xcfa   : > { %v2907_v60 = vmul.f32 %v5355_v7, %v4369_v11  ;;  %v3658_v7 = vpack.c.bf16 %v2965_v21, %v2964_v44 }
 0xcfb   : > { %v2828_v26 = vadd.f32 %v2826_v20, %v2824_v25  ;;  %v2829_v58 = vadd.f32 %v2827_v47, %v2825_v51 }
 0xcfc   : > { %3659 = vmatprep.subr.bf16.mxu0 %v3658_v7 }
 0xcfd   : > { %2858 = vrot.lane.b32.xlu1 %v2854_v43, %s5513_s3  ;;  %2848 = vrot.lane.b32.xlu0 %v2843_v5, %s5511_s25  ;;  %v2967_v43 = vld [vmem:[%s5484_s16 + $0x18] sm:$0xff] }
 0xcfe   : > { %v3662_v5 = vpack.c.bf16 %v2967_v43, %v2966_v62  ;;  %3661 = vmatpush3.bf16.msra.mxu0 %v3658_v7 }
 0xd00   : > { %3663 = vmatprep.subr.bf16.mxu0 %v3662_v5 }
 0xd01   : > { %2874 = vrot.lane.b32.xlu1 %v2870_v50, %s5512_s24  ;;  %2860 = vrot.lane.b32.xlu0 %v2855_v36, %s5513_s3  ;;  %v2968_v50 = vld [vmem:[%s5484_s16 + $0x20] sm:$0xff]  ;;  %v2969_v36 = vld [vmem:[%s5484_s16 + $0x28] sm:$0xff] }
 0xd02   : > { %3665 = vmatpush3.bf16.msra.mxu0 %v3662_v5 }
 0xd05   : > { %2886 = vrot.lane.b32.xlu1 %v2882_v8, %s5511_s25  ;;  %2876 = vrot.lane.b32.xlu0 %v2871_v29, %s5512_s24  ;;  %v3666_v29 = vpack.c.bf16 %v2969_v36, %v2968_v50 }
 0xd07   : > { %3667 = vmatprep.subr.bf16.mxu0 %v3666_v29 }
 0xd08   : > { %3669 = vmatpush3.bf16.msra.mxu0 %v3666_v29 }
 0xd09   : > { %2898 = vrot.lane.b32.xlu1 %v2894_v49, %s5513_s3  ;;  %2888 = vrot.lane.b32.xlu0 %v2883_v18, %s5511_s25  ;;  %v2970_v49 = vld [vmem:[%s5484_s16 + $0x30] sm:$0xff]  ;;  %v2971_v18 = vld [vmem:[%s5484_s16 + $0x38] sm:$0xff] }
 0xd0d   : > { %2914 = vrot.lane.b32.xlu1 %v2910_v57, %s5512_s24  ;;  %2900 = vrot.lane.b32.xlu0 %v2895_v9, %s5513_s3  ;;  %v3670_v57 = vpack.c.bf16 %v2971_v18, %v2970_v49  ;;  %v2972_v9 = vld [vmem:[%s5484_s16 + $0x40] sm:$0xff] }
 0xd0f   : > { %3671 = vmatprep.subr.bf16.mxu0 %v3670_v57 }
 0xd10   : > { %3673 = vmatpush3.bf16.msra.mxu0 %v3670_v57 }
 0xd11   : > { %2924 = vrot.lane.b32.xlu1 %v3758_v1, %s5513_s3  ;;  %2916 = vrot.lane.b32.xlu0 %v2911_v16, %s5512_s24  ;;  %v2973_v16 = vld [vmem:[%s5484_s16 + $0x48] sm:$0xff] }
 0xd12   : > { %v3674_v1 = vpack.c.bf16 %v2973_v16, %v2972_v9 }
 0xd14   : > { %3675 = vmatprep.subr.bf16.mxu0 %v3674_v1 }
 0xd15   : > { %2926 = vrot.lane.b32.xlu1 %v3759_v4, %s5513_s3  ;;  %3677 = vmatpush3.bf16.msra.mxu0 %v3674_v1  ;;  %v2975_v4 = vld [vmem:[%s5484_s16 + $0x58] sm:$0xff] }
 0xd67   : > { %v2835_v40 = vpop.permute.xlu1 %2834 }
 0xd68   : > { %v2840_v34 = vadd.f32 %v2835_v40, %v2828_v26  ;;  %v3068_v40 = vld [vmem:[%s3896_s21 + $0x8] sm:$0xff] }
 0xd6b   : > { %v2847_v46 = vpop.permute.xlu1 %2846  ;;  %v2837_v22 = vpop.permute.xlu0 %2836 }
 0xd6c   : > { %v2852_v6 = vadd.f32 %v2847_v46, %v2840_v34  ;;  %v2841_v27 = vadd.f32 %v2837_v22, %v2829_v58  ;;  %v2933_v34 = vsub.f32 1.0, %v5101_v30 }
 0xd6f   : > { %v2859_v13 = vpop.permute.xlu1 %2858  ;;  %v2849_v52 = vpop.permute.xlu0 %2848 }
 0xd70   : > { %v2864_v54 = vadd.f32 %v2859_v13, %v2852_v6  ;;  %v2853_v55 = vadd.f32 %v2849_v52, %v2841_v27  ;;  %v3067_v27 = vld [vmem:[%s3896_s21] sm:$0xff] }
 0xd72   : > { %v2868_v45 = vadd.f32 %v2866_v0, %v2864_v54 }
 0xd73   : > { %v2875_v42 = vpop.permute.xlu1 %2874  ;;  %v2861_v2 = vpop.permute.xlu0 %2860 }
 0xd74   : > { %v2865_v53 = vadd.f32 %v2861_v2, %v2853_v55  ;;  %v2880_v59 = vadd.f32 %v2875_v42, %v2868_v45  ;;  %v3186_v42 = vld [vmem:[#allocation3] ss:$0 sm:$0xff] }
 0xd76   : > { %v2869_v14 = vadd.f32 %v2867_v15, %v2865_v53 }
 0xd77   : > { %v2887_v41 = vpop.permute.xlu1 %2886  ;;  %v2877_v28 = vpop.permute.xlu0 %2876 }
 0xd78   : > { %v2892_v23 = vadd.f32 %v2887_v41, %v2880_v59  ;;  %v2881_v61 = vadd.f32 %v2877_v28, %v2869_v14 }
 0xd7b   : > { %v2899_v48 = vpop.permute.xlu1 %2898  ;;  %v2889_v32 = vpop.permute.xlu0 %2888 }
 0xd7c   : > { %v2904_v35 = vadd.f32 %v2899_v48, %v2892_v23  ;;  %v2893_v31 = vadd.f32 %v2889_v32, %v2881_v61 }
 0xd7e   : > { %v2908_v37 = vadd.f32 %v2906_v10, %v2904_v35 }
 0xd7f   : > { %v2915_v56 = vpop.permute.xlu1 %2914  ;;  %v2901_v38 = vpop.permute.xlu0 %2900 }
 0xd80   : > { %v2920_v63 = vadd.f32 %v2915_v56, %v2908_v37  ;;  %v2905_v19 = vadd.f32 %v2901_v38, %v2893_v31 }
 0xd82   : > { %3750 = vtanh.f32 %v2920_v63  ;;  %v2909_v17 = vadd.f32 %v2907_v60, %v2905_v19 }
 0xd83   : > { %v2917_v39 = vpop.permute.xlu0 %2916  ;;  %v2925_v25 = vpop.permute.xlu1 %2924 }
 0xd84   : > { %v2921_v33 = vadd.f32 %v2917_v39, %v2909_v17  ;;  %v2930_v47 = vmul.f32 %v5096_v12, %v2925_v25 }
 0xd86   : > { %3752 = vtanh.f32 %v2921_v33 }
 0xd87   : > { %v2927_v51 = vpop.permute.xlu1 %2926 }
 0xd88   : > { %v2931_v58 = vmul.f32 %v5101_v30, %v2927_v51 }
 0xd8c   : > { %v3751_v11 = vpop.eup %3750 }
 0xd8d   : > { %2936 = vrot.lane.b32.xlu0 %v3751_v11, %s5513_s3 }
 0xd90   : > { %v3753_v8 = vpop.eup %3752 }
 0xd91   : > { %2938 = vrot.lane.b32.xlu0 %v3753_v8, %s5513_s3 }
 0xd95   : > { %2956 = vrot.lane.b32.xlu0 %v4650_v3, %s5513_s3  ;;  %v2974_v3 = vld [vmem:[%s5484_s16 + $0x50] sm:$0xff] }
 0xd96   : > { %v3678_v20 = vpack.c.bf16 %v2975_v4, %v2974_v3 }
 0xd98   : > { %3679 = vmatprep.subr.bf16.mxu0 %v3678_v20 }
 0xd99   : > { %2958 = vrot.lane.b32.xlu0 %v4664_v24, %s5513_s3  ;;  %3681 = vmatpush3.bf16.msra.mxu0 %v3678_v20  ;;  %v2932_v24 = vsub.f32 1.0, %v5096_v12 }
 0xd9d   : > { %3073 = vrot.lane.b32.xlu0 %v3068_v40, %s3786_s27 }
 0xdff   : > { %v2937_v26 = vpop.permute.xlu0 %2936 }
 0xe00   : > { %v2942_v46 = vmul.f32 %v2937_v26, %v2932_v24 }
 0xe02   : > { %v2944_v22 = vadd.f32 %v2942_v46, %v2930_v47 }
 0xe03   : > { %v2939_v6 = vpop.permute.xlu0 %2938 }
 0xe04   : > { %v2943_v13 = vmul.f32 %v2939_v6, %v2933_v34  ;;  %2948 = vrot.lane.b32.xlu1 %v2944_v22, %s5512_s24 }
 0xe06   : > { %v2945_v52 = vadd.f32 %v2943_v13, %v2931_v58 }
 0xe07   : > { %v2957_v54 = vpop.permute.xlu0 %2956 }
 0xe08   : > { %2950 = vrot.lane.b32.xlu1 %v2945_v52, %s5512_s24 }
 0xe0b   : > { %v2959_v55 = vpop.permute.xlu0 %2958 }
 0xe0c   : > { %3071 = vrot.lane.b32.xlu1 %v3067_v27, %s3786_s27 }
 0xe0f   : > { %v3074_v53 = vpop.permute.xlu0 %3073 }
 0xe76   : > { %v2949_v0 = vpop.permute.xlu1 %2948 }
 0xe77   : > { %v2962_v12 = vsel %vm1802_vm5, %v2949_v0, %v2957_v54 }
 0xe78   : > { %3295 = vmatprep.mubr.msk.f32.mxu0 %vm1895_vm7, %v2962_v12 }
 0xe7a   : > { %v2951_v45 = vpop.permute.xlu1 %2950 }
 0xe7b   : > { %v2963_v30 = vsel %vm1802_vm5, %v2951_v45, %v2959_v55 }
 0xe7c   : > { %3296 = vmatmul.mubr.msk.f32.vlgmr.msra.gmra.mrb[28].mxu0 %vm1895_vm7, %v2963_v30 }
 0xe7e   : > { %v3072_v41 = vpop.permute.xlu1 %3071 }
 0xf4f   : > { %v3297_v2 = vpop.f32.mrb[28].mxu0 }
 0xf50   : > { %v3061_v15 = vadd.f32 %v3297_v2, %v3186_v42  ;;  %v3055_v14 = vpop.f32.mrb[29].mxu0 }
 0xf51   : > { %v3056_v28 = vadd.f32 %v3186_v42, %v3055_v14 }
 0xf52   : > { %3066 = vst.msk [vmem:[%s3901_s23 + $0x8] sm:$0xff] %vm3064_vm8, %v3061_v15  ;;  %v3078_v59 = vsel %vm3064_vm8, %v3061_v15, %v3074_v53 }
 0xf53   : > { %3065 = vst.msk [vmem:[%s3901_s23] sm:$0xff] %vm3064_vm8, %v3056_v28  ;;  %v3077_v23 = vsel %vm3064_vm8, %v3056_v28, %v3072_v41 }
 0xf54   : > { %3080 = vst.msk [vmem:[#allocation2 + $0x8] sm:$0xff] %vm605_vm2, %v3078_v59  ;;  %3079 = vst.msk [vmem:[#allocation2] sm:$0xff] %vm605_vm2, %v3077_v23 }
 0xf55 PF: > { %s30_s29 = sadd.s32 1, %s3766_s29  }
 0xf56   : > { %p27_p5 = scmp.ge.s32.totalorder %s30_s29, 4  }
 0xf58   :  { %29 = sbr.rel (!%p27_p5) target bundleno = 6 (0x6), region = 126 }

</bundles_post_ra>
